<compile_context>
chip_gen: v5e
topology: v5e:2x2
jax: 0.10.0
libtpu: 0.0.40
codegen_flags: <defaults>
</compile_context>

<pallas_src>
import jax
import jax.numpy as jnp
from jax import lax
from jax.experimental import pallas as pl
from jax.experimental.pallas import tpu as pltpu


def _round_up(n, m):
    return ((n + m - 1) // m) * m


def _choose_time_chunk(T, requested):
    """Prefer a divisor of T (no padded tail) unless it is much smaller."""
    tc_req = max(1, min(requested, T))
    best_div = 1
    for d in range(tc_req, 0, -1):
        if T % d == 0:
            best_div = d
            break
    return best_div if 2 * best_div >= tc_req else tc_req


_GATE_PERM = (0, 1, 3, 2)   # PyTorch [i, f, g, o] -> kernel [i, f, o, g]


def _make_lstm_kernel(T, Tc, Bp, Ip, Hp, compute_dtype, needs_mask, n_slabs):
    """Kernel factory closing over static shape/config parameters."""
    sps = Tc // n_slabs            # timesteps per projection slab
    H3 = 3 * Hp

    def kernel(x_ref, wih_ref, whh_ref, bias_ref, h0_ref, c0_ref,
               hseq_ref, hout_ref, cout_ref,
               gx_ref, h_st, c_st):
        chunk = pl.program_id(0)

        @pl.when(chunk == 0)
        def _():
            h_st[...] = h0_ref[...]
            c_st[...] = c0_ref[...]

        bias = bias_ref[...]                                   # (1, 4Hp) f32
        wih = wih_ref[...]                                     # (Ip, 4Hp)

        # ---- Hoisted input projection for the whole time chunk, written in
        # row slabs so step 0 only depends on slab 0 (lets the scheduler
        # overlap later projection MXU pushes with early-step gate work).
        for sl in range(n_slabs):
            t0 = sl * sps
            xs = x_ref[t0:t0 + sps].reshape(sps * Bp, Ip).astype(compute_dtype)
            gx_ref[t0 * Bp:(t0 + sps) * Bp, :] = (
                jnp.dot(xs, wih, preferred_element_type=jnp.float32) + bias)

        whh = whh_ref[...]                                     # (Hp, 4Hp)

        # ---- Serial recurrence over the chunk.  Only the (Bp,Hp)x(Hp,4Hp)
        # recurrent matmul + elementwise gates are on the critical path.
        def step(s, carry):
            h, c = carry
            row0 = pl.multiple_of(s * Bp, Bp)
            g = gx_ref[pl.ds(row0, Bp), :] + jnp.dot(
                h.astype(compute_dtype), whh,
                preferred_element_type=jnp.float32)            # (Bp, 4Hp) f32
            # Gate layout [ i | f | o | g ]: one wide sigmoid + one tanh.
            sg = jax.nn.sigmoid(g[:, :H3])
            gg = jnp.tanh(g[:, H3:])
            i_g = sg[:, 0 * Hp:1 * Hp]
            f_g = sg[:, 1 * Hp:2 * Hp]
            o_g = sg[:, 2 * Hp:3 * Hp]
            c_new = f_g * c + i_g * gg
            h_new = o_g * jnp.tanh(c_new)

            hseq_ref[s] = h_new.astype(hseq_ref.dtype)

            if needs_mask:
                # Padded tail timesteps must not advance the recurrent state.
                valid = (chunk * Tc + s) < T
                h_new = jnp.where(valid, h_new, h)
                c_new = jnp.where(valid, c_new, c)
            return h_new, c_new

        h, c = lax.fori_loop(0, Tc, step, (h_st[...], c_st[...]), unroll=True)

        h_st[...] = h
        c_st[...] = c

        @pl.when(chunk == pl.num_programs(0) - 1)
        def _():
            hout_ref[...] = h.astype(hout_ref.dtype)
            cout_ref[...] = c.astype(cout_ref.dtype)

    return kernel


def prepare_lstm_params(w_ih, w_hh, b_ih, b_hh, compute_dtype=jnp.bfloat16):
    """One-time weight prep (gate reorder + transpose + pad + fuse bias + cast).

    w_ih: (4H, I)  w_hh: (4H, H)  b_ih, b_hh: (4H,) in PyTorch layout
    (gate order [i, f, g, o]).  Gates are reordered to [i, f, o, g] so the
    three sigmoid gates occupy one contiguous (·, 3Hp) slice in the kernel.
    """
    w_ih = jnp.asarray(w_ih, jnp.float32)
    w_hh = jnp.asarray(w_hh, jnp.float32)
    bias = jnp.asarray(b_ih, jnp.float32) + jnp.asarray(b_hh, jnp.float32)

    four_h, I = w_ih.shape
    H = four_h // 4
    Hp = _round_up(H, 128)          # lane-aligned hidden size
    Ip = _round_up(I, 8)            # sublane-aligned input size
    perm = list(_GATE_PERM)

    # W_ih^T padded to (Ip, 4*Hp), gate k occupies columns [k*Hp, (k+1)*Hp).
    w4 = w_ih.reshape(4, H, I)[perm, :, :]
    w4 = jnp.pad(w4, ((0, 0), (0, Hp - H), (0, Ip - I)))         # (4,Hp,Ip)
    wih_t = jnp.transpose(w4, (2, 0, 1)).reshape(Ip, 4 * Hp)     # (Ip,4Hp)

    # W_hh^T padded to (Hp, 4*Hp).
    wh4 = w_hh.reshape(4, H, H)[perm, :, :]
    wh4 = jnp.pad(wh4, ((0, 0), (0, Hp - H), (0, Hp - H)))       # (4,Hp,Hp)
    whh_t = jnp.transpose(wh4, (2, 0, 1)).reshape(Hp, 4 * Hp)    # (Hp,4Hp)

    # Fused bias, added in f32 right after the input projection.
    b4 = jnp.pad(bias.reshape(4, H)[perm, :], ((0, 0), (0, Hp - H)))
    bias_row = b4.reshape(1, 4 * Hp)

    return dict(
        wih=wih_t.astype(compute_dtype),
        whh=whh_t.astype(compute_dtype),
        bias=bias_row,                      # float32
        H=H, I=I, Hp=Hp, Ip=Ip,
        compute_dtype=compute_dtype,
    )


def lstm_forward(x, params, h=None, c=None, time_chunk=32, out_dtype=None):
    """
    x: (seq_len, batch, input_size); h, c: optional (1, batch, hidden).
    Returns (h_seq, (h, c)) matching the PyTorch module.
    """
    T, B, I = x.shape
    H, Hp, Ip = params["H"], params["Hp"], params["Ip"]
    cd = params["compute_dtype"]
    dtype = out_dtype if out_dtype is not None else x.dtype
    assert I == params["I"], "input_size mismatch with prepared params"

    if h is None:
        h = jnp.zeros((1, B, H), x.dtype)
    if c is None:
        c = jnp.zeros((1, B, H), x.dtype)
    if T == 0:
        return jnp.zeros((0, B, H), dtype), (h, c)

    Bp = _round_up(B, 8)
    Tc = _choose_time_chunk(T, time_chunk)
    T_pad = _round_up(T, Tc)
    n_chunks = T_pad // Tc
    needs_mask = (T_pad != T)
    n_slabs = 2 if (Tc >= 8 and Tc % 2 == 0) else 1

    # Pad x only where actually needed (aligned shapes stay copy-free in HBM).
    pads = ((0, T_pad - T), (0, Bp - B), (0, Ip - I))
    x_p = jnp.pad(x, pads) if any(p[1] for p in pads) else x

    h0 = jnp.pad(h[0].astype(jnp.float32), ((0, Bp - B), (0, Hp - H)))
    c0 = jnp.pad(c[0].astype(jnp.float32), ((0, Bp - B), (0, Hp - H)))

    # ---- Explicit VMEM budget (worst case: double-buffered everything).
    G = 4 * Hp
    cd_b = jnp.dtype(cd).itemsize
    x_b = jnp.dtype(x_p.dtype).itemsize
    o_b = jnp.dtype(dtype).itemsize
    vmem_bytes = (
        2 * Tc * Bp * Ip * x_b        # x chunk
        + 2 * Ip * G * cd_b           # W_ih^T
        + 2 * Hp * G * cd_b           # W_hh^T
        + 2 * G * 4                   # bias
        + 2 * 2 * Bp * Hp * 4         # h0, c0
        + 2 * Tc * Bp * Hp * o_b      # h_seq chunk
        + 2 * 2 * Bp * Hp * o_b       # final h, c
        + Tc * Bp * G * 4             # gx scratch
        + 2 * Bp * Hp * 4             # h/c carry scratch
    )
    vmem_limit = min(max(int(vmem_bytes * 1.5) + (2 << 20), 32 * 1024 * 1024),
                     128 * 1024 * 1024)

    kernel = _make_lstm_kernel(T=T, Tc=Tc, Bp=Bp, Ip=Ip, Hp=Hp,
                               compute_dtype=cd, needs_mask=needs_mask,
                               n_slabs=n_slabs)

    def build_specs(resident_single):
        kw = dict(pipeline_mode=pl.Buffered(1)) if resident_single else {}
        in_specs = [
            pl.BlockSpec((Tc, Bp, Ip), lambda ci: (ci, 0, 0)),        # x chunk
            pl.BlockSpec((Ip, G), lambda ci: (0, 0), **kw),           # W_ih^T
            pl.BlockSpec((Hp, G), lambda ci: (0, 0), **kw),           # W_hh^T
            pl.BlockSpec((1, G), lambda ci: (0, 0), **kw),            # bias
            pl.BlockSpec((Bp, Hp), lambda ci: (0, 0), **kw),          # h0
            pl.BlockSpec((Bp, Hp), lambda ci: (0, 0), **kw),          # c0
        ]
        out_specs = [
            pl.BlockSpec((Tc, Bp, Hp), lambda ci: (ci, 0, 0)),        # h_seq
            pl.BlockSpec((Bp, Hp), lambda ci: (0, 0)),                # final h
            pl.BlockSpec((Bp, Hp), lambda ci: (0, 0)),                # final c
        ]
        return in_specs, out_specs

    def run(resident_single):
        in_specs, out_specs = build_specs(resident_single)
        grid_spec = pltpu.PrefetchScalarGridSpec(
            num_scalar_prefetch=0,
            grid=(n_chunks,),
            in_specs=in_specs,
            out_specs=out_specs,
            scratch_shapes=[
                pltpu.VMEM((Tc * Bp, G), jnp.float32),   # chunk gates_x
                pltpu.VMEM((Bp, Hp), jnp.float32),       # h carry
                pltpu.VMEM((Bp, Hp), jnp.float32),       # c carry
            ],
        )
        return pl.pallas_call(
            kernel,
            out_shape=(
                jax.ShapeDtypeStruct((T_pad, Bp, Hp), dtype),
                jax.ShapeDtypeStruct((Bp, Hp), dtype),
                jax.ShapeDtypeStruct((Bp, Hp), dtype),
            ),
            grid_spec=grid_spec,
            compiler_params=pltpu.CompilerParams(
                dimension_semantics=("arbitrary",),      # recurrence -> serial
                vmem_limit_bytes=vmem_limit),
        )(x_p, params["wih"], params["whh"], params["bias"], h0, c0)

    try:
        hseq_p, h_p, c_p = run(True)
    except Exception:
        # Fallback for JAX versions without BlockSpec pipeline_mode /
        # pl.Buffered(1): default double-buffered pipeline inputs.
        hseq_p, h_p, c_p = run(False)

    if (T_pad, Bp, Hp) == (T, B, H):
        h_seq = hseq_p
    else:
        h_seq = hseq_p[:T, :B, :H]
    h_last = h_p[:B, :H][None]
    c_last = c_p[:B, :H][None]
    return h_seq, (h_last, c_last)


def _lstm_ref(x, w_ih, w_hh, b_ih, b_hh, h0, c0):
    """Pure-JAX float32 reference (PyTorch nn.LSTM equations)."""
    H = w_hh.shape[1]

    def step(carry, x_t):
        h, c = carry
        gates = x_t @ w_ih.T + b_ih + h @ w_hh.T + b_hh
        i = jax.nn.sigmoid(gates[:, 0 * H:1 * H])
        f = jax.nn.sigmoid(gates[:, 1 * H:2 * H])
        g = jnp.tanh(gates[:, 2 * H:3 * H])
        o = jax.nn.sigmoid(gates[:, 3 * H:4 * H])
        c = f * c + i * g
        h = o * jnp.tanh(c)
        return (h, c), h

    (h, c), h_seq = lax.scan(step, (h0, c0), x)
    return h_seq, h, c


if __name__ == "__main__":
    seq_len, batch, input_size, hidden_size = 8, 2, 4, 32

    key = jax.random.PRNGKey(0)
    kx, k1, k2, k3, k4 = jax.random.split(key, 5)

    bound = 1.0 / (hidden_size ** 0.5)
    w_ih = jax.random.uniform(k1, (4 * hidden_size, input_size), jnp.float32, -bound, bound)
    w_hh = jax.random.uniform(k2, (4 * hidden_size, hidden_size), jnp.float32, -bound, bound)
    b_ih = jax.random.uniform(k3, (4 * hidden_size,), jnp.float32, -bound, bound)
    b_hh = jax.random.uniform(k4, (4 * hidden_size,), jnp.float32, -bound, bound)

    x = jax.random.normal(kx, (seq_len, batch, input_size), jnp.float32)

    h0 = jnp.zeros((batch, hidden_size), jnp.float32)
    c0 = jnp.zeros((batch, hidden_size), jnp.float32)
    h_seq_r, h_r, c_r = _lstm_ref(x, w_ih, w_hh, b_ih, b_hh, h0, c0)

    # --- float32 compute path: tight numerical check (single chunk) ---
    params_f32 = prepare_lstm_params(w_ih, w_hh, b_ih, b_hh,
                                     compute_dtype=jnp.float32)
    h_seq, (h_fin, c_fin) = lstm_forward(x, params_f32)
    jax.block_until_ready((h_seq, h_fin, c_fin))

    assert h_seq.shape == (seq_len, batch, hidden_size)
    assert h_fin.shape == (1, batch, hidden_size)
    assert c_fin.shape == (1, batch, hidden_size)
    assert jnp.allclose(h_seq, h_seq_r, atol=1e-4, rtol=1e-4)
    assert jnp.allclose(h_fin[0], h_r, atol=1e-4, rtol=1e-4)
    assert jnp.allclose(c_fin[0], c_r, atol=1e-4, rtol=1e-4)

    # --- default bf16-matmul path (f32 state/gates): loose check ---
    params_bf16 = prepare_lstm_params(w_ih, w_hh, b_ih, b_hh)
    h_seq_b, (h_fin_b, c_fin_b) = lstm_forward(x, params_bf16)
    jax.block_until_ready((h_seq_b, h_fin_b, c_fin_b))
    assert jnp.allclose(h_seq_b, h_seq_r, atol=5e-2)
    assert jnp.allclose(h_fin_b[0], h_r, atol=5e-2)
    assert jnp.allclose(c_fin_b[0], c_r, atol=1e-1)

    # --- multi-chunk + padded-tail path (T not divisible by chunk) ---
    T2 = 11
    x2 = jax.random.normal(kx, (T2, batch, input_size), jnp.float32)
    hs2_r, h2_r, c2_r = _lstm_ref(x2, w_ih, w_hh, b_ih, b_hh, h0, c0)
    hs2, (h2, c2) = lstm_forward(x2, params_f32, time_chunk=4)
    jax.block_until_ready((hs2, h2, c2))
    assert hs2.shape == (T2, batch, hidden_size)
    assert jnp.allclose(hs2, hs2_r, atol=1e-4, rtol=1e-4)
    assert jnp.allclose(h2[0], h2_r, atol=1e-4, rtol=1e-4)
    assert jnp.allclose(c2[0], c2_r, atol=1e-4, rtol=1e-4)

    # --- multi-chunk, exact-divisor path (no mask work) ---
    T3 = 24
    x3 = jax.random.normal(k1, (T3, batch, input_size), jnp.float32)
    hs3_r, h3_r, c3_r = _lstm_ref(x3, w_ih, w_hh, b_ih, b_hh, h0, c0)
    hs3, (h3, c3) = lstm_forward(x3, params_f32, time_chunk=8)
    jax.block_until_ready((hs3, h3, c3))
    assert jnp.allclose(hs3, hs3_r, atol=1e-4, rtol=1e-4)
    assert jnp.allclose(h3[0], h3_r, atol=1e-4, rtol=1e-4)
    assert jnp.allclose(c3[0], c3_r, atol=1e-4, rtol=1e-4)

    print("KERNEL_OK")
</pallas_src>

<mosaic_0001>
module attributes {stable_mosaic.version = 11 : i64} {
  func.func @kernel(%arg0: i32, %arg1: memref<8x8x8xf32, #tpu.memory_space<vmem>>, %arg2: memref<8x512xf32, #tpu.memory_space<vmem>>, %arg3: memref<128x512xf32, #tpu.memory_space<vmem>>, %arg4: memref<1x512xf32, #tpu.memory_space<vmem>>, %arg5: memref<8x128xf32, #tpu.memory_space<vmem>>, %arg6: memref<8x128xf32, #tpu.memory_space<vmem>>, %arg7: memref<8x8x128xf32, #tpu.memory_space<vmem>>, %arg8: memref<8x128xf32, #tpu.memory_space<vmem>>, %arg9: memref<8x128xf32, #tpu.memory_space<vmem>>, %arg10: memref<64x512xf32, #tpu.memory_space<vmem>>, %arg11: memref<8x128xf32, #tpu.memory_space<vmem>>, %arg12: memref<8x128xf32, #tpu.memory_space<vmem>>) attributes {dimension_semantics = [#tpu.dimension_semantics<arbitrary>], iteration_bounds = array<i64: 1>, scalar_prefetch = 0 : i64, scratch_operands = 3 : i64, tpu.core_type = #tpu.core_type<tc>, window_params = [{transform_indices = @transform_0, window_bounds = array<i64: 8, 8, 8>}, {pipeline_mode = #tpu.pipeline_mode<synchronous>, transform_indices = @transform_1, window_bounds = array<i64: 8, 512>}, {pipeline_mode = #tpu.pipeline_mode<synchronous>, transform_indices = @transform_2, window_bounds = array<i64: 128, 512>}, {pipeline_mode = #tpu.pipeline_mode<synchronous>, transform_indices = @transform_3, window_bounds = array<i64: 1, 512>}, {pipeline_mode = #tpu.pipeline_mode<synchronous>, transform_indices = @transform_4, window_bounds = array<i64: 8, 128>}, {pipeline_mode = #tpu.pipeline_mode<synchronous>, transform_indices = @transform_5, window_bounds = array<i64: 8, 128>}, {transform_indices = @transform_6, window_bounds = array<i64: 8, 8, 128>}, {pipeline_mode = #tpu.pipeline_mode<synchronous>, transform_indices = @transform_7, window_bounds = array<i64: 8, 128>}, {pipeline_mode = #tpu.pipeline_mode<synchronous>, transform_indices = @transform_8, window_bounds = array<i64: 8, 128>}]} {
    %c0_i32 = arith.constant 0 : i32
    %0 = arith.cmpi eq, %arg0, %c0_i32 : i32
    %1 = arith.extui %0 : i1 to i32
    %c0_i32_0 = arith.constant 0 : i32
    %2 = arith.cmpi ne, %1, %c0_i32_0 : i32
    scf.if %2 {
      %c0_74 = arith.constant 0 : index
      %c0_75 = arith.constant 0 : index
      %233 = vector.load %arg5[%c0_74, %c0_75] : memref<8x128xf32, #tpu.memory_space<vmem>>, vector<8x128xf32>
      %c0_76 = arith.constant 0 : index
      %c0_77 = arith.constant 0 : index
      %234 = vector.load %arg11[%c0_76, %c0_77] : memref<8x128xf32, #tpu.memory_space<vmem>>, vector<8x128xf32>
      tpu.vector_store %arg11[%c0_76, %c0_77], %233 {strides = array<i32>} : memref<8x128xf32, #tpu.memory_space<vmem>>, vector<8x128xf32>,
      %c0_78 = arith.constant 0 : index
      %c0_79 = arith.constant 0 : index
      %235 = vector.load %arg6[%c0_78, %c0_79] : memref<8x128xf32, #tpu.memory_space<vmem>>, vector<8x128xf32>
      %c0_80 = arith.constant 0 : index
      %c0_81 = arith.constant 0 : index
      %236 = vector.load %arg12[%c0_80, %c0_81] : memref<8x128xf32, #tpu.memory_space<vmem>>, vector<8x128xf32>
      tpu.vector_store %arg12[%c0_80, %c0_81], %235 {strides = array<i32>} : memref<8x128xf32, #tpu.memory_space<vmem>>, vector<8x128xf32>,
    } else {
    }
    %c0 = arith.constant 0 : index
    %c0_1 = arith.constant 0 : index
    %3 = vector.load %arg4[%c0, %c0_1] : memref<1x512xf32, #tpu.memory_space<vmem>>, vector<1x512xf32>
    %c0_2 = arith.constant 0 : index
    %c0_3 = arith.constant 0 : index
    %4 = vector.load %arg2[%c0_2, %c0_3] : memref<8x512xf32, #tpu.memory_space<vmem>>, vector<8x512xf32>
    %c0_4 = arith.constant 0 : index
    %c0_5 = arith.constant 0 : index
    %c0_6 = arith.constant 0 : index
    %5 = vector.load %arg1[%c0_4, %c0_5, %c0_6] : memref<8x8x8xf32, #tpu.memory_space<vmem>>, vector<4x8x8xf32>
    %6 = vector.shape_cast %5 : vector<4x8x8xf32> to vector<32x8xf32>
    %cst = arith.constant dense<0.000000e+00> : vector<32x512xf32>
    %7 = tpu.matmul %6, %4, %cst {dimension_numbers = #tpu.dot_dimension_numbers<[1], [0], [0], [1], [0, 0, 1, 1], [], []>} : vector<32x8xf32>, vector<8x512xf32>, vector<32x512xf32> -> vector<32x512xf32>
    %8 = vector.broadcast %3 : vector<1x512xf32> to vector<32x512xf32>
    %9 = arith.addf %7, %8 : vector<32x512xf32>
    %c0_7 = arith.constant 0 : index
    %c0_8 = arith.constant 0 : index
    %10 = vector.load %arg10[%c0_7, %c0_8] : memref<64x512xf32, #tpu.memory_space<vmem>>, vector<32x512xf32>
    tpu.vector_store %arg10[%c0_7, %c0_8], %9 {strides = array<i32>} : memref<64x512xf32, #tpu.memory_space<vmem>>, vector<32x512xf32>,
    %c4 = arith.constant 4 : index
    %c0_9 = arith.constant 0 : index
    %c0_10 = arith.constant 0 : index
    %11 = vector.load %arg1[%c4, %c0_9, %c0_10] : memref<8x8x8xf32, #tpu.memory_space<vmem>>, vector<4x8x8xf32>
    %12 = vector.shape_cast %11 : vector<4x8x8xf32> to vector<32x8xf32>
    %cst_11 = arith.constant dense<0.000000e+00> : vector<32x512xf32>
    %13 = tpu.matmul %12, %4, %cst_11 {dimension_numbers = #tpu.dot_dimension_numbers<[1], [0], [0], [1], [0, 0, 1, 1], [], []>} : vector<32x8xf32>, vector<8x512xf32>, vector<32x512xf32> -> vector<32x512xf32>
    %14 = vector.broadcast %3 : vector<1x512xf32> to vector<32x512xf32>
    %15 = arith.addf %13, %14 : vector<32x512xf32>
    %c32 = arith.constant 32 : index
    %c0_12 = arith.constant 0 : index
    %16 = vector.load %arg10[%c32, %c0_12] : memref<64x512xf32, #tpu.memory_space<vmem>>, vector<32x512xf32>
    tpu.vector_store %arg10[%c32, %c0_12], %15 {strides = array<i32>} : memref<64x512xf32, #tpu.memory_space<vmem>>, vector<32x512xf32>,
    %c0_13 = arith.constant 0 : index
    %c0_14 = arith.constant 0 : index
    %17 = vector.load %arg3[%c0_13, %c0_14] : memref<128x512xf32, #tpu.memory_space<vmem>>, vector<128x512xf32>
    %c0_15 = arith.constant 0 : index
    %c0_16 = arith.constant 0 : index
    %18 = vector.load %arg11[%c0_15, %c0_16] : memref<8x128xf32, #tpu.memory_space<vmem>>, vector<8x128xf32>
    %c0_17 = arith.constant 0 : index
    %c0_18 = arith.constant 0 : index
    %19 = vector.load %arg12[%c0_17, %c0_18] : memref<8x128xf32, #tpu.memory_space<vmem>>, vector<8x128xf32>
    %c0_i32_19 = arith.constant 0 : i32
    %c8_i32 = arith.constant 8 : i32
    %20 = arith.muli %c0_i32_19, %c8_i32 : i32
    %21 = tpu.assume_multiple %20, 8 : i32
    %22 = arith.index_cast %21 : i32 to index
    %c0_20 = arith.constant 0 : index
    %23 = vector.load %arg10[%22, %c0_20] : memref<64x512xf32, #tpu.memory_space<vmem>>, vector<8x512xf32>
    %cst_21 = arith.constant dense<0.000000e+00> : vector<8x512xf32>
    %24 = tpu.matmul %18, %17, %cst_21 {dimension_numbers = #tpu.dot_dimension_numbers<[1], [0], [0], [1], [0, 0, 1, 1], [], []>} : vector<8x128xf32>, vector<128x512xf32>, vector<8x512xf32> -> vector<8x512xf32>
    %25 = arith.addf %23, %24 : vector<8x512xf32>
    %26 = vector.extract_strided_slice %25 {offsets = [0, 0], sizes = [8, 384], strides = [1, 1]} : vector<8x512xf32> to vector<8x384xf32>
    %27 = arith.negf %26 : vector<8x384xf32>
    %28 = math.exp %27 : vector<8x384xf32>
    %cst_22 = arith.constant 1.000000e+00 : f32
    %29 = vector.broadcast %cst_22 : f32 to vector<8x384xf32>
    %30 = arith.addf %29, %28 : vector<8x384xf32>
    %31 = arith.divf %29, %30 : vector<8x384xf32>
    %32 = vector.extract_strided_slice %25 {offsets = [0, 384], sizes = [8, 128], strides = [1, 1]} : vector<8x512xf32> to vector<8x128xf32>
    %33 = math.tanh %32 : vector<8x128xf32>
    %34 = vector.extract_strided_slice %31 {offsets = [0, 0], sizes = [8, 128], strides = [1, 1]} : vector<8x384xf32> to vector<8x128xf32>
    %35 = vector.extract_strided_slice %31 {offsets = [0, 128], sizes = [8, 128], strides = [1, 1]} : vector<8x384xf32> to vector<8x128xf32>
    %36 = vector.extract_strided_slice %31 {offsets = [0, 256], sizes = [8, 128], strides = [1, 1]} : vector<8x384xf32> to vector<8x128xf32>
    %37 = arith.mulf %35, %19 : vector<8x128xf32>
    %38 = arith.mulf %34, %33 : vector<8x128xf32>
    %39 = arith.addf %37, %38 : vector<8x128xf32>
    %40 = math.tanh %39 : vector<8x128xf32>
    %41 = arith.mulf %36, %40 : vector<8x128xf32>
    %42 = arith.index_cast %c0_i32_19 : i32 to index
    %c0_23 = arith.constant 0 : index
    %c0_24 = arith.constant 0 : index
    %43 = vector.load %arg7[%42, %c0_23, %c0_24] : memref<8x8x128xf32, #tpu.memory_space<vmem>>, vector<1x8x128xf32>
    %44 = vector.shape_cast %43 : vector<1x8x128xf32> to vector<8x128xf32>
    %45 = vector.shape_cast %41 : vector<8x128xf32> to vector<1x8x128xf32>
    tpu.vector_store %arg7[%42, %c0_23, %c0_24], %45 {strides = array<i32>} : memref<8x8x128xf32, #tpu.memory_space<vmem>>, vector<1x8x128xf32>,
    %c1_i32 = arith.constant 1 : i32
    %c8_i32_25 = arith.constant 8 : i32
    %46 = arith.muli %c1_i32, %c8_i32_25 : i32
    %47 = tpu.assume_multiple %46, 8 : i32
    %48 = arith.index_cast %47 : i32 to index
    %c0_26 = arith.constant 0 : index
    %49 = vector.load %arg10[%48, %c0_26] : memref<64x512xf32, #tpu.memory_space<vmem>>, vector<8x512xf32>
    %cst_27 = arith.constant dense<0.000000e+00> : vector<8x512xf32>
    %50 = tpu.matmul %41, %17, %cst_27 {dimension_numbers = #tpu.dot_dimension_numbers<[1], [0], [0], [1], [0, 0, 1, 1], [], []>} : vector<8x128xf32>, vector<128x512xf32>, vector<8x512xf32> -> vector<8x512xf32>
    %51 = arith.addf %49, %50 : vector<8x512xf32>
    %52 = vector.extract_strided_slice %51 {offsets = [0, 0], sizes = [8, 384], strides = [1, 1]} : vector<8x512xf32> to vector<8x384xf32>
    %53 = arith.negf %52 : vector<8x384xf32>
    %54 = math.exp %53 : vector<8x384xf32>
    %cst_28 = arith.constant 1.000000e+00 : f32
    %55 = vector.broadcast %cst_28 : f32 to vector<8x384xf32>
    %56 = arith.addf %55, %54 : vector<8x384xf32>
    %57 = arith.divf %55, %56 : vector<8x384xf32>
    %58 = vector.extract_strided_slice %51 {offsets = [0, 384], sizes = [8, 128], strides = [1, 1]} : vector<8x512xf32> to vector<8x128xf32>
    %59 = math.tanh %58 : vector<8x128xf32>
    %60 = vector.extract_strided_slice %57 {offsets = [0, 0], sizes = [8, 128], strides = [1, 1]} : vector<8x384xf32> to vector<8x128xf32>
    %61 = vector.extract_strided_slice %57 {offsets = [0, 128], sizes = [8, 128], strides = [1, 1]} : vector<8x384xf32> to vector<8x128xf32>
    %62 = vector.extract_strided_slice %57 {offsets = [0, 256], sizes = [8, 128], strides = [1, 1]} : vector<8x384xf32> to vector<8x128xf32>
    %63 = arith.mulf %61, %39 : vector<8x128xf32>
    %64 = arith.mulf %60, %59 : vector<8x128xf32>
    %65 = arith.addf %63, %64 : vector<8x128xf32>
    %66 = math.tanh %65 : vector<8x128xf32>
    %67 = arith.mulf %62, %66 : vector<8x128xf32>
    %68 = arith.index_cast %c1_i32 : i32 to index
    %c0_29 = arith.constant 0 : index
    %c0_30 = arith.constant 0 : index
    %69 = vector.load %arg7[%68, %c0_29, %c0_30] : memref<8x8x128xf32, #tpu.memory_space<vmem>>, vector<1x8x128xf32>
    %70 = vector.shape_cast %69 : vector<1x8x128xf32> to vector<8x128xf32>
    %71 = vector.shape_cast %67 : vector<8x128xf32> to vector<1x8x128xf32>
    tpu.vector_store %arg7[%68, %c0_29, %c0_30], %71 {strides = array<i32>} : memref<8x8x128xf32, #tpu.memory_space<vmem>>, vector<1x8x128xf32>,
    %c2_i32 = arith.constant 2 : i32
    %c8_i32_31 = arith.constant 8 : i32
    %72 = arith.muli %c2_i32, %c8_i32_31 : i32
    %73 = tpu.assume_multiple %72, 8 : i32
    %74 = arith.index_cast %73 : i32 to index
    %c0_32 = arith.constant 0 : index
    %75 = vector.load %arg10[%74, %c0_32] : memref<64x512xf32, #tpu.memory_space<vmem>>, vector<8x512xf32>
    %cst_33 = arith.constant dense<0.000000e+00> : vector<8x512xf32>
    %76 = tpu.matmul %67, %17, %cst_33 {dimension_numbers = #tpu.dot_dimension_numbers<[1], [0], [0], [1], [0, 0, 1, 1], [], []>} : vector<8x128xf32>, vector<128x512xf32>, vector<8x512xf32> -> vector<8x512xf32>
    %77 = arith.addf %75, %76 : vector<8x512xf32>
    %78 = vector.extract_strided_slice %77 {offsets = [0, 0], sizes = [8, 384], strides = [1, 1]} : vector<8x512xf32> to vector<8x384xf32>
    %79 = arith.negf %78 : vector<8x384xf32>
    %80 = math.exp %79 : vector<8x384xf32>
    %cst_34 = arith.constant 1.000000e+00 : f32
    %81 = vector.broadcast %cst_34 : f32 to vector<8x384xf32>
    %82 = arith.addf %81, %80 : vector<8x384xf32>
    %83 = arith.divf %81, %82 : vector<8x384xf32>
    %84 = vector.extract_strided_slice %77 {offsets = [0, 384], sizes = [8, 128], strides = [1, 1]} : vector<8x512xf32> to vector<8x128xf32>
    %85 = math.tanh %84 : vector<8x128xf32>
    %86 = vector.extract_strided_slice %83 {offsets = [0, 0], sizes = [8, 128], strides = [1, 1]} : vector<8x384xf32> to vector<8x128xf32>
    %87 = vector.extract_strided_slice %83 {offsets = [0, 128], sizes = [8, 128], strides = [1, 1]} : vector<8x384xf32> to vector<8x128xf32>
    %88 = vector.extract_strided_slice %83 {offsets = [0, 256], sizes = [8, 128], strides = [1, 1]} : vector<8x384xf32> to vector<8x128xf32>
    %89 = arith.mulf %87, %65 : vector<8x128xf32>
    %90 = arith.mulf %86, %85 : vector<8x128xf32>
    %91 = arith.addf %89, %90 : vector<8x128xf32>
    %92 = math.tanh %91 : vector<8x128xf32>
    %93 = arith.mulf %88, %92 : vector<8x128xf32>
    %94 = arith.index_cast %c2_i32 : i32 to index
    %c0_35 = arith.constant 0 : index
    %c0_36 = arith.constant 0 : index
    %95 = vector.load %arg7[%94, %c0_35, %c0_36] : memref<8x8x128xf32, #tpu.memory_space<vmem>>, vector<1x8x128xf32>
    %96 = vector.shape_cast %95 : vector<1x8x128xf32> to vector<8x128xf32>
    %97 = vector.shape_cast %93 : vector<8x128xf32> to vector<1x8x128xf32>
    tpu.vector_store %arg7[%94, %c0_35, %c0_36], %97 {strides = array<i32>} : memref<8x8x128xf32, #tpu.memory_space<vmem>>, vector<1x8x128xf32>,
    %c3_i32 = arith.constant 3 : i32
    %c8_i32_37 = arith.constant 8 : i32
    %98 = arith.muli %c3_i32, %c8_i32_37 : i32
    %99 = tpu.assume_multiple %98, 8 : i32
    %100 = arith.index_cast %99 : i32 to index
    %c0_38 = arith.constant 0 : index
    %101 = vector.load %arg10[%100, %c0_38] : memref<64x512xf32, #tpu.memory_space<vmem>>, vector<8x512xf32>
    %cst_39 = arith.constant dense<0.000000e+00> : vector<8x512xf32>
    %102 = tpu.matmul %93, %17, %cst_39 {dimension_numbers = #tpu.dot_dimension_numbers<[1], [0], [0], [1], [0, 0, 1, 1], [], []>} : vector<8x128xf32>, vector<128x512xf32>, vector<8x512xf32> -> vector<8x512xf32>
    %103 = arith.addf %101, %102 : vector<8x512xf32>
    %104 = vector.extract_strided_slice %103 {offsets = [0, 0], sizes = [8, 384], strides = [1, 1]} : vector<8x512xf32> to vector<8x384xf32>
    %105 = arith.negf %104 : vector<8x384xf32>
    %106 = math.exp %105 : vector<8x384xf32>
    %cst_40 = arith.constant 1.000000e+00 : f32
    %107 = vector.broadcast %cst_40 : f32 to vector<8x384xf32>
    %108 = arith.addf %107, %106 : vector<8x384xf32>
    %109 = arith.divf %107, %108 : vector<8x384xf32>
    %110 = vector.extract_strided_slice %103 {offsets = [0, 384], sizes = [8, 128], strides = [1, 1]} : vector<8x512xf32> to vector<8x128xf32>
    %111 = math.tanh %110 : vector<8x128xf32>
    %112 = vector.extract_strided_slice %109 {offsets = [0, 0], sizes = [8, 128], strides = [1, 1]} : vector<8x384xf32> to vector<8x128xf32>
    %113 = vector.extract_strided_slice %109 {offsets = [0, 128], sizes = [8, 128], strides = [1, 1]} : vector<8x384xf32> to vector<8x128xf32>
    %114 = vector.extract_strided_slice %109 {offsets = [0, 256], sizes = [8, 128], strides = [1, 1]} : vector<8x384xf32> to vector<8x128xf32>
    %115 = arith.mulf %113, %91 : vector<8x128xf32>
    %116 = arith.mulf %112, %111 : vector<8x128xf32>
    %117 = arith.addf %115, %116 : vector<8x128xf32>
    %118 = math.tanh %117 : vector<8x128xf32>
    %119 = arith.mulf %114, %118 : vector<8x128xf32>
    %120 = arith.index_cast %c3_i32 : i32 to index
    %c0_41 = arith.constant 0 : index
    %c0_42 = arith.constant 0 : index
    %121 = vector.load %arg7[%120, %c0_41, %c0_42] : memref<8x8x128xf32, #tpu.memory_space<vmem>>, vector<1x8x128xf32>
    %122 = vector.shape_cast %121 : vector<1x8x128xf32> to vector<8x128xf32>
    %123 = vector.shape_cast %119 : vector<8x128xf32> to vector<1x8x128xf32>
    tpu.vector_store %arg7[%120, %c0_41, %c0_42], %123 {strides = array<i32>} : memref<8x8x128xf32, #tpu.memory_space<vmem>>, vector<1x8x128xf32>,
    %c4_i32 = arith.constant 4 : i32
    %c8_i32_43 = arith.constant 8 : i32
    %124 = arith.muli %c4_i32, %c8_i32_43 : i32
    %125 = tpu.assume_multiple %124, 8 : i32
    %126 = arith.index_cast %125 : i32 to index
    %c0_44 = arith.constant 0 : index
    %127 = vector.load %arg10[%126, %c0_44] : memref<64x512xf32, #tpu.memory_space<vmem>>, vector<8x512xf32>
    %cst_45 = arith.constant dense<0.000000e+00> : vector<8x512xf32>
    %128 = tpu.matmul %119, %17, %cst_45 {dimension_numbers = #tpu.dot_dimension_numbers<[1], [0], [0], [1], [0, 0, 1, 1], [], []>} : vector<8x128xf32>, vector<128x512xf32>, vector<8x512xf32> -> vector<8x512xf32>
    %129 = arith.addf %127, %128 : vector<8x512xf32>
    %130 = vector.extract_strided_slice %129 {offsets = [0, 0], sizes = [8, 384], strides = [1, 1]} : vector<8x512xf32> to vector<8x384xf32>
    %131 = arith.negf %130 : vector<8x384xf32>
    %132 = math.exp %131 : vector<8x384xf32>
    %cst_46 = arith.constant 1.000000e+00 : f32
    %133 = vector.broadcast %cst_46 : f32 to vector<8x384xf32>
    %134 = arith.addf %133, %132 : vector<8x384xf32>
    %135 = arith.divf %133, %134 : vector<8x384xf32>
    %136 = vector.extract_strided_slice %129 {offsets = [0, 384], sizes = [8, 128], strides = [1, 1]} : vector<8x512xf32> to vector<8x128xf32>
    %137 = math.tanh %136 : vector<8x128xf32>
    %138 = vector.extract_strided_slice %135 {offsets = [0, 0], sizes = [8, 128], strides = [1, 1]} : vector<8x384xf32> to vector<8x128xf32>
    %139 = vector.extract_strided_slice %135 {offsets = [0, 128], sizes = [8, 128], strides = [1, 1]} : vector<8x384xf32> to vector<8x128xf32>
    %140 = vector.extract_strided_slice %135 {offsets = [0, 256], sizes = [8, 128], strides = [1, 1]} : vector<8x384xf32> to vector<8x128xf32>
    %141 = arith.mulf %139, %117 : vector<8x128xf32>
    %142 = arith.mulf %138, %137 : vector<8x128xf32>
    %143 = arith.addf %141, %142 : vector<8x128xf32>
    %144 = math.tanh %143 : vector<8x128xf32>
    %145 = arith.mulf %140, %144 : vector<8x128xf32>
    %146 = arith.index_cast %c4_i32 : i32 to index
    %c0_47 = arith.constant 0 : index
    %c0_48 = arith.constant 0 : index
    %147 = vector.load %arg7[%146, %c0_47, %c0_48] : memref<8x8x128xf32, #tpu.memory_space<vmem>>, vector<1x8x128xf32>
    %148 = vector.shape_cast %147 : vector<1x8x128xf32> to vector<8x128xf32>
    %149 = vector.shape_cast %145 : vector<8x128xf32> to vector<1x8x128xf32>
    tpu.vector_store %arg7[%146, %c0_47, %c0_48], %149 {strides = array<i32>} : memref<8x8x128xf32, #tpu.memory_space<vmem>>, vector<1x8x128xf32>,
    %c5_i32 = arith.constant 5 : i32
    %c8_i32_49 = arith.constant 8 : i32
    %150 = arith.muli %c5_i32, %c8_i32_49 : i32
    %151 = tpu.assume_multiple %150, 8 : i32
    %152 = arith.index_cast %151 : i32 to index
    %c0_50 = arith.constant 0 : index
    %153 = vector.load %arg10[%152, %c0_50] : memref<64x512xf32, #tpu.memory_space<vmem>>, vector<8x512xf32>
    %cst_51 = arith.constant dense<0.000000e+00> : vector<8x512xf32>
    %154 = tpu.matmul %145, %17, %cst_51 {dimension_numbers = #tpu.dot_dimension_numbers<[1], [0], [0], [1], [0, 0, 1, 1], [], []>} : vector<8x128xf32>, vector<128x512xf32>, vector<8x512xf32> -> vector<8x512xf32>
    %155 = arith.addf %153, %154 : vector<8x512xf32>
    %156 = vector.extract_strided_slice %155 {offsets = [0, 0], sizes = [8, 384], strides = [1, 1]} : vector<8x512xf32> to vector<8x384xf32>
    %157 = arith.negf %156 : vector<8x384xf32>
    %158 = math.exp %157 : vector<8x384xf32>
    %cst_52 = arith.constant 1.000000e+00 : f32
    %159 = vector.broadcast %cst_52 : f32 to vector<8x384xf32>
    %160 = arith.addf %159, %158 : vector<8x384xf32>
    %161 = arith.divf %159, %160 : vector<8x384xf32>
    %162 = vector.extract_strided_slice %155 {offsets = [0, 384], sizes = [8, 128], strides = [1, 1]} : vector<8x512xf32> to vector<8x128xf32>
    %163 = math.tanh %162 : vector<8x128xf32>
    %164 = vector.extract_strided_slice %161 {offsets = [0, 0], sizes = [8, 128], strides = [1, 1]} : vector<8x384xf32> to vector<8x128xf32>
    %165 = vector.extract_strided_slice %161 {offsets = [0, 128], sizes = [8, 128], strides = [1, 1]} : vector<8x384xf32> to vector<8x128xf32>
    %166 = vector.extract_strided_slice %161 {offsets = [0, 256], sizes = [8, 128], strides = [1, 1]} : vector<8x384xf32> to vector<8x128xf32>
    %167 = arith.mulf %165, %143 : vector<8x128xf32>
    %168 = arith.mulf %164, %163 : vector<8x128xf32>
    %169 = arith.addf %167, %168 : vector<8x128xf32>
    %170 = math.tanh %169 : vector<8x128xf32>
    %171 = arith.mulf %166, %170 : vector<8x128xf32>
    %172 = arith.index_cast %c5_i32 : i32 to index
    %c0_53 = arith.constant 0 : index
    %c0_54 = arith.constant 0 : index
    %173 = vector.load %arg7[%172, %c0_53, %c0_54] : memref<8x8x128xf32, #tpu.memory_space<vmem>>, vector<1x8x128xf32>
    %174 = vector.shape_cast %173 : vector<1x8x128xf32> to vector<8x128xf32>
    %175 = vector.shape_cast %171 : vector<8x128xf32> to vector<1x8x128xf32>
    tpu.vector_store %arg7[%172, %c0_53, %c0_54], %175 {strides = array<i32>} : memref<8x8x128xf32, #tpu.memory_space<vmem>>, vector<1x8x128xf32>,
    %c6_i32 = arith.constant 6 : i32
    %c8_i32_55 = arith.constant 8 : i32
    %176 = arith.muli %c6_i32, %c8_i32_55 : i32
    %177 = tpu.assume_multiple %176, 8 : i32
    %178 = arith.index_cast %177 : i32 to index
    %c0_56 = arith.constant 0 : index
    %179 = vector.load %arg10[%178, %c0_56] : memref<64x512xf32, #tpu.memory_space<vmem>>, vector<8x512xf32>
    %cst_57 = arith.constant dense<0.000000e+00> : vector<8x512xf32>
    %180 = tpu.matmul %171, %17, %cst_57 {dimension_numbers = #tpu.dot_dimension_numbers<[1], [0], [0], [1], [0, 0, 1, 1], [], []>} : vector<8x128xf32>, vector<128x512xf32>, vector<8x512xf32> -> vector<8x512xf32>
    %181 = arith.addf %179, %180 : vector<8x512xf32>
    %182 = vector.extract_strided_slice %181 {offsets = [0, 0], sizes = [8, 384], strides = [1, 1]} : vector<8x512xf32> to vector<8x384xf32>
    %183 = arith.negf %182 : vector<8x384xf32>
    %184 = math.exp %183 : vector<8x384xf32>
    %cst_58 = arith.constant 1.000000e+00 : f32
    %185 = vector.broadcast %cst_58 : f32 to vector<8x384xf32>
    %186 = arith.addf %185, %184 : vector<8x384xf32>
    %187 = arith.divf %185, %186 : vector<8x384xf32>
    %188 = vector.extract_strided_slice %181 {offsets = [0, 384], sizes = [8, 128], strides = [1, 1]} : vector<8x512xf32> to vector<8x128xf32>
    %189 = math.tanh %188 : vector<8x128xf32>
    %190 = vector.extract_strided_slice %187 {offsets = [0, 0], sizes = [8, 128], strides = [1, 1]} : vector<8x384xf32> to vector<8x128xf32>
    %191 = vector.extract_strided_slice %187 {offsets = [0, 128], sizes = [8, 128], strides = [1, 1]} : vector<8x384xf32> to vector<8x128xf32>
    %192 = vector.extract_strided_slice %187 {offsets = [0, 256], sizes = [8, 128], strides = [1, 1]} : vector<8x384xf32> to vector<8x128xf32>
    %193 = arith.mulf %191, %169 : vector<8x128xf32>
    %194 = arith.mulf %190, %189 : vector<8x128xf32>
    %195 = arith.addf %193, %194 : vector<8x128xf32>
    %196 = math.tanh %195 : vector<8x128xf32>
    %197 = arith.mulf %192, %196 : vector<8x128xf32>
    %198 = arith.index_cast %c6_i32 : i32 to index
    %c0_59 = arith.constant 0 : index
    %c0_60 = arith.constant 0 : index
    %199 = vector.load %arg7[%198, %c0_59, %c0_60] : memref<8x8x128xf32, #tpu.memory_space<vmem>>, vector<1x8x128xf32>
    %200 = vector.shape_cast %199 : vector<1x8x128xf32> to vector<8x128xf32>
    %201 = vector.shape_cast %197 : vector<8x128xf32> to vector<1x8x128xf32>
    tpu.vector_store %arg7[%198, %c0_59, %c0_60], %201 {strides = array<i32>} : memref<8x8x128xf32, #tpu.memory_space<vmem>>, vector<1x8x128xf32>,
    %c7_i32 = arith.constant 7 : i32
    %c8_i32_61 = arith.constant 8 : i32
    %202 = arith.muli %c7_i32, %c8_i32_61 : i32
    %203 = tpu.assume_multiple %202, 8 : i32
    %204 = arith.index_cast %203 : i32 to index
    %c0_62 = arith.constant 0 : index
    %205 = vector.load %arg10[%204, %c0_62] : memref<64x512xf32, #tpu.memory_space<vmem>>, vector<8x512xf32>
    %cst_63 = arith.constant dense<0.000000e+00> : vector<8x512xf32>
    %206 = tpu.matmul %197, %17, %cst_63 {dimension_numbers = #tpu.dot_dimension_numbers<[1], [0], [0], [1], [0, 0, 1, 1], [], []>} : vector<8x128xf32>, vector<128x512xf32>, vector<8x512xf32> -> vector<8x512xf32>
    %207 = arith.addf %205, %206 : vector<8x512xf32>
    %208 = vector.extract_strided_slice %207 {offsets = [0, 0], sizes = [8, 384], strides = [1, 1]} : vector<8x512xf32> to vector<8x384xf32>
    %209 = arith.negf %208 : vector<8x384xf32>
    %210 = math.exp %209 : vector<8x384xf32>
    %cst_64 = arith.constant 1.000000e+00 : f32
    %211 = vector.broadcast %cst_64 : f32 to vector<8x384xf32>
    %212 = arith.addf %211, %210 : vector<8x384xf32>
    %213 = arith.divf %211, %212 : vector<8x384xf32>
    %214 = vector.extract_strided_slice %207 {offsets = [0, 384], sizes = [8, 128], strides = [1, 1]} : vector<8x512xf32> to vector<8x128xf32>
    %215 = math.tanh %214 : vector<8x128xf32>
    %216 = vector.extract_strided_slice %213 {offsets = [0, 0], sizes = [8, 128], strides = [1, 1]} : vector<8x384xf32> to vector<8x128xf32>
    %217 = vector.extract_strided_slice %213 {offsets = [0, 128], sizes = [8, 128], strides = [1, 1]} : vector<8x384xf32> to vector<8x128xf32>
    %218 = vector.extract_strided_slice %213 {offsets = [0, 256], sizes = [8, 128], strides = [1, 1]} : vector<8x384xf32> to vector<8x128xf32>
    %219 = arith.mulf %217, %195 : vector<8x128xf32>
    %220 = arith.mulf %216, %215 : vector<8x128xf32>
    %221 = arith.addf %219, %220 : vector<8x128xf32>
    %222 = math.tanh %221 : vector<8x128xf32>
    %223 = arith.mulf %218, %222 : vector<8x128xf32>
    %224 = arith.index_cast %c7_i32 : i32 to index
    %c0_65 = arith.constant 0 : index
    %c0_66 = arith.constant 0 : index
    %225 = vector.load %arg7[%224, %c0_65, %c0_66] : memref<8x8x128xf32, #tpu.memory_space<vmem>>, vector<1x8x128xf32>
    %226 = vector.shape_cast %225 : vector<1x8x128xf32> to vector<8x128xf32>
    %227 = vector.shape_cast %223 : vector<8x128xf32> to vector<1x8x128xf32>
    tpu.vector_store %arg7[%224, %c0_65, %c0_66], %227 {strides = array<i32>} : memref<8x8x128xf32, #tpu.memory_space<vmem>>, vector<1x8x128xf32>,
    %c8_i32_67 = arith.constant 8 : i32
    %c0_68 = arith.constant 0 : index
    %c0_69 = arith.constant 0 : index
    %228 = vector.load %arg11[%c0_68, %c0_69] : memref<8x128xf32, #tpu.memory_space<vmem>>, vector<8x128xf32>
    tpu.vector_store %arg11[%c0_68, %c0_69], %223 {strides = array<i32>} : memref<8x128xf32, #tpu.memory_space<vmem>>, vector<8x128xf32>,
    %c0_70 = arith.constant 0 : index
    %c0_71 = arith.constant 0 : index
    %229 = vector.load %arg12[%c0_70, %c0_71] : memref<8x128xf32, #tpu.memory_space<vmem>>, vector<8x128xf32>
    tpu.vector_store %arg12[%c0_70, %c0_71], %221 {strides = array<i32>} : memref<8x128xf32, #tpu.memory_space<vmem>>, vector<8x128xf32>,
    %c0_i32_72 = arith.constant 0 : i32
    %230 = arith.cmpi eq, %arg0, %c0_i32_72 : i32
    %231 = arith.extui %230 : i1 to i32
    %c0_i32_73 = arith.constant 0 : i32
    %232 = arith.cmpi ne, %231, %c0_i32_73 : i32
    scf.if %232 {
      %c0_74 = arith.constant 0 : index
      %c0_75 = arith.constant 0 : index
      %233 = vector.load %arg8[%c0_74, %c0_75] : memref<8x128xf32, #tpu.memory_space<vmem>>, vector<8x128xf32>
      tpu.vector_store %arg8[%c0_74, %c0_75], %223 {strides = array<i32>} : memref<8x128xf32, #tpu.memory_space<vmem>>, vector<8x128xf32>,
      %c0_76 = arith.constant 0 : index
      %c0_77 = arith.constant 0 : index
      %234 = vector.load %arg9[%c0_76, %c0_77] : memref<8x128xf32, #tpu.memory_space<vmem>>, vector<8x128xf32>
      tpu.vector_store %arg9[%c0_76, %c0_77], %221 {strides = array<i32>} : memref<8x128xf32, #tpu.memory_space<vmem>>, vector<8x128xf32>,
    } else {
    }
    return
  }
  func.func @transform_0(%arg0: i32) -> (i32, i32, i32) {
    %c0_i32 = arith.constant 0 : i32
    %c0_i32_0 = arith.constant 0 : i32
    %c0_i32_1 = arith.constant 0 : i32
    return %arg0, %c0_i32, %c0_i32_0 : i32, i32, i32
  }
  func.func @transform_1(%arg0: i32) -> (i32, i32) {
    %c0_i32 = arith.constant 0 : i32
    %c0_i32_0 = arith.constant 0 : i32
    %c0_i32_1 = arith.constant 0 : i32
    return %c0_i32, %c0_i32_0 : i32, i32
  }
  func.func @transform_2(%arg0: i32) -> (i32, i32) {
    %c0_i32 = arith.constant 0 : i32
    %c0_i32_0 = arith.constant 0 : i32
    %c0_i32_1 = arith.constant 0 : i32
    return %c0_i32, %c0_i32_0 : i32, i32
  }
  func.func @transform_3(%arg0: i32) -> (i32, i32) {
    %c0_i32 = arith.constant 0 : i32
    %c0_i32_0 = arith.constant 0 : i32
    %c0_i32_1 = arith.constant 0 : i32
    return %c0_i32, %c0_i32_0 : i32, i32
  }
  func.func @transform_4(%arg0: i32) -> (i32, i32) {
    %c0_i32 = arith.constant 0 : i32
    %c0_i32_0 = arith.constant 0 : i32
    %c0_i32_1 = arith.constant 0 : i32
    return %c0_i32, %c0_i32_0 : i32, i32
  }
  func.func @transform_5(%arg0: i32) -> (i32, i32) {
    %c0_i32 = arith.constant 0 : i32
    %c0_i32_0 = arith.constant 0 : i32
    %c0_i32_1 = arith.constant 0 : i32
    return %c0_i32, %c0_i32_0 : i32, i32
  }
  func.func @transform_6(%arg0: i32) -> (i32, i32, i32) {
    %c0_i32 = arith.constant 0 : i32
    %c0_i32_0 = arith.constant 0 : i32
    %c0_i32_1 = arith.constant 0 : i32
    return %arg0, %c0_i32, %c0_i32_0 : i32, i32, i32
  }
  func.func @transform_7(%arg0: i32) -> (i32, i32) {
    %c0_i32 = arith.constant 0 : i32
    %c0_i32_0 = arith.constant 0 : i32
    %c0_i32_1 = arith.constant 0 : i32
    return %c0_i32, %c0_i32_0 : i32, i32
  }
  func.func @transform_8(%arg0: i32) -> (i32, i32) {
    %c0_i32 = arith.constant 0 : i32
    %c0_i32_0 = arith.constant 0 : i32
    %c0_i32_1 = arith.constant 0 : i32
    return %c0_i32, %c0_i32_0 : i32, i32
  }
}

module attributes {stable_mosaic.version = 11 : i64} {
  func.func @kernel(%arg0: i32, %arg1: memref<8x8x8xf32, #tpu.memory_space<vmem>>, %arg2: memref<8x512xf32, #tpu.memory_space<vmem>>, %arg3: memref<128x512xf32, #tpu.memory_space<vmem>>, %arg4: memref<1x512xf32, #tpu.memory_space<vmem>>, %arg5: memref<8x128xf32, #tpu.memory_space<vmem>>, %arg6: memref<8x128xf32, #tpu.memory_space<vmem>>, %arg7: memref<8x8x128xf32, #tpu.memory_space<vmem>>, %arg8: memref<8x128xf32, #tpu.memory_space<vmem>>, %arg9: memref<8x128xf32, #tpu.memory_space<vmem>>, %arg10: memref<64x512xf32, #tpu.memory_space<vmem>>, %arg11: memref<8x128xf32, #tpu.memory_space<vmem>>, %arg12: memref<8x128xf32, #tpu.memory_space<vmem>>) attributes {dimension_semantics = [#tpu.dimension_semantics<arbitrary>], iteration_bounds = array<i64: 1>, scalar_prefetch = 0 : i64, scratch_operands = 3 : i64, tpu.core_type = #tpu.core_type<tc>, window_params = [{transform_indices = @transform_0, window_bounds = array<i64: 8, 8, 8>}, {pipeline_mode = #tpu.pipeline_mode<synchronous>, transform_indices = @transform_1, window_bounds = array<i64: 8, 512>}, {pipeline_mode = #tpu.pipeline_mode<synchronous>, transform_indices = @transform_2, window_bounds = array<i64: 128, 512>}, {pipeline_mode = #tpu.pipeline_mode<synchronous>, transform_indices = @transform_3, window_bounds = array<i64: 1, 512>}, {pipeline_mode = #tpu.pipeline_mode<synchronous>, transform_indices = @transform_4, window_bounds = array<i64: 8, 128>}, {pipeline_mode = #tpu.pipeline_mode<synchronous>, transform_indices = @transform_5, window_bounds = array<i64: 8, 128>}, {transform_indices = @transform_6, window_bounds = array<i64: 8, 8, 128>}, {pipeline_mode = #tpu.pipeline_mode<synchronous>, transform_indices = @transform_7, window_bounds = array<i64: 8, 128>}, {pipeline_mode = #tpu.pipeline_mode<synchronous>, transform_indices = @transform_8, window_bounds = array<i64: 8, 128>}]} {
    %c0_i32 = arith.constant 0 : i32
    %0 = arith.cmpi eq, %arg0, %c0_i32 : i32
    %1 = arith.extui %0 : i1 to i32
    %c0_i32_0 = arith.constant 0 : i32
    %2 = arith.cmpi ne, %1, %c0_i32_0 : i32
    scf.if %2 {
      %c0_74 = arith.constant 0 : index
      %c0_75 = arith.constant 0 : index
      %233 = vector.load %arg5[%c0_74, %c0_75] : memref<8x128xf32, #tpu.memory_space<vmem>>, vector<8x128xf32>
      %c0_76 = arith.constant 0 : index
      %c0_77 = arith.constant 0 : index
      %234 = vector.load %arg11[%c0_76, %c0_77] : memref<8x128xf32, #tpu.memory_space<vmem>>, vector<8x128xf32>
      tpu.vector_store %arg11[%c0_76, %c0_77], %233 {strides = array<i32>} : memref<8x128xf32, #tpu.memory_space<vmem>>, vector<8x128xf32>,
      %c0_78 = arith.constant 0 : index
      %c0_79 = arith.constant 0 : index
      %235 = vector.load %arg6[%c0_78, %c0_79] : memref<8x128xf32, #tpu.memory_space<vmem>>, vector<8x128xf32>
      %c0_80 = arith.constant 0 : index
      %c0_81 = arith.constant 0 : index
      %236 = vector.load %arg12[%c0_80, %c0_81] : memref<8x128xf32, #tpu.memory_space<vmem>>, vector<8x128xf32>
      tpu.vector_store %arg12[%c0_80, %c0_81], %235 {strides = array<i32>} : memref<8x128xf32, #tpu.memory_space<vmem>>, vector<8x128xf32>,
    } else {
    }
    %c0 = arith.constant 0 : index
    %c0_1 = arith.constant 0 : index
    %3 = vector.load %arg4[%c0, %c0_1] : memref<1x512xf32, #tpu.memory_space<vmem>>, vector<1x512xf32>
    %c0_2 = arith.constant 0 : index
    %c0_3 = arith.constant 0 : index
    %4 = vector.load %arg2[%c0_2, %c0_3] : memref<8x512xf32, #tpu.memory_space<vmem>>, vector<8x512xf32>
    %c0_4 = arith.constant 0 : index
    %c0_5 = arith.constant 0 : index
    %c0_6 = arith.constant 0 : index
    %5 = vector.load %arg1[%c0_4, %c0_5, %c0_6] : memref<8x8x8xf32, #tpu.memory_space<vmem>>, vector<4x8x8xf32>
    %6 = vector.shape_cast %5 : vector<4x8x8xf32> to vector<32x8xf32>
    %cst = arith.constant dense<0.000000e+00> : vector<32x512xf32>
    %7 = tpu.matmul %6, %4, %cst {dimension_numbers = #tpu.dot_dimension_numbers<[1], [0], [0], [1], [0, 0, 1, 1], [], []>} : vector<32x8xf32>, vector<8x512xf32>, vector<32x512xf32> -> vector<32x512xf32>
    %8 = vector.broadcast %3 : vector<1x512xf32> to vector<32x512xf32>
    %9 = arith.addf %7, %8 : vector<32x512xf32>
    %c0_7 = arith.constant 0 : index
    %c0_8 = arith.constant 0 : index
    %10 = vector.load %arg10[%c0_7, %c0_8] : memref<64x512xf32, #tpu.memory_space<vmem>>, vector<32x512xf32>
    tpu.vector_store %arg10[%c0_7, %c0_8], %9 {strides = array<i32>} : memref<64x512xf32, #tpu.memory_space<vmem>>, vector<32x512xf32>,
    %c4 = arith.constant 4 : index
    %c0_9 = arith.constant 0 : index
    %c0_10 = arith.constant 0 : index
    %11 = vector.load %arg1[%c4, %c0_9, %c0_10] : memref<8x8x8xf32, #tpu.memory_space<vmem>>, vector<4x8x8xf32>
    %12 = vector.shape_cast %11 : vector<4x8x8xf32> to vector<32x8xf32>
    %cst_11 = arith.constant dense<0.000000e+00> : vector<32x512xf32>
    %13 = tpu.matmul %12, %4, %cst_11 {dimension_numbers = #tpu.dot_dimension_numbers<[1], [0], [0], [1], [0, 0, 1, 1], [], []>} : vector<32x8xf32>, vector<8x512xf32>, vector<32x512xf32> -> vector<32x512xf32>
    %14 = vector.broadcast %3 : vector<1x512xf32> to vector<32x512xf32>
    %15 = arith.addf %13, %14 : vector<32x512xf32>
    %c32 = arith.constant 32 : index
    %c0_12 = arith.constant 0 : index
    %16 = vector.load %arg10[%c32, %c0_12] : memref<64x512xf32, #tpu.memory_space<vmem>>, vector<32x512xf32>
    tpu.vector_store %arg10[%c32, %c0_12], %15 {strides = array<i32>} : memref<64x512xf32, #tpu.memory_space<vmem>>, vector<32x512xf32>,
    %c0_13 = arith.constant 0 : index
    %c0_14 = arith.constant 0 : index
    %17 = vector.load %arg3[%c0_13, %c0_14] : memref<128x512xf32, #tpu.memory_space<vmem>>, vector<128x512xf32>
    %c0_15 = arith.constant 0 : index
    %c0_16 = arith.constant 0 : index
    %18 = vector.load %arg11[%c0_15, %c0_16] : memref<8x128xf32, #tpu.memory_space<vmem>>, vector<8x128xf32>
    %c0_17 = arith.constant 0 : index
    %c0_18 = arith.constant 0 : index
    %19 = vector.load %arg12[%c0_17, %c0_18] : memref<8x128xf32, #tpu.memory_space<vmem>>, vector<8x128xf32>
    %c0_i32_19 = arith.constant 0 : i32
    %c8_i32 = arith.constant 8 : i32
    %20 = arith.muli %c0_i32_19, %c8_i32 : i32
    %21 = tpu.assume_multiple %20, 8 : i32
    %22 = arith.index_cast %21 : i32 to index
    %c0_20 = arith.constant 0 : index
    %23 = vector.load %arg10[%22, %c0_20] : memref<64x512xf32, #tpu.memory_space<vmem>>, vector<8x512xf32>
    %cst_21 = arith.constant dense<0.000000e+00> : vector<8x512xf32>
    %24 = tpu.matmul %18, %17, %cst_21 {dimension_numbers = #tpu.dot_dimension_numbers<[1], [0], [0], [1], [0, 0, 1, 1], [], []>} : vector<8x128xf32>, vector<128x512xf32>, vector<8x512xf32> -> vector<8x512xf32>
    %25 = arith.addf %23, %24 : vector<8x512xf32>
    %26 = vector.extract_strided_slice %25 {offsets = [0, 0], sizes = [8, 384], strides = [1, 1]} : vector<8x512xf32> to vector<8x384xf32>
    %27 = arith.negf %26 : vector<8x384xf32>
    %28 = math.exp %27 : vector<8x384xf32>
    %cst_22 = arith.constant 1.000000e+00 : f32
    %29 = vector.broadcast %cst_22 : f32 to vector<8x384xf32>
    %30 = arith.addf %29, %28 : vector<8x384xf32>
    %31 = arith.divf %29, %30 : vector<8x384xf32>
    %32 = vector.extract_strided_slice %25 {offsets = [0, 384], sizes = [8, 128], strides = [1, 1]} : vector<8x512xf32> to vector<8x128xf32>
    %33 = math.tanh %32 : vector<8x128xf32>
    %34 = vector.extract_strided_slice %31 {offsets = [0, 0], sizes = [8, 128], strides = [1, 1]} : vector<8x384xf32> to vector<8x128xf32>
    %35 = vector.extract_strided_slice %31 {offsets = [0, 128], sizes = [8, 128], strides = [1, 1]} : vector<8x384xf32> to vector<8x128xf32>
    %36 = vector.extract_strided_slice %31 {offsets = [0, 256], sizes = [8, 128], strides = [1, 1]} : vector<8x384xf32> to vector<8x128xf32>
    %37 = arith.mulf %35, %19 : vector<8x128xf32>
    %38 = arith.mulf %34, %33 : vector<8x128xf32>
    %39 = arith.addf %37, %38 : vector<8x128xf32>
    %40 = math.tanh %39 : vector<8x128xf32>
    %41 = arith.mulf %36, %40 : vector<8x128xf32>
    %42 = arith.index_cast %c0_i32_19 : i32 to index
    %c0_23 = arith.constant 0 : index
    %c0_24 = arith.constant 0 : index
    %43 = vector.load %arg7[%42, %c0_23, %c0_24] : memref<8x8x128xf32, #tpu.memory_space<vmem>>, vector<1x8x128xf32>
    %44 = vector.shape_cast %43 : vector<1x8x128xf32> to vector<8x128xf32>
    %45 = vector.shape_cast %41 : vector<8x128xf32> to vector<1x8x128xf32>
    tpu.vector_store %arg7[%42, %c0_23, %c0_24], %45 {strides = array<i32>} : memref<8x8x128xf32, #tpu.memory_space<vmem>>, vector<1x8x128xf32>,
    %c1_i32 = arith.constant 1 : i32
    %c8_i32_25 = arith.constant 8 : i32
    %46 = arith.muli %c1_i32, %c8_i32_25 : i32
    %47 = tpu.assume_multiple %46, 8 : i32
    %48 = arith.index_cast %47 : i32 to index
    %c0_26 = arith.constant 0 : index
    %49 = vector.load %arg10[%48, %c0_26] : memref<64x512xf32, #tpu.memory_space<vmem>>, vector<8x512xf32>
    %cst_27 = arith.constant dense<0.000000e+00> : vector<8x512xf32>
    %50 = tpu.matmul %41, %17, %cst_27 {dimension_numbers = #tpu.dot_dimension_numbers<[1], [0], [0], [1], [0, 0, 1, 1], [], []>} : vector<8x128xf32>, vector<128x512xf32>, vector<8x512xf32> -> vector<8x512xf32>
    %51 = arith.addf %49, %50 : vector<8x512xf32>
    %52 = vector.extract_strided_slice %51 {offsets = [0, 0], sizes = [8, 384], strides = [1, 1]} : vector<8x512xf32> to vector<8x384xf32>
    %53 = arith.negf %52 : vector<8x384xf32>
    %54 = math.exp %53 : vector<8x384xf32>
    %cst_28 = arith.constant 1.000000e+00 : f32
    %55 = vector.broadcast %cst_28 : f32 to vector<8x384xf32>
    %56 = arith.addf %55, %54 : vector<8x384xf32>
    %57 = arith.divf %55, %56 : vector<8x384xf32>
    %58 = vector.extract_strided_slice %51 {offsets = [0, 384], sizes = [8, 128], strides = [1, 1]} : vector<8x512xf32> to vector<8x128xf32>
    %59 = math.tanh %58 : vector<8x128xf32>
    %60 = vector.extract_strided_slice %57 {offsets = [0, 0], sizes = [8, 128], strides = [1, 1]} : vector<8x384xf32> to vector<8x128xf32>
    %61 = vector.extract_strided_slice %57 {offsets = [0, 128], sizes = [8, 128], strides = [1, 1]} : vector<8x384xf32> to vector<8x128xf32>
    %62 = vector.extract_strided_slice %57 {offsets = [0, 256], sizes = [8, 128], strides = [1, 1]} : vector<8x384xf32> to vector<8x128xf32>
    %63 = arith.mulf %61, %39 : vector<8x128xf32>
    %64 = arith.mulf %60, %59 : vector<8x128xf32>
    %65 = arith.addf %63, %64 : vector<8x128xf32>
    %66 = math.tanh %65 : vector<8x128xf32>
    %67 = arith.mulf %62, %66 : vector<8x128xf32>
    %68 = arith.index_cast %c1_i32 : i32 to index
    %c0_29 = arith.constant 0 : index
    %c0_30 = arith.constant 0 : index
    %69 = vector.load %arg7[%68, %c0_29, %c0_30] : memref<8x8x128xf32, #tpu.memory_space<vmem>>, vector<1x8x128xf32>
    %70 = vector.shape_cast %69 : vector<1x8x128xf32> to vector<8x128xf32>
    %71 = vector.shape_cast %67 : vector<8x128xf32> to vector<1x8x128xf32>
    tpu.vector_store %arg7[%68, %c0_29, %c0_30], %71 {strides = array<i32>} : memref<8x8x128xf32, #tpu.memory_space<vmem>>, vector<1x8x128xf32>,
    %c2_i32 = arith.constant 2 : i32
    %c8_i32_31 = arith.constant 8 : i32
    %72 = arith.muli %c2_i32, %c8_i32_31 : i32
    %73 = tpu.assume_multiple %72, 8 : i32
    %74 = arith.index_cast %73 : i32 to index
    %c0_32 = arith.constant 0 : index
    %75 = vector.load %arg10[%74, %c0_32] : memref<64x512xf32, #tpu.memory_space<vmem>>, vector<8x512xf32>
    %cst_33 = arith.constant dense<0.000000e+00> : vector<8x512xf32>
    %76 = tpu.matmul %67, %17, %cst_33 {dimension_numbers = #tpu.dot_dimension_numbers<[1], [0], [0], [1], [0, 0, 1, 1], [], []>} : vector<8x128xf32>, vector<128x512xf32>, vector<8x512xf32> -> vector<8x512xf32>
    %77 = arith.addf %75, %76 : vector<8x512xf32>
    %78 = vector.extract_strided_slice %77 {offsets = [0, 0], sizes = [8, 384], strides = [1, 1]} : vector<8x512xf32> to vector<8x384xf32>
    %79 = arith.negf %78 : vector<8x384xf32>
    %80 = math.exp %79 : vector<8x384xf32>
    %cst_34 = arith.constant 1.000000e+00 : f32
    %81 = vector.broadcast %cst_34 : f32 to vector<8x384xf32>
    %82 = arith.addf %81, %80 : vector<8x384xf32>
    %83 = arith.divf %81, %82 : vector<8x384xf32>
    %84 = vector.extract_strided_slice %77 {offsets = [0, 384], sizes = [8, 128], strides = [1, 1]} : vector<8x512xf32> to vector<8x128xf32>
    %85 = math.tanh %84 : vector<8x128xf32>
    %86 = vector.extract_strided_slice %83 {offsets = [0, 0], sizes = [8, 128], strides = [1, 1]} : vector<8x384xf32> to vector<8x128xf32>
    %87 = vector.extract_strided_slice %83 {offsets = [0, 128], sizes = [8, 128], strides = [1, 1]} : vector<8x384xf32> to vector<8x128xf32>
    %88 = vector.extract_strided_slice %83 {offsets = [0, 256], sizes = [8, 128], strides = [1, 1]} : vector<8x384xf32> to vector<8x128xf32>
    %89 = arith.mulf %87, %65 : vector<8x128xf32>
    %90 = arith.mulf %86, %85 : vector<8x128xf32>
    %91 = arith.addf %89, %90 : vector<8x128xf32>
    %92 = math.tanh %91 : vector<8x128xf32>
    %93 = arith.mulf %88, %92 : vector<8x128xf32>
    %94 = arith.index_cast %c2_i32 : i32 to index
    %c0_35 = arith.constant 0 : index
    %c0_36 = arith.constant 0 : index
    %95 = vector.load %arg7[%94, %c0_35, %c0_36] : memref<8x8x128xf32, #tpu.memory_space<vmem>>, vector<1x8x128xf32>
    %96 = vector.shape_cast %95 : vector<1x8x128xf32> to vector<8x128xf32>
    %97 = vector.shape_cast %93 : vector<8x128xf32> to vector<1x8x128xf32>
    tpu.vector_store %arg7[%94, %c0_35, %c0_36], %97 {strides = array<i32>} : memref<8x8x128xf32, #tpu.memory_space<vmem>>, vector<1x8x128xf32>,
    %c3_i32 = arith.constant 3 : i32
    %c8_i32_37 = arith.constant 8 : i32
    %98 = arith.muli %c3_i32, %c8_i32_37 : i32
    %99 = tpu.assume_multiple %98, 8 : i32
    %100 = arith.index_cast %99 : i32 to index
    %c0_38 = arith.constant 0 : index
    %101 = vector.load %arg10[%100, %c0_38] : memref<64x512xf32, #tpu.memory_space<vmem>>, vector<8x512xf32>
    %cst_39 = arith.constant dense<0.000000e+00> : vector<8x512xf32>
    %102 = tpu.matmul %93, %17, %cst_39 {dimension_numbers = #tpu.dot_dimension_numbers<[1], [0], [0], [1], [0, 0, 1, 1], [], []>} : vector<8x128xf32>, vector<128x512xf32>, vector<8x512xf32> -> vector<8x512xf32>
    %103 = arith.addf %101, %102 : vector<8x512xf32>
    %104 = vector.extract_strided_slice %103 {offsets = [0, 0], sizes = [8, 384], strides = [1, 1]} : vector<8x512xf32> to vector<8x384xf32>
    %105 = arith.negf %104 : vector<8x384xf32>
    %106 = math.exp %105 : vector<8x384xf32>
    %cst_40 = arith.constant 1.000000e+00 : f32
    %107 = vector.broadcast %cst_40 : f32 to vector<8x384xf32>
    %108 = arith.addf %107, %106 : vector<8x384xf32>
    %109 = arith.divf %107, %108 : vector<8x384xf32>
    %110 = vector.extract_strided_slice %103 {offsets = [0, 384], sizes = [8, 128], strides = [1, 1]} : vector<8x512xf32> to vector<8x128xf32>
    %111 = math.tanh %110 : vector<8x128xf32>
    %112 = vector.extract_strided_slice %109 {offsets = [0, 0], sizes = [8, 128], strides = [1, 1]} : vector<8x384xf32> to vector<8x128xf32>
    %113 = vector.extract_strided_slice %109 {offsets = [0, 128], sizes = [8, 128], strides = [1, 1]} : vector<8x384xf32> to vector<8x128xf32>
    %114 = vector.extract_strided_slice %109 {offsets = [0, 256], sizes = [8, 128], strides = [1, 1]} : vector<8x384xf32> to vector<8x128xf32>
    %115 = arith.mulf %113, %91 : vector<8x128xf32>
    %116 = arith.mulf %112, %111 : vector<8x128xf32>
    %117 = arith.addf %115, %116 : vector<8x128xf32>
    %118 = math.tanh %117 : vector<8x128xf32>
    %119 = arith.mulf %114, %118 : vector<8x128xf32>
    %120 = arith.index_cast %c3_i32 : i32 to index
    %c0_41 = arith.constant 0 : index
    %c0_42 = arith.constant 0 : index
    %121 = vector.load %arg7[%120, %c0_41, %c0_42] : memref<8x8x128xf32, #tpu.memory_space<vmem>>, vector<1x8x128xf32>
    %122 = vector.shape_cast %121 : vector<1x8x128xf32> to vector<8x128xf32>
    %123 = vector.shape_cast %119 : vector<8x128xf32> to vector<1x8x128xf32>
    tpu.vector_store %arg7[%120, %c0_41, %c0_42], %123 {strides = array<i32>} : memref<8x8x128xf32, #tpu.memory_space<vmem>>, vector<1x8x128xf32>,
    %c4_i32 = arith.constant 4 : i32
    %c8_i32_43 = arith.constant 8 : i32
    %124 = arith.muli %c4_i32, %c8_i32_43 : i32
    %125 = tpu.assume_multiple %124, 8 : i32
    %126 = arith.index_cast %125 : i32 to index
    %c0_44 = arith.constant 0 : index
    %127 = vector.load %arg10[%126, %c0_44] : memref<64x512xf32, #tpu.memory_space<vmem>>, vector<8x512xf32>
    %cst_45 = arith.constant dense<0.000000e+00> : vector<8x512xf32>
    %128 = tpu.matmul %119, %17, %cst_45 {dimension_numbers = #tpu.dot_dimension_numbers<[1], [0], [0], [1], [0, 0, 1, 1], [], []>} : vector<8x128xf32>, vector<128x512xf32>, vector<8x512xf32> -> vector<8x512xf32>
    %129 = arith.addf %127, %128 : vector<8x512xf32>
    %130 = vector.extract_strided_slice %129 {offsets = [0, 0], sizes = [8, 384], strides = [1, 1]} : vector<8x512xf32> to vector<8x384xf32>
    %131 = arith.negf %130 : vector<8x384xf32>
    %132 = math.exp %131 : vector<8x384xf32>
    %cst_46 = arith.constant 1.000000e+00 : f32
    %133 = vector.broadcast %cst_46 : f32 to vector<8x384xf32>
    %134 = arith.addf %133, %132 : vector<8x384xf32>
    %135 = arith.divf %133, %134 : vector<8x384xf32>
    %136 = vector.extract_strided_slice %129 {offsets = [0, 384], sizes = [8, 128], strides = [1, 1]} : vector<8x512xf32> to vector<8x128xf32>
    %137 = math.tanh %136 : vector<8x128xf32>
    %138 = vector.extract_strided_slice %135 {offsets = [0, 0], sizes = [8, 128], strides = [1, 1]} : vector<8x384xf32> to vector<8x128xf32>
    %139 = vector.extract_strided_slice %135 {offsets = [0, 128], sizes = [8, 128], strides = [1, 1]} : vector<8x384xf32> to vector<8x128xf32>
    %140 = vector.extract_strided_slice %135 {offsets = [0, 256], sizes = [8, 128], strides = [1, 1]} : vector<8x384xf32> to vector<8x128xf32>
    %141 = arith.mulf %139, %117 : vector<8x128xf32>
    %142 = arith.mulf %138, %137 : vector<8x128xf32>
    %143 = arith.addf %141, %142 : vector<8x128xf32>
    %144 = math.tanh %143 : vector<8x128xf32>
    %145 = arith.mulf %140, %144 : vector<8x128xf32>
    %146 = arith.index_cast %c4_i32 : i32 to index
    %c0_47 = arith.constant 0 : index
    %c0_48 = arith.constant 0 : index
    %147 = vector.load %arg7[%146, %c0_47, %c0_48] : memref<8x8x128xf32, #tpu.memory_space<vmem>>, vector<1x8x128xf32>
    %148 = vector.shape_cast %147 : vector<1x8x128xf32> to vector<8x128xf32>
    %149 = vector.shape_cast %145 : vector<8x128xf32> to vector<1x8x128xf32>
    tpu.vector_store %arg7[%146, %c0_47, %c0_48], %149 {strides = array<i32>} : memref<8x8x128xf32, #tpu.memory_space<vmem>>, vector<1x8x128xf32>,
    %c5_i32 = arith.constant 5 : i32
    %c8_i32_49 = arith.constant 8 : i32
    %150 = arith.muli %c5_i32, %c8_i32_49 : i32
    %151 = tpu.assume_multiple %150, 8 : i32
    %152 = arith.index_cast %151 : i32 to index
    %c0_50 = arith.constant 0 : index
    %153 = vector.load %arg10[%152, %c0_50] : memref<64x512xf32, #tpu.memory_space<vmem>>, vector<8x512xf32>
    %cst_51 = arith.constant dense<0.000000e+00> : vector<8x512xf32>
    %154 = tpu.matmul %145, %17, %cst_51 {dimension_numbers = #tpu.dot_dimension_numbers<[1], [0], [0], [1], [0, 0, 1, 1], [], []>} : vector<8x128xf32>, vector<128x512xf32>, vector<8x512xf32> -> vector<8x512xf32>
    %155 = arith.addf %153, %154 : vector<8x512xf32>
    %156 = vector.extract_strided_slice %155 {offsets = [0, 0], sizes = [8, 384], strides = [1, 1]} : vector<8x512xf32> to vector<8x384xf32>
    %157 = arith.negf %156 : vector<8x384xf32>
    %158 = math.exp %157 : vector<8x384xf32>
    %cst_52 = arith.constant 1.000000e+00 : f32
    %159 = vector.broadcast %cst_52 : f32 to vector<8x384xf32>
    %160 = arith.addf %159, %158 : vector<8x384xf32>
    %161 = arith.divf %159, %160 : vector<8x384xf32>
    %162 = vector.extract_strided_slice %155 {offsets = [0, 384], sizes = [8, 128], strides = [1, 1]} : vector<8x512xf32> to vector<8x128xf32>
    %163 = math.tanh %162 : vector<8x128xf32>
    %164 = vector.extract_strided_slice %161 {offsets = [0, 0], sizes = [8, 128], strides = [1, 1]} : vector<8x384xf32> to vector<8x128xf32>
    %165 = vector.extract_strided_slice %161 {offsets = [0, 128], sizes = [8, 128], strides = [1, 1]} : vector<8x384xf32> to vector<8x128xf32>
    %166 = vector.extract_strided_slice %161 {offsets = [0, 256], sizes = [8, 128], strides = [1, 1]} : vector<8x384xf32> to vector<8x128xf32>
    %167 = arith.mulf %165, %143 : vector<8x128xf32>
    %168 = arith.mulf %164, %163 : vector<8x128xf32>
    %169 = arith.addf %167, %168 : vector<8x128xf32>
    %170 = math.tanh %169 : vector<8x128xf32>
    %171 = arith.mulf %166, %170 : vector<8x128xf32>
    %172 = arith.index_cast %c5_i32 : i32 to index
    %c0_53 = arith.constant 0 : index
    %c0_54 = arith.constant 0 : index
    %173 = vector.load %arg7[%172, %c0_53, %c0_54] : memref<8x8x128xf32, #tpu.memory_space<vmem>>, vector<1x8x128xf32>
    %174 = vector.shape_cast %173 : vector<1x8x128xf32> to vector<8x128xf32>
    %175 = vector.shape_cast %171 : vector<8x128xf32> to vector<1x8x128xf32>
    tpu.vector_store %arg7[%172, %c0_53, %c0_54], %175 {strides = array<i32>} : memref<8x8x128xf32, #tpu.memory_space<vmem>>, vector<1x8x128xf32>,
    %c6_i32 = arith.constant 6 : i32
    %c8_i32_55 = arith.constant 8 : i32
    %176 = arith.muli %c6_i32, %c8_i32_55 : i32
    %177 = tpu.assume_multiple %176, 8 : i32
    %178 = arith.index_cast %177 : i32 to index
    %c0_56 = arith.constant 0 : index
    %179 = vector.load %arg10[%178, %c0_56] : memref<64x512xf32, #tpu.memory_space<vmem>>, vector<8x512xf32>
    %cst_57 = arith.constant dense<0.000000e+00> : vector<8x512xf32>
    %180 = tpu.matmul %171, %17, %cst_57 {dimension_numbers = #tpu.dot_dimension_numbers<[1], [0], [0], [1], [0, 0, 1, 1], [], []>} : vector<8x128xf32>, vector<128x512xf32>, vector<8x512xf32> -> vector<8x512xf32>
    %181 = arith.addf %179, %180 : vector<8x512xf32>
    %182 = vector.extract_strided_slice %181 {offsets = [0, 0], sizes = [8, 384], strides = [1, 1]} : vector<8x512xf32> to vector<8x384xf32>
    %183 = arith.negf %182 : vector<8x384xf32>
    %184 = math.exp %183 : vector<8x384xf32>
    %cst_58 = arith.constant 1.000000e+00 : f32
    %185 = vector.broadcast %cst_58 : f32 to vector<8x384xf32>
    %186 = arith.addf %185, %184 : vector<8x384xf32>
    %187 = arith.divf %185, %186 : vector<8x384xf32>
    %188 = vector.extract_strided_slice %181 {offsets = [0, 384], sizes = [8, 128], strides = [1, 1]} : vector<8x512xf32> to vector<8x128xf32>
    %189 = math.tanh %188 : vector<8x128xf32>
    %190 = vector.extract_strided_slice %187 {offsets = [0, 0], sizes = [8, 128], strides = [1, 1]} : vector<8x384xf32> to vector<8x128xf32>
    %191 = vector.extract_strided_slice %187 {offsets = [0, 128], sizes = [8, 128], strides = [1, 1]} : vector<8x384xf32> to vector<8x128xf32>
    %192 = vector.extract_strided_slice %187 {offsets = [0, 256], sizes = [8, 128], strides = [1, 1]} : vector<8x384xf32> to vector<8x128xf32>
    %193 = arith.mulf %191, %169 : vector<8x128xf32>
    %194 = arith.mulf %190, %189 : vector<8x128xf32>
    %195 = arith.addf %193, %194 : vector<8x128xf32>
    %196 = math.tanh %195 : vector<8x128xf32>
    %197 = arith.mulf %192, %196 : vector<8x128xf32>
    %198 = arith.index_cast %c6_i32 : i32 to index
    %c0_59 = arith.constant 0 : index
    %c0_60 = arith.constant 0 : index
    %199 = vector.load %arg7[%198, %c0_59, %c0_60] : memref<8x8x128xf32, #tpu.memory_space<vmem>>, vector<1x8x128xf32>
    %200 = vector.shape_cast %199 : vector<1x8x128xf32> to vector<8x128xf32>
    %201 = vector.shape_cast %197 : vector<8x128xf32> to vector<1x8x128xf32>
    tpu.vector_store %arg7[%198, %c0_59, %c0_60], %201 {strides = array<i32>} : memref<8x8x128xf32, #tpu.memory_space<vmem>>, vector<1x8x128xf32>,
    %c7_i32 = arith.constant 7 : i32
    %c8_i32_61 = arith.constant 8 : i32
    %202 = arith.muli %c7_i32, %c8_i32_61 : i32
    %203 = tpu.assume_multiple %202, 8 : i32
    %204 = arith.index_cast %203 : i32 to index
    %c0_62 = arith.constant 0 : index
    %205 = vector.load %arg10[%204, %c0_62] : memref<64x512xf32, #tpu.memory_space<vmem>>, vector<8x512xf32>
    %cst_63 = arith.constant dense<0.000000e+00> : vector<8x512xf32>
    %206 = tpu.matmul %197, %17, %cst_63 {dimension_numbers = #tpu.dot_dimension_numbers<[1], [0], [0], [1], [0, 0, 1, 1], [], []>} : vector<8x128xf32>, vector<128x512xf32>, vector<8x512xf32> -> vector<8x512xf32>
    %207 = arith.addf %205, %206 : vector<8x512xf32>
    %208 = vector.extract_strided_slice %207 {offsets = [0, 0], sizes = [8, 384], strides = [1, 1]} : vector<8x512xf32> to vector<8x384xf32>
    %209 = arith.negf %208 : vector<8x384xf32>
    %210 = math.exp %209 : vector<8x384xf32>
    %cst_64 = arith.constant 1.000000e+00 : f32
    %211 = vector.broadcast %cst_64 : f32 to vector<8x384xf32>
    %212 = arith.addf %211, %210 : vector<8x384xf32>
    %213 = arith.divf %211, %212 : vector<8x384xf32>
    %214 = vector.extract_strided_slice %207 {offsets = [0, 384], sizes = [8, 128], strides = [1, 1]} : vector<8x512xf32> to vector<8x128xf32>
    %215 = math.tanh %214 : vector<8x128xf32>
    %216 = vector.extract_strided_slice %213 {offsets = [0, 0], sizes = [8, 128], strides = [1, 1]} : vector<8x384xf32> to vector<8x128xf32>
    %217 = vector.extract_strided_slice %213 {offsets = [0, 128], sizes = [8, 128], strides = [1, 1]} : vector<8x384xf32> to vector<8x128xf32>
    %218 = vector.extract_strided_slice %213 {offsets = [0, 256], sizes = [8, 128], strides = [1, 1]} : vector<8x384xf32> to vector<8x128xf32>
    %219 = arith.mulf %217, %195 : vector<8x128xf32>
    %220 = arith.mulf %216, %215 : vector<8x128xf32>
    %221 = arith.addf %219, %220 : vector<8x128xf32>
    %222 = math.tanh %221 : vector<8x128xf32>
    %223 = arith.mulf %218, %222 : vector<8x128xf32>
    %224 = arith.index_cast %c7_i32 : i32 to index
    %c0_65 = arith.constant 0 : index
    %c0_66 = arith.constant 0 : index
    %225 = vector.load %arg7[%224, %c0_65, %c0_66] : memref<8x8x128xf32, #tpu.memory_space<vmem>>, vector<1x8x128xf32>
    %226 = vector.shape_cast %225 : vector<1x8x128xf32> to vector<8x128xf32>
    %227 = vector.shape_cast %223 : vector<8x128xf32> to vector<1x8x128xf32>
    tpu.vector_store %arg7[%224, %c0_65, %c0_66], %227 {strides = array<i32>} : memref<8x8x128xf32, #tpu.memory_space<vmem>>, vector<1x8x128xf32>,
    %c8_i32_67 = arith.constant 8 : i32
    %c0_68 = arith.constant 0 : index
    %c0_69 = arith.constant 0 : index
    %228 = vector.load %arg11[%c0_68, %c0_69] : memref<8x128xf32, #tpu.memory_space<vmem>>, vector<8x128xf32>
    tpu.vector_store %arg11[%c0_68, %c0_69], %223 {strides = array<i32>} : memref<8x128xf32, #tpu.memory_space<vmem>>, vector<8x128xf32>,
    %c0_70 = arith.constant 0 : index
    %c0_71 = arith.constant 0 : index
    %229 = vector.load %arg12[%c0_70, %c0_71] : memref<8x128xf32, #tpu.memory_space<vmem>>, vector<8x128xf32>
    tpu.vector_store %arg12[%c0_70, %c0_71], %221 {strides = array<i32>} : memref<8x128xf32, #tpu.memory_space<vmem>>, vector<8x128xf32>,
    %c0_i32_72 = arith.constant 0 : i32
    %230 = arith.cmpi eq, %arg0, %c0_i32_72 : i32
    %231 = arith.extui %230 : i1 to i32
    %c0_i32_73 = arith.constant 0 : i32
    %232 = arith.cmpi ne, %231, %c0_i32_73 : i32
    scf.if %232 {
      %c0_74 = arith.constant 0 : index
      %c0_75 = arith.constant 0 : index
      %233 = vector.load %arg8[%c0_74, %c0_75] : memref<8x128xf32, #tpu.memory_space<vmem>>, vector<8x128xf32>
      tpu.vector_store %arg8[%c0_74, %c0_75], %223 {strides = array<i32>} : memref<8x128xf32, #tpu.memory_space<vmem>>, vector<8x128xf32>,
      %c0_76 = arith.constant 0 : index
      %c0_77 = arith.constant 0 : index
      %234 = vector.load %arg9[%c0_76, %c0_77] : memref<8x128xf32, #tpu.memory_space<vmem>>, vector<8x128xf32>
      tpu.vector_store %arg9[%c0_76, %c0_77], %221 {strides = array<i32>} : memref<8x128xf32, #tpu.memory_space<vmem>>, vector<8x128xf32>,
    } else {
    }
    return
  }
  func.func @transform_0(%arg0: i32) -> (i32, i32, i32) {
    %c0_i32 = arith.constant 0 : i32
    %c0_i32_0 = arith.constant 0 : i32
    %c0_i32_1 = arith.constant 0 : i32
    return %arg0, %c0_i32, %c0_i32_0 : i32, i32, i32
  }
  func.func @transform_1(%arg0: i32) -> (i32, i32) {
    %c0_i32 = arith.constant 0 : i32
    %c0_i32_0 = arith.constant 0 : i32
    %c0_i32_1 = arith.constant 0 : i32
    return %c0_i32, %c0_i32_0 : i32, i32
  }
  func.func @transform_2(%arg0: i32) -> (i32, i32) {
    %c0_i32 = arith.constant 0 : i32
    %c0_i32_0 = arith.constant 0 : i32
    %c0_i32_1 = arith.constant 0 : i32
    return %c0_i32, %c0_i32_0 : i32, i32
  }
  func.func @transform_3(%arg0: i32) -> (i32, i32) {
    %c0_i32 = arith.constant 0 : i32
    %c0_i32_0 = arith.constant 0 : i32
    %c0_i32_1 = arith.constant 0 : i32
    return %c0_i32, %c0_i32_0 : i32, i32
  }
  func.func @transform_4(%arg0: i32) -> (i32, i32) {
    %c0_i32 = arith.constant 0 : i32
    %c0_i32_0 = arith.constant 0 : i32
    %c0_i32_1 = arith.constant 0 : i32
    return %c0_i32, %c0_i32_0 : i32, i32
  }
  func.func @transform_5(%arg0: i32) -> (i32, i32) {
    %c0_i32 = arith.constant 0 : i32
    %c0_i32_0 = arith.constant 0 : i32
    %c0_i32_1 = arith.constant 0 : i32
    return %c0_i32, %c0_i32_0 : i32, i32
  }
  func.func @transform_6(%arg0: i32) -> (i32, i32, i32) {
    %c0_i32 = arith.constant 0 : i32
    %c0_i32_0 = arith.constant 0 : i32
    %c0_i32_1 = arith.constant 0 : i32
    return %arg0, %c0_i32, %c0_i32_0 : i32, i32, i32
  }
  func.func @transform_7(%arg0: i32) -> (i32, i32) {
    %c0_i32 = arith.constant 0 : i32
    %c0_i32_0 = arith.constant 0 : i32
    %c0_i32_1 = arith.constant 0 : i32
    return %c0_i32, %c0_i32_0 : i32, i32
  }
  func.func @transform_8(%arg0: i32) -> (i32, i32) {
    %c0_i32 = arith.constant 0 : i32
    %c0_i32_0 = arith.constant 0 : i32
    %c0_i32_1 = arith.constant 0 : i32
    return %c0_i32, %c0_i32_0 : i32, i32
  }
}

</mosaic_0001>

<bundles_post_ra>
// kernel: tpu_custom_call.1
= control target key start
LH: loop header
LB: loop body
LE: loop exit
PB: predicated region body
PF: predicated region fallthrough
CT: control target
= control target key end

     0   :  { %14 = vsyncpa [#allocation6], 0  ;;  %s3332_s0 = inlined_call_operand.hbm [shape: f32[8,8,8], index: 0, kind: input, shape index: {}]   ;;  %s3333_s1 = inlined_call_operand.hbm [shape: f32[8,512], index: 1, kind: input, shape index: {}]   ;;  %s3334_s2 = inlined_call_operand.hbm [shape: f32[128,512], index: 2, kind: input, shape index: {}]   ;;  %s3335_s3 = inlined_call_operand.hbm [shape: f32[1,512], index: 3, kind: input, shape index: {}]   ;;  %s3336_s4 = inlined_call_operand.hbm [shape: f32[8,128], index: 4, kind: input, shape index: {}]   ;;  %s3337_s5 = inlined_call_operand.hbm [shape: f32[8,128], index: 5, kind: input, shape index: {}]   ;;  %s3338_s6 = inlined_call_operand.hbm [shape: f32[8,8,128], index: 6, kind: output, shape index: {0}]   ;;  %s3339_s7 = inlined_call_operand.hbm [shape: f32[8,128], index: 7, kind: output, shape index: {1}]   ;;  %s3340_s8 = inlined_call_operand.hbm [shape: f32[8,128], index: 8, kind: output, shape index: {2}]  }
   0x1   :  { %15 = vsyncpa [#allocation9], 0 }
   0x2   :  { %16 = vsyncpa [#allocation12], 0 }
   0x3   :  { %17 = vsyncpa [#allocation15], 0 }
   0x4   :  { %18 = vsyncpa [#allocation7], 0  ;;  %s38_s29 = sshll.u32 %s3333_s1, 4  ;;  %s39_s29 = int_to_ptr.hbm [resolvable:$true] %s38_s29 }
   0x5   :  { %19 = vsyncpa [#allocation18], 0  ;;  %s2303_s30 = smov [#allocation8]   ;;  %s62_s12 = sshll.u32 %s3335_s3, 4  ;;  %s63_s12 = int_to_ptr.hbm [resolvable:$true] %s62_s12 }
   0x6   :  { %s40_s9 = sshll.u32 %s2303_s30, 4  ;;  %s2304_s13 = smov [#allocation11]   ;;  %s41_s9 = int_to_ptr.vmem [resolvable:$true] %s40_s9 }
   0x7   :  { %43 = dma.hbm_to_vmem [thread:$0]  %s39_s29, 512, %s41_s9, [#allocation9]  }
   0x8   :  { %s64_s14 = sshll.u32 %s2304_s13, 4  ;;  %s24_s17 = sshll.u32 %s3332_s0, 4  ;;  %s65_s14 = int_to_ptr.vmem [resolvable:$true] %s64_s14  ;;  %s25_s17 = int_to_ptr.hbm [resolvable:$true] %s24_s17 }
   0x9   :  { %67 = dma.hbm_to_vmem [thread:$0]  %s63_s12, 64, %s65_s14, [#allocation12]  }
   0xa   :  { %s2305_s1 = smov [#allocation5]   ;;  %s48_s21 = sshll.u32 %s3334_s2, 4  ;;  %s49_s21 = int_to_ptr.hbm [resolvable:$true] %s48_s21 }
   0xb   :  { %s26_s18 = sshll.u32 %s2305_s1, 4  ;;  %s2306_s22 = smov 128   ;;  %s27_s18 = int_to_ptr.vmem [resolvable:$true] %s26_s18 }
   0xc   :  { %s2307_s3 = smov 8   ;;  %s2308_s23 = smov [#allocation10]  }
   0xd   :  { %32 = dma.hbm_to_vmem [thread:$0]  %s25_s17, 1024, %s27_s18, [#allocation6], %s2306_s22, %s2306_s22, %s2307_s3  }
   0xe   :  { %s50_s24 = sshll.u32 %s2308_s23, 4  ;;  %s2309_s0 = smov 512   ;;  %s51_s24 = int_to_ptr.vmem [resolvable:$true] %s50_s24 }
   0xf   :  { %s2310_s25 = smov 32   ;;  %s73_s28 = sshll.u32 %s3336_s4, 4  ;;  %s74_s28 = int_to_ptr.hbm [resolvable:$true] %s73_s28 }
  0x10   :  { %56 = dma.hbm_to_vmem [thread:$0]  %s49_s21, 8192, %s51_s24, [#allocation9], %s2309_s0, %s2309_s0, %s2310_s25  }
  0x11   :  { %s2311_s29 = smov [#allocation13]   ;;  %s84_s10 = sshll.u32 %s3337_s5, 4  ;;  %s85_s10 = int_to_ptr.hbm [resolvable:$true] %s84_s10 }
  0x12   :  { %s75_s2 = sshll.u32 %s2311_s29, 4  ;;  %s2312_s11 = smov [#allocation14]   ;;  %s76_s2 = int_to_ptr.vmem [resolvable:$true] %s75_s2 }
  0x13   :  { %78 = dma.hbm_to_vmem [thread:$0]  %s74_s28, 128, %s76_s2, [#allocation12]  }
  0x14   :  { %s86_s12 = sshll.u32 %s2312_s11, 4  ;;  %s87_s12 = int_to_ptr.vmem [resolvable:$true] %s86_s12 }
  0x15   :  { %89 = dma.hbm_to_vmem [thread:$0]  %s85_s10, 128, %s87_s12, [#allocation15]  }
  0x16   :  { %2291 = dma.done.wait [#allocation6], 1024  }
  0x17   :  { %2292 = vsyncadd [#allocation6], 4294966272 }
  0x18   :  { %2293 = dma.done.wait [#allocation9], 8704  }
  0x19   :  { %2294 = vsyncadd [#allocation9], 4294958592 }
  0x1a   :  { %2295 = dma.done.wait [#allocation12], 192  }
  0x1b   :  { %2296 = vsyncadd [#allocation12], 4294967104 }
  0x1c   :  { %2297 = dma.done.wait [#allocation15], 128  }
  0x1d   :  { %2298 = vsyncadd [#allocation15], 4294967168  ;;  %v123_v0 = vld [vmem:[#allocation8] sm:$0xff]  ;;  %v124_v1 = vld [vmem:[#allocation8 + $0x8] sm:$0xff]  ;;  %vm140_vm0 = vcmask 64512   ;;  %s2313_s4 = smov [#allocation16]  }
  0x1e   :  { %v125_v2 = vld [vmem:[#allocation8 + $0x10] sm:$0xff]  ;;  %168 = vmatpush.msra.mxu0 %v123_v0  ;;  %197 = vmatpush.msra.mxu1 %v124_v1  ;;  %v126_v3 = vld [vmem:[#allocation8 + $0x18] sm:$0xff]  ;;  %v127_v4 = vld [vmem:[#allocation5] sm:$0xff]  ;;  %s1758_s5 = sshll.u32 %s2313_s4, 4  ;;  %s1760_s15 = sshll.u32 %s3338_s6, 4  ;;  %s1759_s5 = int_to_ptr.vmem [resolvable:$true] %s1758_s5  ;;  %s1761_s15 = int_to_ptr.hbm [resolvable:$true] %s1760_s15 }
  0x1f   :  { %226 = vmatpush.msra.mxu2 %v125_v2  ;;  %255 = vmatpush.msra.mxu3 %v126_v3  ;;  %v2386_v5 = vld [vmem:[#allocation10 + $0x1e0] sm:$0xff]  ;;  %v2388_v6 = vld [vmem:[#allocation10 + $0x1e8] sm:$0xff]  ;;  %v2390_v7 = vld [vmem:[#allocation10 + $0x1f0] sm:$0xff]  ;;  %s2314_s16 = smov [#allocation17]   ;;  %s1774_s19 = sshll.u32 %s3339_s7, 4  ;;  %s1775_s19 = int_to_ptr.hbm [resolvable:$true] %s1774_s19 }
  0x20   :  { %1814 = vmatmul.msk.f32.vlgmr.msra.gmra.mxu0 %vm140_vm0, %v127_v4  ;;  %1818 = vmatmul.msk.f32.vlgmr.msra.gmra.mxu1 %vm140_vm0, %v127_v4  ;;  %v2392_v8 = vld [vmem:[#allocation10 + $0x1f8] sm:$0xff]  ;;  %v2394_v9 = vld [vmem:[#allocation10 + $0x1c0] sm:$0xff]  ;;  %v2396_v10 = vld [vmem:[#allocation10 + $0x1c8] sm:$0xff]  ;;  %s1772_s17 = sshll.u32 %s2314_s16, 4  ;;  %s2315_s20 = smov [#allocation19]   ;;  %s1773_s17 = int_to_ptr.vmem [resolvable:$true] %s1772_s17 }
  0x21   :  { %1822 = vmatmul.msk.f32.vlgmr.msra.gmra.mxu2 %vm140_vm0, %v127_v4  ;;  %1826 = vmatmul.msk.f32.vlgmr.msra.gmra.mxu3 %vm140_vm0, %v127_v4  ;;  %3431 = vst [vmem:[#allocation26_spill] sm:$0xff] %v2392_v8  ;;  %v2400_v11 = vld [vmem:[#allocation10 + $0x1d0] sm:$0xff]  ;;  %v2402_v12 = vld [vmem:[#allocation10 + $0x1d8] sm:$0xff]  ;;  %v128_v13 = vld [vmem:[#allocation5 + $0x8] sm:$0xff]  ;;  %s1783_s21 = sshll.u32 %s2315_s20, 4  ;;  %s1785_s0 = sshll.u32 %s3340_s8, 4  ;;  %s1784_s21 = int_to_ptr.vmem [resolvable:$true] %s1783_s21  ;;  %s1786_s0 = int_to_ptr.hbm [resolvable:$true] %s1785_s0 }
  0x22   :  { %317 = vmatpush.msrb.mxu0 %v123_v0  ;;  %346 = vmatpush.msrb.mxu1 %v124_v1  ;;  %v2410_v14 = vld [vmem:[#allocation10 + $0x1a0] sm:$0xff]  ;;  %v2412_v15 = vld [vmem:[#allocation10 + $0x1a8] sm:$0xff]  ;;  %v2416_v16 = vld [vmem:[#allocation10 + $0x1b0] sm:$0xff] }
  0x23   :  { %375 = vmatpush.msrb.mxu2 %v125_v2  ;;  %404 = vmatpush.msrb.mxu3 %v126_v3  ;;  %v2418_v17 = vld [vmem:[#allocation10 + $0x1b8] sm:$0xff]  ;;  %v2422_v18 = vld [vmem:[#allocation10 + $0x180] sm:$0xff]  ;;  %v2424_v19 = vld [vmem:[#allocation10 + $0x188] sm:$0xff] }
  0x24   :  { %507 = vmatpush.msra.mxu0 %v2386_v5  ;;  %527 = vmatpush.msra.mxu1 %v2388_v6  ;;  %v2428_v20 = vld [vmem:[#allocation10 + $0x190] sm:$0xff]  ;;  %v2430_v21 = vld [vmem:[#allocation10 + $0x198] sm:$0xff]  ;;  %v2434_v22 = vld [vmem:[#allocation10 + $0x160] sm:$0xff] }
  0x25   :  { %547 = vmatpush.msra.mxu2 %v2390_v7  ;;  %567 = vmatpush.msra.mxu3 %v2392_v8  ;;  %v2436_v23 = vld [vmem:[#allocation10 + $0x168] sm:$0xff]  ;;  %v2440_v24 = vld [vmem:[#allocation10 + $0x170] sm:$0xff]  ;;  %v2442_v25 = vld [vmem:[#allocation10 + $0x178] sm:$0xff] }
  0x26   :  { %508 = vmatpush.msra.mxu0 %v2394_v9  ;;  %528 = vmatpush.msra.mxu1 %v2396_v10  ;;  %v129_v26 = vld [vmem:[#allocation5 + $0x10] sm:$0xff]  ;;  %v2450_v27 = vld [vmem:[#allocation10 + $0x140] sm:$0xff]  ;;  %v2452_v28 = vld [vmem:[#allocation10 + $0x148] sm:$0xff] }
  0x27   :  { %548 = vmatpush.msra.mxu2 %v2400_v11  ;;  %568 = vmatpush.msra.mxu3 %v2402_v12  ;;  %v2456_v29 = vld [vmem:[#allocation10 + $0x150] sm:$0xff]  ;;  %v2458_v30 = vld [vmem:[#allocation10 + $0x158] sm:$0xff]  ;;  %v2462_v31 = vld [vmem:[#allocation10 + $0x120] sm:$0xff] }
  0x28   :  { %1815 = vmatmul.msk.f32.gmra.mxu0 %vm140_vm0, %v128_v13  ;;  %1819 = vmatmul.msk.f32.gmra.mxu1 %vm140_vm0, %v128_v13  ;;  %v2464_v32 = vld [vmem:[#allocation10 + $0x128] sm:$0xff]  ;;  %v2468_v33 = vld [vmem:[#allocation10 + $0x130] sm:$0xff]  ;;  %v2470_v34 = vld [vmem:[#allocation10 + $0x138] sm:$0xff] }
  0x29   :  { %1823 = vmatmul.msk.f32.gmra.mxu2 %vm140_vm0, %v128_v13  ;;  %1827 = vmatmul.msk.f32.gmra.mxu3 %vm140_vm0, %v128_v13  ;;  %v2474_v35 = vld [vmem:[#allocation10 + $0x100] sm:$0xff]  ;;  %v2476_v36 = vld [vmem:[#allocation10 + $0x108] sm:$0xff]  ;;  %v2480_v37 = vld [vmem:[#allocation10 + $0x110] sm:$0xff] }
  0x2a   :  { %509 = vmatpush.msra.mxu0 %v2410_v14  ;;  %529 = vmatpush.msra.mxu1 %v2412_v15  ;;  %v2482_v38 = vld [vmem:[#allocation10 + $0x118] sm:$0xff]  ;;  %v2490_v40 = vld [vmem:[#allocation10 + $0xe0] sm:$0xff]  ;;  %v2492_v41 = vld [vmem:[#allocation10 + $0xe8] sm:$0xff] }
  0x2b   :  { %549 = vmatpush.msra.mxu2 %v2416_v16  ;;  %569 = vmatpush.msra.mxu3 %v2418_v17  ;;  %v130_v39 = vld [vmem:[#allocation5 + $0x18] sm:$0xff]  ;;  %v2496_v42 = vld [vmem:[#allocation10 + $0xf0] sm:$0xff]  ;;  %v2502_v44 = vld [vmem:[#allocation10 + $0xc0] sm:$0xff] }
  0x2c   :  { %510 = vmatpush.msra.mxu0 %v2422_v18  ;;  %530 = vmatpush.msra.mxu1 %v2424_v19  ;;  %v2498_v43 = vld [vmem:[#allocation10 + $0xf8] sm:$0xff]  ;;  %v2504_v45 = vld [vmem:[#allocation10 + $0xc8] sm:$0xff]  ;;  %v2508_v46 = vld [vmem:[#allocation10 + $0xd0] sm:$0xff] }
  0x2d   :  { %550 = vmatpush.msra.mxu2 %v2428_v20  ;;  %570 = vmatpush.msra.mxu3 %v2430_v21  ;;  %3432 = vst [vmem:[#allocation27_spill] sm:$0xff] %v2508_v46  ;;  %v2510_v47 = vld [vmem:[#allocation10 + $0xd8] sm:$0xff]  ;;  %v2514_v48 = vld [vmem:[#allocation10 + $0xa0] sm:$0xff]  ;;  %v2516_v49 = vld [vmem:[#allocation10 + $0xa8] sm:$0xff] }
  0x2e   :  { %511 = vmatpush.msra.mxu0 %v2434_v22  ;;  %531 = vmatpush.msra.mxu1 %v2436_v23  ;;  %3433 = vst [vmem:[#allocation28_spill] sm:$0xff] %v2510_v47  ;;  %v2520_v50 = vld [vmem:[#allocation10 + $0xb0] sm:$0xff]  ;;  %v2522_v51 = vld [vmem:[#allocation10 + $0xb8] sm:$0xff]  ;;  %v286_v52 = vld [vmem:[#allocation5 + $0x20] sm:$0xff] }
  0x2f   :  { %551 = vmatpush.msra.mxu2 %v2440_v24  ;;  %571 = vmatpush.msra.mxu3 %v2442_v25  ;;  %3434 = vst [vmem:[#allocation29_spill] sm:$0xff] %v2514_v48  ;;  %v2530_v53 = vld [vmem:[#allocation10 + $0x80] sm:$0xff]  ;;  %v2532_v54 = vld [vmem:[#allocation10 + $0x88] sm:$0xff]  ;;  %v2536_v55 = vld [vmem:[#allocation10 + $0x90] sm:$0xff] }
  0x30   :  { %1816 = vmatmul.msk.f32.gmra.mxu0 %vm140_vm0, %v129_v26  ;;  %1820 = vmatmul.msk.f32.gmra.mxu1 %vm140_vm0, %v129_v26  ;;  %3435 = vst [vmem:[#allocation30_spill] sm:$0xff] %v2516_v49  ;;  %v2538_v56 = vld [vmem:[#allocation10 + $0x98] sm:$0xff]  ;;  %v2542_v57 = vld [vmem:[#allocation10 + $0x60] sm:$0xff]  ;;  %v2544_v58 = vld [vmem:[#allocation10 + $0x68] sm:$0xff] }
  0x31   :  { %1824 = vmatmul.msk.f32.gmra.mxu2 %vm140_vm0, %v129_v26  ;;  %1828 = vmatmul.msk.f32.gmra.mxu3 %vm140_vm0, %v129_v26  ;;  %3436 = vst [vmem:[#allocation31_spill] sm:$0xff] %v2520_v50  ;;  %v2548_v59 = vld [vmem:[#allocation10 + $0x70] sm:$0xff]  ;;  %v2550_v60 = vld [vmem:[#allocation10 + $0x78] sm:$0xff]  ;;  %v2554_v61 = vld [vmem:[#allocation10 + $0x40] sm:$0xff] }
  0x32   :  { %512 = vmatpush.msra.mxu0 %v2450_v27  ;;  %532 = vmatpush.msra.mxu1 %v2452_v28  ;;  %3437 = vst [vmem:[#allocation32_spill] sm:$0xff] %v2522_v51  ;;  %v2556_v62 = vld [vmem:[#allocation10 + $0x48] sm:$0xff]  ;;  %v2560_v63 = vld [vmem:[#allocation10 + $0x50] sm:$0xff]  ;;  %v2562_v0 = vld [vmem:[#allocation10 + $0x58] sm:$0xff] }
  0x33   :  { %552 = vmatpush.msra.mxu2 %v2456_v29  ;;  %572 = vmatpush.msra.mxu3 %v2458_v30  ;;  %3438 = vst [vmem:[#allocation33_spill] sm:$0xff] %v2530_v53  ;;  %v287_v1 = vld [vmem:[#allocation5 + $0x28] sm:$0xff]  ;;  %v2570_v2 = vld [vmem:[#allocation10 + $0x20] sm:$0xff]  ;;  %v2576_v4 = vld [vmem:[#allocation10 + $0x30] sm:$0xff] }
  0x34   :  { %513 = vmatpush.msra.mxu0 %v2462_v31  ;;  %533 = vmatpush.msra.mxu1 %v2464_v32  ;;  %3439 = vst [vmem:[#allocation34_spill] sm:$0xff] %v2532_v54  ;;  %v2572_v3 = vld [vmem:[#allocation10 + $0x28] sm:$0xff]  ;;  %v2578_v13 = vld [vmem:[#allocation10 + $0x38] sm:$0xff]  ;;  %v2582_v26 = vld [vmem:[#allocation10] sm:$0xff] }
  0x35   :  { %553 = vmatpush.msra.mxu2 %v2468_v33  ;;  %573 = vmatpush.msra.mxu3 %v2470_v34  ;;  %3440 = vst [vmem:[#allocation35_spill] sm:$0xff] %v2536_v55 }
  0x36   :  { %514 = vmatpush.msra.mxu0 %v2474_v35  ;;  %534 = vmatpush.msra.mxu1 %v2476_v36  ;;  %3441 = vst [vmem:[#allocation36_spill] sm:$0xff] %v2538_v56 }
  0x37   :  { %554 = vmatpush.msra.mxu2 %v2480_v37  ;;  %574 = vmatpush.msra.mxu3 %v2482_v38  ;;  %3442 = vst [vmem:[#allocation37_spill] sm:$0xff] %v2542_v57 }
  0x38   :  { %1817 = vmatmul.msk.f32.gmra.mxu0 %vm140_vm0, %v130_v39  ;;  %1821 = vmatmul.msk.f32.gmra.mxu1 %vm140_vm0, %v130_v39  ;;  %3443 = vst [vmem:[#allocation38_spill] sm:$0xff] %v2544_v58 }
  0x39   :  { %1825 = vmatmul.msk.f32.gmra.mxu2 %vm140_vm0, %v130_v39  ;;  %1829 = vmatmul.msk.f32.gmra.mxu3 %vm140_vm0, %v130_v39  ;;  %3444 = vst [vmem:[#allocation39_spill] sm:$0xff] %v2548_v59  ;;  %v2584_v39 = vld [vmem:[#allocation10 + $0x8] sm:$0xff] }
  0x3a   :  { %515 = vmatpush.msra.mxu0 %v2490_v40  ;;  %535 = vmatpush.msra.mxu1 %v2492_v41  ;;  %3445 = vst [vmem:[#allocation40_spill] sm:$0xff] %v2550_v60 }
  0x3b   :  { %555 = vmatpush.msra.mxu2 %v2496_v42  ;;  %575 = vmatpush.msra.mxu3 %v2498_v43  ;;  %3446 = vst [vmem:[#allocation41_spill] sm:$0xff] %v2554_v61 }
  0x3c   :  { %516 = vmatpush.msra.mxu0 %v2502_v44  ;;  %536 = vmatpush.msra.mxu1 %v2504_v45  ;;  %3447 = vst [vmem:[#allocation42_spill] sm:$0xff] %v2556_v62 }
  0x3d   :  { %556 = vmatpush.msra.mxu2 %v2508_v46  ;;  %576 = vmatpush.msra.mxu3 %v2510_v47  ;;  %3448 = vst [vmem:[#allocation43_spill] sm:$0xff] %v2560_v63 }
  0x3e   :  { %517 = vmatpush.msra.mxu0 %v2514_v48  ;;  %537 = vmatpush.msra.mxu1 %v2516_v49  ;;  %3449 = vst [vmem:[#allocation44_spill] sm:$0xff] %v2562_v0 }
  0x3f   :  { %557 = vmatpush.msra.mxu2 %v2520_v50  ;;  %577 = vmatpush.msra.mxu3 %v2522_v51  ;;  %3450 = vst [vmem:[#allocation45_spill] sm:$0xff] %v2570_v2 }
  0x40   :  { %1830 = vmatmul.msk.f32.vlgmr.msrb.gmra.mxu0 %vm140_vm0, %v286_v52  ;;  %1834 = vmatmul.msk.f32.vlgmr.msrb.gmra.mxu1 %vm140_vm0, %v286_v52  ;;  %3451 = vst [vmem:[#allocation46_spill] sm:$0xff] %v2572_v3 }
  0x41   :  { %1838 = vmatmul.msk.f32.vlgmr.msrb.gmra.mxu2 %vm140_vm0, %v286_v52  ;;  %1842 = vmatmul.msk.f32.vlgmr.msrb.gmra.mxu3 %vm140_vm0, %v286_v52  ;;  %3452 = vst [vmem:[#allocation47_spill] sm:$0xff] %v2576_v4  ;;  %v2588_v52 = vld [vmem:[#allocation10 + $0x10] sm:$0xff] }
  0x42   :  { %518 = vmatpush.msra.mxu0 %v2530_v53  ;;  %538 = vmatpush.msra.mxu1 %v2532_v54  ;;  %3453 = vst [vmem:[#allocation48_spill] sm:$0xff] %v2578_v13 }
  0x43   :  { %558 = vmatpush.msra.mxu2 %v2536_v55  ;;  %578 = vmatpush.msra.mxu3 %v2538_v56  ;;  %3454 = vst [vmem:[#allocation49_spill] sm:$0xff] %v2582_v26 }
  0x44   :  { %519 = vmatpush.msra.mxu0 %v2542_v57  ;;  %539 = vmatpush.msra.mxu1 %v2544_v58  ;;  %3455 = vst [vmem:[#allocation50_spill] sm:$0xff] %v2584_v39 }
  0x45   :  { %559 = vmatpush.msra.mxu2 %v2548_v59  ;;  %579 = vmatpush.msra.mxu3 %v2550_v60  ;;  %3456 = vst [vmem:[#allocation51_spill] sm:$0xff] %v2588_v52 }
  0x46   :  { %520 = vmatpush.msra.mxu0 %v2554_v61  ;;  %540 = vmatpush.msra.mxu1 %v2556_v62 }
  0x47   :  { %560 = vmatpush.msra.mxu2 %v2560_v63  ;;  %580 = vmatpush.msra.mxu3 %v2562_v0  ;;  %v2590_v0 = vld [vmem:[#allocation10 + $0x18] sm:$0xff] }
  0x48   :  { %1831 = vmatmul.msk.f32.gmra.mxu0 %vm140_vm0, %v287_v1  ;;  %1835 = vmatmul.msk.f32.gmra.mxu1 %vm140_vm0, %v287_v1  ;;  %3457 = vst [vmem:[#allocation52_spill] sm:$0xff] %v2590_v0 }
  0x49   :  { %1839 = vmatmul.msk.f32.gmra.mxu2 %vm140_vm0, %v287_v1  ;;  %1843 = vmatmul.msk.f32.gmra.mxu3 %vm140_vm0, %v287_v1  ;;  %v288_v1 = vld [vmem:[#allocation5 + $0x30] sm:$0xff] }
  0x4a   :  { %521 = vmatpush.msra.mxu0 %v2570_v2  ;;  %541 = vmatpush.msra.mxu1 %v2572_v3 }
  0x4b   :  { %561 = vmatpush.msra.mxu2 %v2576_v4  ;;  %581 = vmatpush.msra.mxu3 %v2578_v13 }
  0x4c   :  { %522 = vmatpush.msra.mxu0 %v2582_v26  ;;  %542 = vmatpush.msra.mxu1 %v2584_v39 }
  0x4d   :  { %562 = vmatpush.msra.mxu2 %v2588_v52  ;;  %582 = vmatpush.msra.mxu3 %v2590_v0 }
  0x4e   :  { %662 = vmatpush.msrb.mxu0 %v2386_v5  ;;  %682 = vmatpush.msrb.mxu1 %v2388_v6 }
  0x4f   :  { %702 = vmatpush.msrb.mxu2 %v2390_v7  ;;  %722 = vmatpush.msrb.mxu3 %v2392_v8  ;;  %v289_v8 = vld [vmem:[#allocation5 + $0x38] sm:$0xff] }
  0x50   :  { %1832 = vmatmul.msk.f32.gmra.mxu0 %vm140_vm0, %v288_v1  ;;  %1836 = vmatmul.msk.f32.gmra.mxu1 %vm140_vm0, %v288_v1 }
  0x51   :  { %1840 = vmatmul.msk.f32.gmra.mxu2 %vm140_vm0, %v288_v1  ;;  %1844 = vmatmul.msk.f32.gmra.mxu3 %vm140_vm0, %v288_v1  ;;  %v118_v1 = vld [vmem:[#allocation13] sm:$0xff] }
  0x52   :  { %663 = vmatpush.msrb.mxu0 %v2394_v9  ;;  %683 = vmatpush.msrb.mxu1 %v2396_v10 }
  0x53   :  { %703 = vmatpush.msrb.mxu2 %v2400_v11  ;;  %723 = vmatpush.msrb.mxu3 %v2402_v12 }
  0x54   :  { %664 = vmatpush.msrb.mxu0 %v2410_v14  ;;  %684 = vmatpush.msrb.mxu1 %v2412_v15 }
  0x55   :  { %704 = vmatpush.msrb.mxu2 %v2416_v16  ;;  %724 = vmatpush.msrb.mxu3 %v2418_v17 }
  0x56   :  { %665 = vmatpush.msrb.mxu0 %v2422_v18  ;;  %685 = vmatpush.msrb.mxu1 %v2424_v19 }
  0x57   :  { %705 = vmatpush.msrb.mxu2 %v2428_v20  ;;  %725 = vmatpush.msrb.mxu3 %v2430_v21 }
  0x58   :  { %1833 = vmatmul.msk.f32.gmra.mxu0 %vm140_vm0, %v289_v8  ;;  %1837 = vmatmul.msk.f32.gmra.mxu1 %vm140_vm0, %v289_v8 }
  0x59   :  { %1841 = vmatmul.msk.f32.gmra.mxu2 %vm140_vm0, %v289_v8  ;;  %1845 = vmatmul.msk.f32.gmra.mxu3 %vm140_vm0, %v289_v8  ;;  %v3458_v8 = vld [vmem:[#allocation44_spill] sm:$0xff] }
  0x5a   :  { %666 = vmatpush.msrb.mxu0 %v2434_v22  ;;  %686 = vmatpush.msrb.mxu1 %v2436_v23 }
  0x5b   :  { %706 = vmatpush.msrb.mxu2 %v2440_v24  ;;  %726 = vmatpush.msrb.mxu3 %v2442_v25 }
  0x5c   :  { %667 = vmatpush.msrb.mxu0 %v2450_v27  ;;  %687 = vmatpush.msrb.mxu1 %v2452_v28 }
  0x5d   :  { %707 = vmatpush.msrb.mxu2 %v2456_v29  ;;  %727 = vmatpush.msrb.mxu3 %v2458_v30 }
  0x5e   :  { %668 = vmatpush.msrb.mxu0 %v2462_v31  ;;  %688 = vmatpush.msrb.mxu1 %v2464_v32 }
  0x5f   :  { %708 = vmatpush.msrb.mxu2 %v2468_v33  ;;  %728 = vmatpush.msrb.mxu3 %v2470_v34 }
  0x60   :  { %523 = vmatmul.f32.vlgmr.msra.gmra.mxu0 %v118_v1  ;;  %543 = vmatmul.f32.vlgmr.msra.gmra.mxu1 %v118_v1 }
  0x61   :  { %563 = vmatmul.f32.vlgmr.msra.gmra.mxu2 %v118_v1  ;;  %583 = vmatmul.f32.vlgmr.msra.gmra.mxu3 %v118_v1  ;;  %v3459_v1 = vld [vmem:[#allocation26_spill] sm:$0xff] }
  0x62   :  { %669 = vmatpush.msrb.mxu0 %v2474_v35  ;;  %689 = vmatpush.msrb.mxu1 %v2476_v36 }
  0x63   :  { %709 = vmatpush.msrb.mxu2 %v2480_v37  ;;  %729 = vmatpush.msrb.mxu3 %v2482_v38 }
  0x64   :  { %670 = vmatpush.msrb.mxu0 %v2490_v40  ;;  %690 = vmatpush.msrb.mxu1 %v2492_v41 }
  0x65   :  { %710 = vmatpush.msrb.mxu2 %v2496_v42  ;;  %730 = vmatpush.msrb.mxu3 %v2498_v43 }
  0x66   :  { %671 = vmatpush.msrb.mxu0 %v2502_v44  ;;  %691 = vmatpush.msrb.mxu1 %v2504_v45 }
  0x67   :  { %711 = vmatpush.msrb.mxu2 %v2508_v46  ;;  %731 = vmatpush.msrb.mxu3 %v2510_v47 }
  0x68   :  { %672 = vmatpush.msrb.mxu0 %v2514_v48  ;;  %692 = vmatpush.msrb.mxu1 %v2516_v49 }
  0x69   :  { %712 = vmatpush.msrb.mxu2 %v2520_v50  ;;  %732 = vmatpush.msrb.mxu3 %v2522_v51 }
  0x6a   :  { %673 = vmatpush.msrb.mxu0 %v2530_v53  ;;  %693 = vmatpush.msrb.mxu1 %v2532_v54 }
  0x6b   :  { %713 = vmatpush.msrb.mxu2 %v2536_v55  ;;  %733 = vmatpush.msrb.mxu3 %v2538_v56 }
  0x6c   :  { %674 = vmatpush.msrb.mxu0 %v2542_v57  ;;  %694 = vmatpush.msrb.mxu1 %v2544_v58 }
  0x6d   :  { %714 = vmatpush.msrb.mxu2 %v2548_v59  ;;  %734 = vmatpush.msrb.mxu3 %v2550_v60 }
  0x6e   :  { %675 = vmatpush.msrb.mxu0 %v2554_v61  ;;  %695 = vmatpush.msrb.mxu1 %v2556_v62 }
  0x6f   :  { %715 = vmatpush.msrb.mxu2 %v2560_v63  ;;  %735 = vmatpush.msrb.mxu3 %v3458_v8 }
  0x70   :  { %676 = vmatpush.msrb.mxu0 %v2570_v2  ;;  %696 = vmatpush.msrb.mxu1 %v2572_v3 }
  0x71   :  { %716 = vmatpush.msrb.mxu2 %v2576_v4  ;;  %736 = vmatpush.msrb.mxu3 %v2578_v13 }
  0x72   :  { %677 = vmatpush.msrb.mxu0 %v2582_v26  ;;  %697 = vmatpush.msrb.mxu1 %v2584_v39 }
  0x73   :  { %717 = vmatpush.msrb.mxu2 %v2588_v52  ;;  %737 = vmatpush.msrb.mxu3 %v2590_v0 }
  0x74   :  { %818 = vmatpush.msra.mxu0 %v2386_v5  ;;  %838 = vmatpush.msra.mxu1 %v2388_v6 }
  0x75   :  { %858 = vmatpush.msra.mxu2 %v2390_v7  ;;  %878 = vmatpush.msra.mxu3 %v3459_v1 }
  0x76   :  { %819 = vmatpush.msra.mxu0 %v2394_v9  ;;  %839 = vmatpush.msra.mxu1 %v2396_v10 }
  0x77   :  { %859 = vmatpush.msra.mxu2 %v2400_v11  ;;  %879 = vmatpush.msra.mxu3 %v2402_v12 }
  0x78   :  { %820 = vmatpush.msra.mxu0 %v2410_v14  ;;  %840 = vmatpush.msra.mxu1 %v2412_v15 }
  0x79   :  { %860 = vmatpush.msra.mxu2 %v2416_v16  ;;  %880 = vmatpush.msra.mxu3 %v2418_v17 }
  0x7a   :  { %821 = vmatpush.msra.mxu0 %v2422_v18  ;;  %841 = vmatpush.msra.mxu1 %v2424_v19 }
  0x7b   :  { %861 = vmatpush.msra.mxu2 %v2428_v20  ;;  %881 = vmatpush.msra.mxu3 %v2430_v21 }
  0x7c   :  { %822 = vmatpush.msra.mxu0 %v2434_v22  ;;  %842 = vmatpush.msra.mxu1 %v2436_v23 }
  0x7d   :  { %862 = vmatpush.msra.mxu2 %v2440_v24  ;;  %882 = vmatpush.msra.mxu3 %v2442_v25 }
  0x7e   :  { %823 = vmatpush.msra.mxu0 %v2450_v27  ;;  %843 = vmatpush.msra.mxu1 %v2452_v28 }
  0x7f   :  { %863 = vmatpush.msra.mxu2 %v2456_v29  ;;  %883 = vmatpush.msra.mxu3 %v2458_v30 }
  0x80   :  { %824 = vmatpush.msra.mxu0 %v2462_v31  ;;  %844 = vmatpush.msra.mxu1 %v2464_v32 }
  0x81   :  { %864 = vmatpush.msra.mxu2 %v2468_v33  ;;  %884 = vmatpush.msra.mxu3 %v2470_v34 }
  0x82   :  { %825 = vmatpush.msra.mxu0 %v2474_v35  ;;  %845 = vmatpush.msra.mxu1 %v2476_v36 }
  0x83   :  { %865 = vmatpush.msra.mxu2 %v2480_v37  ;;  %885 = vmatpush.msra.mxu3 %v2482_v38 }
  0x84   :  { %826 = vmatpush.msra.mxu0 %v2490_v40  ;;  %846 = vmatpush.msra.mxu1 %v2492_v41 }
  0x85   :  { %866 = vmatpush.msra.mxu2 %v2496_v42  ;;  %886 = vmatpush.msra.mxu3 %v2498_v43 }
  0x86   :  { %827 = vmatpush.msra.mxu0 %v2502_v44  ;;  %847 = vmatpush.msra.mxu1 %v2504_v45 }
  0x87   :  { %867 = vmatpush.msra.mxu2 %v2508_v46  ;;  %887 = vmatpush.msra.mxu3 %v2510_v47 }
  0x88   :  { %828 = vmatpush.msra.mxu0 %v2514_v48  ;;  %848 = vmatpush.msra.mxu1 %v2516_v49 }
  0x89   :  { %868 = vmatpush.msra.mxu2 %v2520_v50  ;;  %888 = vmatpush.msra.mxu3 %v2522_v51 }
  0x8a   :  { %829 = vmatpush.msra.mxu0 %v2530_v53  ;;  %849 = vmatpush.msra.mxu1 %v2532_v54 }
  0x8b   :  { %869 = vmatpush.msra.mxu2 %v2536_v55  ;;  %889 = vmatpush.msra.mxu3 %v2538_v56 }
  0x8c   :  { %830 = vmatpush.msra.mxu0 %v2542_v57  ;;  %850 = vmatpush.msra.mxu1 %v2544_v58 }
  0x8d   :  { %870 = vmatpush.msra.mxu2 %v2548_v59  ;;  %890 = vmatpush.msra.mxu3 %v2550_v60 }
  0x8e   :  { %831 = vmatpush.msra.mxu0 %v2554_v61  ;;  %851 = vmatpush.msra.mxu1 %v2556_v62  ;;  %v122_v61 = vld [vmem:[#allocation11] sm:$0xf] }
  0x8f   :  { %871 = vmatpush.msra.mxu2 %v2560_v63  ;;  %891 = vmatpush.msra.mxu3 %v3458_v8  ;;  %v132_v8 = vperm.slane %v122_v61, 0  ;;  %v133_v60 = vperm.slane %v122_v61, 1 }
  0x90   :  { %832 = vmatpush.msra.mxu0 %v2570_v2  ;;  %852 = vmatpush.msra.mxu1 %v2572_v3 }
  0x91   :  { %872 = vmatpush.msra.mxu2 %v2576_v4  ;;  %892 = vmatpush.msra.mxu3 %v2578_v13 }
  0x92   :  { %833 = vmatpush.msra.mxu0 %v2582_v26  ;;  %853 = vmatpush.msra.mxu1 %v2584_v39  ;;  %v2742_v39 = vperm.slane %v122_v61, 2 }
  0x93   :  { %873 = vmatpush.msra.mxu2 %v2588_v52  ;;  %893 = vmatpush.msra.mxu3 %v2590_v0  ;;  %v2744_v52 = vperm.slane %v122_v61, 3 }
  0x9d   :  { %v170_v62 = vpop.f32.mrf.mxu0  ;;  %v199_v63 = vpop.f32.mrf.mxu1 }
  0xa4   :  { %v2734_v2 = vpop.f32.mrf.mxu2  ;;  %v2736_v3 = vpop.f32.mrf.mxu3 }
  0xa5   :  { %v173_v4 = vpop.f32.mrf.mxu0  ;;  %v202_v59 = vpop.f32.mrf.mxu1 }
  0xa6   :  { %v2738_v13 = vadd.f32 %v173_v4, %v132_v8  ;;  %v2740_v26 = vadd.f32 %v202_v59, %v133_v60 }
  0xa8   :  { %3460 = vst [vmem:[#allocation26_spill] sm:$0xff] %v2738_v13 }
  0xa9   :  { %3461 = vst [vmem:[#allocation53_spill] sm:$0xff] %v2740_v26 }
  0xac   :  { %v231_v0 = vpop.f32.mrf.mxu2  ;;  %v260_v58 = vpop.f32.mrf.mxu3 }
  0xad   :  { %v2747_v57 = vadd.f32 %v231_v0, %v2742_v39  ;;  %v2750_v56 = vadd.f32 %v260_v58, %v2744_v52  ;;  %v176_v55 = vpop.f32.mrf.mxu0  ;;  %v205_v54 = vpop.f32.mrf.mxu1 }
  0xae   :  { %v2752_v53 = vadd.f32 %v176_v55, %v132_v8  ;;  %v2754_v4 = vadd.f32 %v205_v54, %v133_v60 }
  0xaf   :  { %3462 = vst [vmem:[#allocation54_spill] sm:$0xff] %v2747_v57 }
  0xb0   :  { %3463 = vst [vmem:[#allocation55_spill] sm:$0xff] %v2750_v56 }
  0xb1   :  { %3464 = vst [vmem:[#allocation56_spill] sm:$0xff] %v2752_v53 }
  0xb2   :  { %3465 = vst [vmem:[#allocation57_spill] sm:$0xff] %v2754_v4 }
  0xb4   :  { %v234_v59 = vpop.f32.mrf.mxu2  ;;  %v263_v26 = vpop.f32.mrf.mxu3 }
  0xb5   :  { %v2757_v13 = vadd.f32 %v234_v59, %v2742_v39  ;;  %v2760_v61 = vadd.f32 %v263_v26, %v2744_v52  ;;  %v179_v51 = vpop.f32.mrf.mxu0  ;;  %v208_v0 = vpop.f32.mrf.mxu1 }
  0xb6   :  { %v2762_v57 = vadd.f32 %v179_v51, %v132_v8  ;;  %v2764_v58 = vadd.f32 %v208_v0, %v133_v60 }
  0xb7   :  { %3466 = vst [vmem:[#allocation58_spill] sm:$0xff] %v2757_v13 }
  0xb8   :  { %3467 = vst [vmem:[#allocation59_spill] sm:$0xff] %v2760_v61 }
  0xb9   :  { %3468 = vst [vmem:[#allocation60_spill] sm:$0xff] %v2762_v57 }
  0xba   :  { %3469 = vst [vmem:[#allocation61_spill] sm:$0xff] %v2764_v58 }
  0xbc   :  { %v237_v56 = vpop.f32.mrf.mxu2  ;;  %v266_v50 = vpop.f32.mrf.mxu3 }
  0xbd   :  { %v2767_v55 = vadd.f32 %v237_v56, %v2742_v39  ;;  %v2770_v54 = vadd.f32 %v266_v50, %v2744_v52  ;;  %v319_v4 = vpop.f32.mrf.mxu0  ;;  %v348_v59 = vpop.f32.mrf.mxu1 }
  0xbe   :  { %v2772_v13 = vadd.f32 %v319_v4, %v132_v8  ;;  %v2774_v26 = vadd.f32 %v348_v59, %v133_v60 }
  0xbf   :  { %3470 = vst [vmem:[#allocation62_spill] sm:$0xff] %v2767_v55 }
  0xc0   :  { %3471 = vst [vmem:[#allocation63_spill] sm:$0xff] %v2770_v54 }
  0xc1   :  { %3472 = vst [vmem:[#allocation64_spill] sm:$0xff] %v2772_v13 }
  0xc2   :  { %3473 = vst [vmem:[#allocation65_spill] sm:$0xff] %v2774_v26 }
  0xc4   :  { %v377_v61 = vpop.f32.mrf.mxu2  ;;  %v406_v53 = vpop.f32.mrf.mxu3 }
  0xc5   :  { %v2777_v51 = vadd.f32 %v377_v61, %v2742_v39  ;;  %v2780_v0 = vadd.f32 %v406_v53, %v2744_v52  ;;  %v322_v58 = vpop.f32.mrf.mxu0  ;;  %v351_v56 = vpop.f32.mrf.mxu1 }
  0xc6   :  { %v2782_v55 = vadd.f32 %v322_v58, %v132_v8  ;;  %v2784_v50 = vadd.f32 %v351_v56, %v133_v60 }
  0xc7   :  { %3474 = vst [vmem:[#allocation66_spill] sm:$0xff] %v2777_v51 }
  0xc8   :  { %3475 = vst [vmem:[#allocation67_spill] sm:$0xff] %v2780_v0 }
  0xc9   :  { %3476 = vst [vmem:[#allocation68_spill] sm:$0xff] %v2782_v55  ;;  %v200_v55 = vadd.f32 %v199_v63, %v133_v60 }
  0xca   :  { %3477 = vst [vmem:[#allocation69_spill] sm:$0xff] %v2784_v50 }
  0xcc   :  { %v380_v54 = vpop.f32.mrf.mxu2  ;;  %v409_v57 = vpop.f32.mrf.mxu3 }
  0xcd   :  { %v2787_v4 = vadd.f32 %v380_v54, %v2742_v39  ;;  %v2790_v59 = vadd.f32 %v409_v57, %v2744_v52  ;;  %v325_v26 = vpop.f32.mrf.mxu0  ;;  %v354_v61 = vpop.f32.mrf.mxu1 }
  0xce   :  { %v2792_v51 = vadd.f32 %v325_v26, %v132_v8  ;;  %v2794_v53 = vadd.f32 %v354_v61, %v133_v60 }
  0xcf   :  { %3478 = vst [vmem:[#allocation70_spill] sm:$0xff] %v2787_v4 }
  0xd0   :  { %3479 = vst [vmem:[#allocation71_spill] sm:$0xff] %v2790_v59  ;;  %v171_v59 = vadd.f32 %v170_v62, %v132_v8 }
  0xd1   :  { %3480 = vst [vmem:[#allocation72_spill] sm:$0xff] %v2792_v51 }
  0xd2   :  { %3481 = vst [vmem:[#allocation73_spill] sm:$0xff] %v2794_v53 }
  0xd4   :  { %v383_v0 = vpop.f32.mrf.mxu2  ;;  %v412_v13 = vpop.f32.mrf.mxu3 }
  0xd5   :  { %v2797_v58 = vadd.f32 %v383_v0, %v2742_v39  ;;  %v2800_v56 = vadd.f32 %v412_v13, %v2744_v52  ;;  %v328_v50 = vpop.f32.mrf.mxu0  ;;  %v357_v54 = vpop.f32.mrf.mxu1 }
  0xd6   :  { %v2802_v4 = vadd.f32 %v328_v50, %v132_v8  ;;  %v2804_v57 = vadd.f32 %v357_v54, %v133_v60  ;;  %v229_v50 = vadd.f32 %v2734_v2, %v2742_v39 }
  0xd7   :  { %3482 = vst [vmem:[#allocation74_spill] sm:$0xff] %v2797_v58 }
  0xd8   :  { %3483 = vst [vmem:[#allocation75_spill] sm:$0xff] %v2800_v56 }
  0xd9   :  { %3484 = vst [vmem:[#allocation76_spill] sm:$0xff] %v2802_v4 }
  0xda   :  { %3485 = vst [vmem:[#allocation77_spill] sm:$0xff] %v2804_v57 }
  0xdc   :  { %v386_v26 = vpop.f32.mrf.mxu2  ;;  %v415_v51 = vpop.f32.mrf.mxu3 }
  0xdd   :  { %v2807_v61 = vadd.f32 %v386_v26, %v2742_v39  ;;  %v2810_v53 = vadd.f32 %v415_v51, %v2744_v52  ;;  %v524_v0 = vpop.f32.mrf.mxu0  ;;  %v544_v58 = vpop.f32.mrf.mxu1 }
  0xde   :  { %v587_v13 = vadd.f32 %v524_v0, %v171_v59  ;;  %v588_v56 = vadd.f32 %v544_v58, %v200_v55  ;;  %v258_v55 = vadd.f32 %v2736_v3, %v2744_v52 }
  0xdf   :  { %3486 = vst [vmem:[#allocation78_spill] sm:$0xff] %v2807_v61 }
  0xe0   :  { %3487 = vst [vmem:[#allocation79_spill] sm:$0xff] %v2810_v53  ;;  %v1846_v49 = vmul.f32 -1.442695, %v587_v13  ;;  %v1847_v48 = vmul.f32 -1.442695, %v588_v56 }
  0xe2   :  { %1883 = vpow2.f32 %v1846_v49 }
  0xe3   :  { %1885 = vpow2.f32 %v1847_v48 }
  0xe4   :  { %v564_v60 = vpop.f32.mrf.mxu2  ;;  %v584_v53 = vpop.f32.mrf.mxu3 }
  0xe5   :  { %v589_v62 = vadd.f32 %v564_v60, %v229_v50  ;;  %v590_v56 = vadd.f32 %v584_v53, %v258_v55 }
  0xe7   :  { %v1848_v63 = vmul.f32 -1.442695, %v589_v62 }
  0xe8   :  { %v1884_v8 = vpop.eup %1883 }
  0xe9   :  { %v1886_v54 = vpop.eup %1885  ;;  %v600_v26 = vadd.f32 1.0, %v1884_v8  ;;  %1887 = vpow2.f32 %v1848_v63 }
  0xea   :  { %v601_v51 = vadd.f32 1.0, %v1886_v54 }
  0xeb   :  { %1889 = vrcp.f32 %v600_v26  ;;  %v614_v50 = vand.u32 2147483648, %v600_v26  ;;  %v612_v63 = vand.u32 2147483647, %v600_v26  ;;  %vm608_vm3 = vweird.f32 %v600_v26 }
  0xec   :  { %1891 = vrcp.f32 %v601_v51  ;;  %v629_v60 = vand.u32 2147483648, %v601_v51  ;;  %v627_v54 = vand.u32 2147483647, %v601_v51  ;;  %vm623_vm4 = vweird.f32 %v601_v51 }
  0xed   :  { %v615_v53 = vor.u32 1.1754944e-38, %v614_v50  ;;  %vm613_vm7 = vcmp.eq.f32.partialorder %v612_v63, 8.507059e+37 }
  0xee   :  { %v630_v55 = vor.u32 1.1754944e-38, %v629_v60  ;;  %vm628_vm8 = vcmp.eq.f32.partialorder %v627_v54, 8.507059e+37 }
  0xef   :  { %v1888_v59 = vpop.eup %1887 }
  0xf0   :  { %v602_v49 = vadd.f32 1.0, %v1888_v59 }
  0xf1   :  { %v1890_v58 = vpop.eup %1889 }
  0xf2   :  { %v1892_v2 = vpop.eup %1891  ;;  %v604_v48 = vmul.f32 %v1890_v58, %v600_v26  ;;  %1893 = vrcp.f32 %v602_v49  ;;  %vm609_vm1 = vweird.f32 %v1890_v58  ;;  %v644_v50 = vand.u32 2147483648, %v602_v49 }
  0xf3   :  { %v619_v39 = vmul.f32 %v1892_v2, %v601_v51  ;;  %1895 = vtanh.f32 %v590_v56  ;;  %vm624_vm2 = vweird.f32 %v1892_v2  ;;  %vm610_vm5 = vmor %vm608_vm3, %vm609_vm1  ;;  %vm638_vm10 = vweird.f32 %v602_v49 }
  0xf4   :  { %v605_v0 = vsub.f32 1.0, %v604_v48  ;;  %vm625_vm6 = vmor %vm623_vm4, %vm624_vm2  ;;  %v120_v48 = vld [vmem:[#allocation14] sm:$0xff]  ;;  %v642_v60 = vand.u32 2147483647, %v602_v49  ;;  %v645_v63 = vor.u32 1.1754944e-38, %v644_v50 }
  0xf5   :  { %v620_v13 = vsub.f32 1.0, %v619_v39 }
  0xf6   :  { %v606_v62 = vmul.f32 %v1890_v58, %v605_v0  ;;  %vm643_vm12 = vcmp.eq.f32.partialorder %v642_v60, 8.507059e+37 }
  0xf7   :  { %v621_v8 = vmul.f32 %v1892_v2, %v620_v13 }
  0xf8   :  { %v1894_v61 = vpop.eup %1893  ;;  %v607_v3 = vadd.f32 %v1890_v58, %v606_v62 }
  0xf9   :  { %v634_v52 = vmul.f32 %v1894_v61, %v602_v49  ;;  %v622_v59 = vadd.f32 %v1892_v2, %v621_v8  ;;  %v1896_v56 = vpop.eup %1895  ;;  %vm639_vm9 = vweird.f32 %v1894_v61 }
  0xfa   :  { %v611_v39 = vsel %vm610_vm5, %v1890_v58, %v607_v3  ;;  %vm640_vm11 = vmor %vm638_vm10, %vm639_vm9 }
  0xfb   :  { %v635_v0 = vsub.f32 1.0, %v634_v52  ;;  %v616_v57 = vsel %vm613_vm7, %v615_v53, %v611_v39  ;;  %v626_v4 = vsel %vm625_vm6, %v1892_v2, %v622_v59  ;;  %v3517_v53 = vld [vmem:[#allocation55_spill] sm:$0xff] }
  0xfc   :  { %v631_v13 = vsel %vm628_vm8, %v630_v55, %v626_v4  ;;  %v650_v47 = vmul.f32 %v1896_v56, %v616_v57 }
  0xfd   :  { %v636_v46 = vmul.f32 %v1894_v61, %v635_v0  ;;  %v649_v62 = vmul.f32 %v631_v13, %v120_v48 }
  0xff   :  { %v2816_v26 = vadd.f32 %v650_v47, %v649_v62  ;;  %v637_v51 = vadd.f32 %v1894_v61, %v636_v46 }
 0x101   :  { %1897 = vtanh.f32 %v2816_v26  ;;  %v641_v58 = vsel %vm640_vm11, %v1894_v61, %v637_v51 }
 0x102   :  { %v646_v2 = vsel %vm643_vm12, %v645_v63, %v641_v58 }
 0x107   :  { %v1898_v8 = vpop.eup %1897 }
 0x108   :  { %v653_v54 = vmul.f32 %v1898_v8, %v646_v2 }
 0x10a   :  { %654 = vst [vmem:[#allocation16] sm:$0xff] %v653_v54  ;;  %678 = vmatmul.f32.vlgmr.msrb.gmra.mxu0 %v653_v54  ;;  %698 = vmatmul.f32.vlgmr.msrb.gmra.mxu1 %v653_v54 }
 0x10b   :  { %718 = vmatmul.f32.vlgmr.msrb.gmra.mxu2 %v653_v54  ;;  %738 = vmatmul.f32.vlgmr.msrb.gmra.mxu3 %v653_v54 }
 0x10c   :  { %974 = vmatpush.msrb.mxu0 %v2386_v5  ;;  %994 = vmatpush.msrb.mxu1 %v2388_v6  ;;  %v3488_v5 = vld [vmem:[#allocation27_spill] sm:$0xff]  ;;  %v3489_v6 = vld [vmem:[#allocation28_spill] sm:$0xff] }
 0x10d   :  { %1014 = vmatpush.msrb.mxu2 %v2390_v7  ;;  %1034 = vmatpush.msrb.mxu3 %v3459_v1  ;;  %v3490_v7 = vld [vmem:[#allocation29_spill] sm:$0xff] }
 0x10e   :  { %975 = vmatpush.msrb.mxu0 %v2394_v9  ;;  %995 = vmatpush.msrb.mxu1 %v2396_v10  ;;  %v3491_v9 = vld [vmem:[#allocation30_spill] sm:$0xff]  ;;  %v3492_v10 = vld [vmem:[#allocation31_spill] sm:$0xff] }
 0x10f   :  { %1015 = vmatpush.msrb.mxu2 %v2400_v11  ;;  %1035 = vmatpush.msrb.mxu3 %v2402_v12  ;;  %v3493_v11 = vld [vmem:[#allocation32_spill] sm:$0xff]  ;;  %v3494_v12 = vld [vmem:[#allocation33_spill] sm:$0xff] }
 0x110   :  { %976 = vmatpush.msrb.mxu0 %v2410_v14  ;;  %996 = vmatpush.msrb.mxu1 %v2412_v15  ;;  %v3495_v14 = vld [vmem:[#allocation34_spill] sm:$0xff]  ;;  %v3496_v15 = vld [vmem:[#allocation35_spill] sm:$0xff] }
 0x111   :  { %1016 = vmatpush.msrb.mxu2 %v2416_v16  ;;  %1036 = vmatpush.msrb.mxu3 %v2418_v17  ;;  %v3497_v16 = vld [vmem:[#allocation36_spill] sm:$0xff]  ;;  %v3498_v17 = vld [vmem:[#allocation37_spill] sm:$0xff] }
 0x112   :  { %977 = vmatpush.msrb.mxu0 %v2422_v18  ;;  %997 = vmatpush.msrb.mxu1 %v2424_v19  ;;  %v3499_v18 = vld [vmem:[#allocation38_spill] sm:$0xff]  ;;  %v3500_v19 = vld [vmem:[#allocation39_spill] sm:$0xff] }
 0x113   :  { %1017 = vmatpush.msrb.mxu2 %v2428_v20  ;;  %1037 = vmatpush.msrb.mxu3 %v2430_v21  ;;  %v3501_v20 = vld [vmem:[#allocation40_spill] sm:$0xff]  ;;  %v3502_v21 = vld [vmem:[#allocation41_spill] sm:$0xff] }
 0x114   :  { %978 = vmatpush.msrb.mxu0 %v2434_v22  ;;  %998 = vmatpush.msrb.mxu1 %v2436_v23  ;;  %v3503_v22 = vld [vmem:[#allocation42_spill] sm:$0xff]  ;;  %v3504_v23 = vld [vmem:[#allocation43_spill] sm:$0xff] }
 0x115   :  { %1018 = vmatpush.msrb.mxu2 %v2440_v24  ;;  %1038 = vmatpush.msrb.mxu3 %v2442_v25  ;;  %v3505_v24 = vld [vmem:[#allocation44_spill] sm:$0xff]  ;;  %v3506_v25 = vld [vmem:[#allocation45_spill] sm:$0xff] }
 0x116   :  { %979 = vmatpush.msrb.mxu0 %v2450_v27  ;;  %999 = vmatpush.msrb.mxu1 %v2452_v28  ;;  %v3507_v27 = vld [vmem:[#allocation46_spill] sm:$0xff]  ;;  %v3508_v28 = vld [vmem:[#allocation47_spill] sm:$0xff] }
 0x117   :  { %1019 = vmatpush.msrb.mxu2 %v2456_v29  ;;  %1039 = vmatpush.msrb.mxu3 %v2458_v30  ;;  %v3509_v29 = vld [vmem:[#allocation48_spill] sm:$0xff]  ;;  %v3510_v30 = vld [vmem:[#allocation49_spill] sm:$0xff] }
 0x118   :  { %980 = vmatpush.msrb.mxu0 %v2462_v31  ;;  %1000 = vmatpush.msrb.mxu1 %v2464_v32  ;;  %v3511_v31 = vld [vmem:[#allocation50_spill] sm:$0xff]  ;;  %v3512_v32 = vld [vmem:[#allocation51_spill] sm:$0xff] }
 0x119   :  { %1020 = vmatpush.msrb.mxu2 %v2468_v33  ;;  %1040 = vmatpush.msrb.mxu3 %v2470_v34  ;;  %v3513_v33 = vld [vmem:[#allocation52_spill] sm:$0xff] }
 0x11a   :  { %981 = vmatpush.msrb.mxu0 %v2474_v35  ;;  %1001 = vmatpush.msrb.mxu1 %v2476_v36  ;;  %v3514_v36 = vld [vmem:[#allocation26_spill] sm:$0xff] }
 0x11b   :  { %1021 = vmatpush.msrb.mxu2 %v2480_v37  ;;  %1041 = vmatpush.msrb.mxu3 %v2482_v38  ;;  %v3515_v38 = vld [vmem:[#allocation53_spill] sm:$0xff] }
 0x11c   :  { %982 = vmatpush.msrb.mxu0 %v2490_v40  ;;  %1002 = vmatpush.msrb.mxu1 %v2492_v41 }
 0x11d   :  { %1022 = vmatpush.msrb.mxu2 %v2496_v42  ;;  %1042 = vmatpush.msrb.mxu3 %v2498_v43 }
 0x11e   :  { %983 = vmatpush.msrb.mxu0 %v2502_v44  ;;  %1003 = vmatpush.msrb.mxu1 %v2504_v45  ;;  %v3516_v44 = vld [vmem:[#allocation54_spill] sm:$0xff] }
 0x11f   :  { %1023 = vmatpush.msrb.mxu2 %v3488_v5  ;;  %1043 = vmatpush.msrb.mxu3 %v3489_v6 }
 0x120   :  { %984 = vmatpush.msrb.mxu0 %v3490_v7  ;;  %1004 = vmatpush.msrb.mxu1 %v3491_v9 }
 0x121   :  { %1024 = vmatpush.msrb.mxu2 %v3492_v10  ;;  %1044 = vmatpush.msrb.mxu3 %v3493_v11 }
 0x122   :  { %985 = vmatpush.msrb.mxu0 %v3494_v12  ;;  %1005 = vmatpush.msrb.mxu1 %v3495_v14 }
 0x123   :  { %1025 = vmatpush.msrb.mxu2 %v3496_v15  ;;  %1045 = vmatpush.msrb.mxu3 %v3497_v16 }
 0x124   :  { %986 = vmatpush.msrb.mxu0 %v3498_v17  ;;  %1006 = vmatpush.msrb.mxu1 %v3499_v18 }
 0x125   :  { %1026 = vmatpush.msrb.mxu2 %v3500_v19  ;;  %1046 = vmatpush.msrb.mxu3 %v3501_v20 }
 0x126   :  { %987 = vmatpush.msrb.mxu0 %v3502_v21  ;;  %1007 = vmatpush.msrb.mxu1 %v3503_v22 }
 0x127   :  { %1027 = vmatpush.msrb.mxu2 %v3504_v23  ;;  %1047 = vmatpush.msrb.mxu3 %v3505_v24 }
 0x128   :  { %988 = vmatpush.msrb.mxu0 %v3506_v25  ;;  %1008 = vmatpush.msrb.mxu1 %v3507_v27 }
 0x129   :  { %1028 = vmatpush.msrb.mxu2 %v3508_v28  ;;  %1048 = vmatpush.msrb.mxu3 %v3509_v29 }
 0x12a   :  { %989 = vmatpush.msrb.mxu0 %v3510_v30  ;;  %1009 = vmatpush.msrb.mxu1 %v3511_v31 }
 0x12b   :  { %1029 = vmatpush.msrb.mxu2 %v3512_v32  ;;  %1049 = vmatpush.msrb.mxu3 %v3513_v33 }
 0x187   :  { %v679_v34 = vpop.f32.mrf.mxu0  ;;  %v699_v35 = vpop.f32.mrf.mxu1 }
 0x188   :  { %v742_v37 = vadd.f32 %v679_v34, %v3514_v36  ;;  %v743_v40 = vadd.f32 %v699_v35, %v3515_v38  ;;  %v2894_v36 = vld [vmem:[#allocation10 + $0x1e8] sm:$0xff]  ;;  %v2900_v38 = vld [vmem:[#allocation10 + $0x1f8] sm:$0xff] }
 0x18a   :  { %v1849_v41 = vmul.f32 -1.442695, %v742_v37  ;;  %v1850_v42 = vmul.f32 -1.442695, %v743_v40  ;;  %v2897_v37 = vld [vmem:[#allocation10 + $0x1f0] sm:$0xff]  ;;  %v2903_v40 = vld [vmem:[#allocation10 + $0x1c0] sm:$0xff] }
 0x18c   :  { %1899 = vpow2.f32 %v1849_v41  ;;  %v2906_v41 = vld [vmem:[#allocation10 + $0x1c8] sm:$0xff] }
 0x18d   :  { %1901 = vpow2.f32 %v1850_v42  ;;  %v2909_v42 = vld [vmem:[#allocation10 + $0x1d0] sm:$0xff] }
 0x18e   :  { %v719_v43 = vpop.f32.mrf.mxu2  ;;  %v739_v61 = vpop.f32.mrf.mxu3 }
 0x18f   :  { %v744_v45 = vadd.f32 %v719_v43, %v3516_v44  ;;  %v745_v59 = vadd.f32 %v739_v61, %v3517_v53  ;;  %v2912_v43 = vld [vmem:[#allocation10 + $0x1d8] sm:$0xff]  ;;  %v2915_v44 = vld [vmem:[#allocation10 + $0x1a0] sm:$0xff] }
 0x190   :  { %v2936_v61 = vld [vmem:[#allocation10 + $0x198] sm:$0xff] }
 0x191   :  { %v1851_v46 = vmul.f32 -1.442695, %v744_v45  ;;  %v2918_v45 = vld [vmem:[#allocation10 + $0x1a8] sm:$0xff]  ;;  %v2948_v53 = vld [vmem:[#allocation10 + $0x178] sm:$0xff] }
 0x192   :  { %v1900_v47 = vpop.eup %1899 }
 0x193   :  { %v1902_v1 = vpop.eup %1901  ;;  %v755_v4 = vadd.f32 1.0, %v1900_v47  ;;  %1903 = vpow2.f32 %v1851_v46  ;;  %v2921_v46 = vld [vmem:[#allocation10 + $0x1b0] sm:$0xff]  ;;  %v2924_v47 = vld [vmem:[#allocation10 + $0x1b8] sm:$0xff] }
 0x194   :  { %v756_v57 = vadd.f32 1.0, %v1902_v1  ;;  %v2927_v1 = vld [vmem:[#allocation10 + $0x180] sm:$0xff] }
 0x195   :  { %1905 = vrcp.f32 %v755_v4  ;;  %v769_v13 = vand.u32 2147483648, %v755_v4  ;;  %v767_v50 = vand.u32 2147483647, %v755_v4  ;;  %vm763_vm15 = vweird.f32 %v755_v4 }
 0x196   :  { %1907 = vrcp.f32 %v756_v57  ;;  %v784_v62 = vand.u32 2147483648, %v756_v57  ;;  %v782_v58 = vand.u32 2147483647, %v756_v57  ;;  %vm778_vm0 = vweird.f32 %v756_v57 }
 0x197   :  { %v770_v54 = vor.u32 1.1754944e-38, %v769_v13  ;;  %vm768_vm3 = vcmp.eq.f32.partialorder %v767_v50, 8.507059e+37  ;;  %v2969_v13 = vld [vmem:[#allocation10 + $0x130] sm:$0xff]  ;;  %v2978_v50 = vld [vmem:[#allocation10 + $0x108] sm:$0xff] }
 0x198   :  { %v785_v6 = vor.u32 1.1754944e-38, %v784_v62  ;;  %vm783_vm4 = vcmp.eq.f32.partialorder %v782_v58, 8.507059e+37  ;;  %v2972_v62 = vld [vmem:[#allocation10 + $0x138] sm:$0xff] }
 0x199   :  { %v1904_v49 = vpop.eup %1903  ;;  %v2984_v58 = vld [vmem:[#allocation10 + $0x118] sm:$0xff] }
 0x19a   :  { %v757_v3 = vadd.f32 1.0, %v1904_v49  ;;  %v2939_v49 = vld [vmem:[#allocation10 + $0x160] sm:$0xff] }
 0x19b   :  { %v1906_v52 = vpop.eup %1905 }
 0x19c   :  { %v1908_v55 = vpop.eup %1907  ;;  %v759_v48 = vmul.f32 %v1906_v52, %v755_v4  ;;  %1909 = vrcp.f32 %v757_v3  ;;  %vm764_vm13 = vweird.f32 %v1906_v52  ;;  %v799_v20 = vand.u32 2147483648, %v757_v3  ;;  %v2930_v4 = vld [vmem:[#allocation10 + $0x188] sm:$0xff] }
 0x19d   :  { %v774_v39 = vmul.f32 %v1908_v55, %v756_v57  ;;  %1911 = vtanh.f32 %v745_v59  ;;  %vm779_vm14 = vweird.f32 %v1908_v55  ;;  %vm765_vm1 = vmor %vm763_vm15, %vm764_vm13  ;;  %vm793_vm6 = vweird.f32 %v757_v3  ;;  %v2933_v57 = vld [vmem:[#allocation10 + $0x190] sm:$0xff]  ;;  %v2951_v59 = vld [vmem:[#allocation10 + $0x140] sm:$0xff] }
 0x19e   :  { %v760_v56 = vsub.f32 1.0, %v759_v48  ;;  %vm780_vm2 = vmor %vm778_vm0, %vm779_vm14  ;;  %v797_v21 = vand.u32 2147483647, %v757_v3  ;;  %v800_v23 = vor.u32 1.1754944e-38, %v799_v20  ;;  %v2957_v48 = vld [vmem:[#allocation10 + $0x150] sm:$0xff]  ;;  %v3035_v20 = vld [vmem:[#allocation10 + $0x60] sm:$0xff] }
 0x19f   :  { %v775_v0 = vsub.f32 1.0, %v774_v39  ;;  %v2960_v39 = vld [vmem:[#allocation10 + $0x158] sm:$0xff]  ;;  %3528 = vst [vmem:[#allocation37_spill] sm:$0xff] %v3035_v20 }
 0x1a0   :  { %v761_v51 = vmul.f32 %v1906_v52, %v760_v56  ;;  %vm798_vm8 = vcmp.eq.f32.partialorder %v797_v21, 8.507059e+37  ;;  %v2963_v56 = vld [vmem:[#allocation10 + $0x120] sm:$0xff]  ;;  %v3038_v21 = vld [vmem:[#allocation10 + $0x68] sm:$0xff] }
 0x1a1   :  { %v776_v60 = vmul.f32 %v1908_v55, %v775_v0  ;;  %v2966_v0 = vld [vmem:[#allocation10 + $0x128] sm:$0xff]  ;;  %3529 = vst [vmem:[#allocation38_spill] sm:$0xff] %v3038_v21 }
 0x1a2   :  { %v1910_v63 = vpop.eup %1909  ;;  %v762_v8 = vadd.f32 %v1906_v52, %v761_v51  ;;  %v2975_v51 = vld [vmem:[#allocation10 + $0x100] sm:$0xff] }
 0x1a3   :  { %v789_v2 = vmul.f32 %v1910_v63, %v757_v3  ;;  %v777_v5 = vadd.f32 %v1908_v55, %v776_v60  ;;  %v1912_v9 = vpop.eup %1911  ;;  %vm794_vm5 = vweird.f32 %v1910_v63  ;;  %v2942_v3 = vld [vmem:[#allocation10 + $0x168] sm:$0xff]  ;;  %v2981_v60 = vld [vmem:[#allocation10 + $0x110] sm:$0xff] }
 0x1a4   :  { %v766_v7 = vsel %vm765_vm1, %v1906_v52, %v762_v8  ;;  %vm795_vm7 = vmor %vm793_vm6, %vm794_vm5  ;;  %v2945_v52 = vld [vmem:[#allocation10 + $0x170] sm:$0xff]  ;;  %v2990_v8 = vld [vmem:[#allocation10 + $0xe8] sm:$0xff] }
 0x1a5   :  { %v790_v10 = vsub.f32 1.0, %v789_v2  ;;  %v771_v11 = vsel %vm768_vm3, %v770_v54, %v766_v7  ;;  %v781_v12 = vsel %vm780_vm2, %v1908_v55, %v777_v5  ;;  %v2954_v55 = vld [vmem:[#allocation10 + $0x148] sm:$0xff]  ;;  %v2993_v2 = vld [vmem:[#allocation10 + $0xf0] sm:$0xff]  ;;  %v2996_v54 = vld [vmem:[#allocation10 + $0xf8] sm:$0xff] }
 0x1a6   :  { %v786_v14 = vsel %vm783_vm4, %v785_v6, %v781_v12  ;;  %v805_v15 = vmul.f32 %v1912_v9, %v771_v11  ;;  %v2999_v5 = vld [vmem:[#allocation10 + $0xc0] sm:$0xff]  ;;  %v3002_v6 = vld [vmem:[#allocation10 + $0xc8] sm:$0xff]  ;;  %v3005_v7 = vld [vmem:[#allocation10 + $0xd0] sm:$0xff] }
 0x1a7   :  { %v791_v16 = vmul.f32 %v1910_v63, %v790_v10  ;;  %v804_v17 = vmul.f32 %v786_v14, %v2816_v26  ;;  %v2891_v26 = vld [vmem:[#allocation10 + $0x1e0] sm:$0xff]  ;;  %3518 = vst [vmem:[#allocation27_spill] sm:$0xff] %v3005_v7  ;;  %v3008_v9 = vld [vmem:[#allocation10 + $0xd8] sm:$0xff]  ;;  %v3014_v11 = vld [vmem:[#allocation10 + $0xa8] sm:$0xff] }
 0x1a8   :  { %3519 = vst [vmem:[#allocation28_spill] sm:$0xff] %v3008_v9  ;;  %v3011_v10 = vld [vmem:[#allocation10 + $0xa0] sm:$0xff]  ;;  %v3017_v12 = vld [vmem:[#allocation10 + $0xb0] sm:$0xff]  ;;  %v3020_v14 = vld [vmem:[#allocation10 + $0xb8] sm:$0xff] }
 0x1a9   :  { %v2888_v18 = vadd.f32 %v805_v15, %v804_v17  ;;  %v792_v19 = vadd.f32 %v1910_v63, %v791_v16  ;;  %3520 = vst [vmem:[#allocation29_spill] sm:$0xff] %v3011_v10  ;;  %v3023_v15 = vld [vmem:[#allocation10 + $0x80] sm:$0xff]  ;;  %v3026_v16 = vld [vmem:[#allocation10 + $0x88] sm:$0xff]  ;;  %v3029_v17 = vld [vmem:[#allocation10 + $0x90] sm:$0xff] }
 0x1aa   :  { %3521 = vst [vmem:[#allocation30_spill] sm:$0xff] %v3014_v11 }
 0x1ab   :  { %1913 = vtanh.f32 %v2888_v18  ;;  %v796_v22 = vsel %vm795_vm7, %v1910_v63, %v792_v19  ;;  %v2987_v63 = vld [vmem:[#allocation10 + $0xe0] sm:$0xff]  ;;  %3522 = vst [vmem:[#allocation31_spill] sm:$0xff] %v3017_v12  ;;  %v3032_v19 = vld [vmem:[#allocation10 + $0x98] sm:$0xff] }
 0x1ac   :  { %v801_v34 = vsel %vm798_vm8, %v800_v23, %v796_v22  ;;  %3523 = vst [vmem:[#allocation32_spill] sm:$0xff] %v3020_v14  ;;  %v3041_v22 = vld [vmem:[#allocation10 + $0x70] sm:$0xff]  ;;  %v3044_v23 = vld [vmem:[#allocation10 + $0x78] sm:$0xff] }
 0x1ad   :  { %3524 = vst [vmem:[#allocation33_spill] sm:$0xff] %v3023_v15 }
 0x1ae   :  { %3525 = vst [vmem:[#allocation34_spill] sm:$0xff] %v3026_v16 }
 0x1af   :  { %3526 = vst [vmem:[#allocation35_spill] sm:$0xff] %v3029_v17 }
 0x1b0   :  { %3527 = vst [vmem:[#allocation36_spill] sm:$0xff] %v3032_v19 }
 0x1b1   :  { %v1914_v24 = vpop.eup %1913  ;;  %3530 = vst [vmem:[#allocation39_spill] sm:$0xff] %v3041_v22 }
 0x1b2   :  { %v808_v35 = vmul.f32 %v1914_v24, %v801_v34  ;;  %3531 = vst [vmem:[#allocation40_spill] sm:$0xff] %v3044_v23  ;;  %v3047_v24 = vld [vmem:[#allocation10 + $0x40] sm:$0xff]  ;;  %v3050_v34 = vld [vmem:[#allocation10 + $0x48] sm:$0xff] }
 0x1b3   :  { %3532 = vst [vmem:[#allocation41_spill] sm:$0xff] %v3047_v24 }
 0x1b4   :  { %810 = vst [vmem:[#allocation16 + $0x8] sm:$0xff] %v808_v35  ;;  %834 = vmatmul.f32.vlgmr.msra.gmra.mxu0 %v808_v35  ;;  %854 = vmatmul.f32.vlgmr.msra.gmra.mxu1 %v808_v35 }
 0x1b5   :  { %874 = vmatmul.f32.vlgmr.msra.gmra.mxu2 %v808_v35  ;;  %894 = vmatmul.f32.vlgmr.msra.gmra.mxu3 %v808_v35  ;;  %3533 = vst [vmem:[#allocation42_spill] sm:$0xff] %v3050_v34  ;;  %v3053_v35 = vld [vmem:[#allocation10 + $0x50] sm:$0xff] }
 0x1b6   :  { %1130 = vmatpush.msra.mxu0 %v2891_v26  ;;  %1150 = vmatpush.msra.mxu1 %v2894_v36  ;;  %3534 = vst [vmem:[#allocation43_spill] sm:$0xff] %v3053_v35 }
 0x1b7   :  { %1170 = vmatpush.msra.mxu2 %v2897_v37  ;;  %1190 = vmatpush.msra.mxu3 %v2900_v38 }
 0x1b8   :  { %1131 = vmatpush.msra.mxu0 %v2903_v40  ;;  %1151 = vmatpush.msra.mxu1 %v2906_v41 }
 0x1b9   :  { %1171 = vmatpush.msra.mxu2 %v2909_v42  ;;  %1191 = vmatpush.msra.mxu3 %v2912_v43 }
 0x1ba   :  { %1132 = vmatpush.msra.mxu0 %v2915_v44  ;;  %1152 = vmatpush.msra.mxu1 %v2918_v45 }
 0x1bb   :  { %1172 = vmatpush.msra.mxu2 %v2921_v46  ;;  %1192 = vmatpush.msra.mxu3 %v2924_v47 }
 0x1bc   :  { %1133 = vmatpush.msra.mxu0 %v2927_v1  ;;  %1153 = vmatpush.msra.mxu1 %v2930_v4 }
 0x1bd   :  { %1173 = vmatpush.msra.mxu2 %v2933_v57  ;;  %1193 = vmatpush.msra.mxu3 %v2936_v61 }
 0x1be   :  { %1134 = vmatpush.msra.mxu0 %v2939_v49  ;;  %1154 = vmatpush.msra.mxu1 %v2942_v3 }
 0x1bf   :  { %1174 = vmatpush.msra.mxu2 %v2945_v52  ;;  %1194 = vmatpush.msra.mxu3 %v2948_v53 }
 0x1c0   :  { %1135 = vmatpush.msra.mxu0 %v2951_v59  ;;  %1155 = vmatpush.msra.mxu1 %v2954_v55 }
 0x1c1   :  { %1175 = vmatpush.msra.mxu2 %v2957_v48  ;;  %1195 = vmatpush.msra.mxu3 %v2960_v39 }
 0x1c2   :  { %1136 = vmatpush.msra.mxu0 %v2963_v56  ;;  %1156 = vmatpush.msra.mxu1 %v2966_v0 }
 0x1c3   :  { %1176 = vmatpush.msra.mxu2 %v2969_v13  ;;  %1196 = vmatpush.msra.mxu3 %v2972_v62 }
 0x1c4   :  { %1137 = vmatpush.msra.mxu0 %v2975_v51  ;;  %1157 = vmatpush.msra.mxu1 %v2978_v50 }
 0x1c5   :  { %1177 = vmatpush.msra.mxu2 %v2981_v60  ;;  %1197 = vmatpush.msra.mxu3 %v2984_v58 }
 0x1c6   :  { %1138 = vmatpush.msra.mxu0 %v2987_v63  ;;  %1158 = vmatpush.msra.mxu1 %v2990_v8 }
 0x1c7   :  { %1178 = vmatpush.msra.mxu2 %v2993_v2  ;;  %1198 = vmatpush.msra.mxu3 %v2996_v54 }
 0x1c8   :  { %1139 = vmatpush.msra.mxu0 %v2999_v5  ;;  %1159 = vmatpush.msra.mxu1 %v3002_v6 }
 0x1c9   :  { %1179 = vmatpush.msra.mxu2 %v3005_v7  ;;  %1199 = vmatpush.msra.mxu3 %v3008_v9 }
 0x1ca   :  { %1140 = vmatpush.msra.mxu0 %v3011_v10  ;;  %1160 = vmatpush.msra.mxu1 %v3014_v11 }
 0x1cb   :  { %1180 = vmatpush.msra.mxu2 %v3017_v12  ;;  %1200 = vmatpush.msra.mxu3 %v3020_v14 }
 0x1cc   :  { %1141 = vmatpush.msra.mxu0 %v3023_v15  ;;  %1161 = vmatpush.msra.mxu1 %v3026_v16 }
 0x1cd   :  { %1181 = vmatpush.msra.mxu2 %v3029_v17  ;;  %1201 = vmatpush.msra.mxu3 %v3032_v19 }
 0x1ce   :  { %1142 = vmatpush.msra.mxu0 %v3035_v20  ;;  %1162 = vmatpush.msra.mxu1 %v3038_v21  ;;  %v3056_v21 = vld [vmem:[#allocation10 + $0x58] sm:$0xff] }
 0x1cf   :  { %1182 = vmatpush.msra.mxu2 %v3041_v22  ;;  %1202 = vmatpush.msra.mxu3 %v3044_v23  ;;  %3535 = vst [vmem:[#allocation44_spill] sm:$0xff] %v3056_v21  ;;  %v3537_v23 = vld [vmem:[#allocation57_spill] sm:$0xff] }
 0x1d0   :  { %1143 = vmatpush.msra.mxu0 %v3047_v24  ;;  %1163 = vmatpush.msra.mxu1 %v3050_v34  ;;  %v3536_v24 = vld [vmem:[#allocation56_spill] sm:$0xff] }
 0x1d1   :  { %1183 = vmatpush.msra.mxu2 %v3053_v35  ;;  %1203 = vmatpush.msra.mxu3 %v3056_v21 }
 0x1d2   :  { %1144 = vmatpush.msra.mxu0 %v3506_v25  ;;  %1164 = vmatpush.msra.mxu1 %v3507_v27 }
 0x1d3   :  { %1184 = vmatpush.msra.mxu2 %v3508_v28  ;;  %1204 = vmatpush.msra.mxu3 %v3509_v29  ;;  %v3538_v29 = vld [vmem:[#allocation58_spill] sm:$0xff] }
 0x1d4   :  { %1145 = vmatpush.msra.mxu0 %v3510_v30  ;;  %1165 = vmatpush.msra.mxu1 %v3511_v31 }
 0x1d5   :  { %1185 = vmatpush.msra.mxu2 %v3512_v32  ;;  %1205 = vmatpush.msra.mxu3 %v3513_v33 }
 0x231   :  { %v835_v35 = vpop.f32.mrf.mxu0  ;;  %v855_v34 = vpop.f32.mrf.mxu1 }
 0x232   :  { %v898_v21 = vadd.f32 %v835_v35, %v3536_v24  ;;  %v899_v25 = vadd.f32 %v855_v34, %v3537_v23  ;;  %v3539_v23 = vld [vmem:[#allocation59_spill] sm:$0xff] }
 0x234   :  { %v1852_v22 = vmul.f32 -1.442695, %v898_v21  ;;  %v1853_v27 = vmul.f32 -1.442695, %v899_v25 }
 0x236   :  { %1915 = vpow2.f32 %v1852_v22 }
 0x237   :  { %1917 = vpow2.f32 %v1853_v27 }
 0x238   :  { %v875_v28 = vpop.f32.mrf.mxu2  ;;  %v895_v33 = vpop.f32.mrf.mxu3 }
 0x239   :  { %v900_v20 = vadd.f32 %v875_v28, %v3538_v29  ;;  %v901_v21 = vadd.f32 %v895_v33, %v3539_v23 }
 0x23b   :  { %v1854_v30 = vmul.f32 -1.442695, %v900_v20 }
 0x23c   :  { %v1916_v19 = vpop.eup %1915 }
 0x23d   :  { %v1918_v31 = vpop.eup %1917  ;;  %v911_v17 = vadd.f32 1.0, %v1916_v19  ;;  %1919 = vpow2.f32 %v1854_v30 }
 0x23e   :  { %v912_v32 = vadd.f32 1.0, %v1918_v31 }
 0x23f   :  { %1921 = vrcp.f32 %v911_v17  ;;  %v925_v20 = vand.u32 2147483648, %v911_v17  ;;  %v923_v30 = vand.u32 2147483647, %v911_v17  ;;  %vm919_vm11 = vweird.f32 %v911_v17 }
 0x240   :  { %1923 = vrcp.f32 %v912_v32  ;;  %v940_v29 = vand.u32 2147483648, %v912_v32  ;;  %v938_v15 = vand.u32 2147483647, %v912_v32  ;;  %vm934_vm12 = vweird.f32 %v912_v32 }
 0x241   :  { %v926_v23 = vor.u32 1.1754944e-38, %v925_v20  ;;  %vm924_vm15 = vcmp.eq.f32.partialorder %v923_v30, 8.507059e+37 }
 0x242   :  { %vm939_vm0 = vcmp.eq.f32.partialorder %v938_v15, 8.507059e+37 }
 0x243   :  { %v1920_v16 = vpop.eup %1919 }
 0x244   :  { %v913_v24 = vadd.f32 1.0, %v1920_v16 }
 0x245   :  { %v1922_v35 = vpop.eup %1921 }
 0x246   :  { %v1924_v34 = vpop.eup %1923  ;;  %v915_v22 = vmul.f32 %v1922_v35, %v911_v17  ;;  %1925 = vrcp.f32 %v913_v24  ;;  %vm920_vm9 = vweird.f32 %v1922_v35  ;;  %v955_v20 = vand.u32 2147483648, %v913_v24 }
 0x247   :  { %v930_v25 = vmul.f32 %v1924_v34, %v912_v32  ;;  %1927 = vtanh.f32 %v901_v21  ;;  %vm935_vm10 = vweird.f32 %v1924_v34  ;;  %vm921_vm13 = vmor %vm919_vm11, %vm920_vm9  ;;  %vm949_vm2 = vweird.f32 %v913_v24 }
 0x248   :  { %v916_v27 = vsub.f32 1.0, %v915_v22  ;;  %vm936_vm14 = vmor %vm934_vm12, %vm935_vm10  ;;  %v941_v22 = vor.u32 1.1754944e-38, %v940_v29  ;;  %v956_v30 = vor.u32 1.1754944e-38, %v955_v20  ;;  %v3131_v20 = vld [vmem:[#allocation10 + $0x20] sm:$0xff] }
 0x249   :  { %v931_v28 = vsub.f32 1.0, %v930_v25  ;;  %3558 = vst [vmem:[#allocation45_spill] sm:$0xff] %v3131_v20 }
 0x24a   :  { %v917_v19 = vmul.f32 %v1922_v35, %v916_v27 }
 0x24b   :  { %v932_v31 = vmul.f32 %v1924_v34, %v931_v28 }
 0x24c   :  { %v1926_v14 = vpop.eup %1925  ;;  %v918_v16 = vadd.f32 %v1922_v35, %v917_v19 }
 0x24d   :  { %v945_v33 = vmul.f32 %v1926_v14, %v913_v24  ;;  %v933_v12 = vadd.f32 %v1924_v34, %v932_v31  ;;  %v1928_v21 = vpop.eup %1927  ;;  %vm950_vm1 = vweird.f32 %v1926_v14  ;;  %v3547_v31 = vld [vmem:[#allocation34_spill] sm:$0xff] }
 0x24e   :  { %v922_v25 = vsel %vm921_vm13, %v1922_v35, %v918_v16  ;;  %v953_v35 = vand.u32 2147483647, %v913_v24  ;;  %vm951_vm3 = vmor %vm949_vm2, %vm950_vm1  ;;  %v3545_v24 = vld [vmem:[#allocation32_spill] sm:$0xff]  ;;  %v3548_v16 = vld [vmem:[#allocation35_spill] sm:$0xff] }
 0x24f   :  { %v946_v11 = vsub.f32 1.0, %v945_v33  ;;  %v927_v27 = vsel %vm924_vm15, %v926_v23, %v922_v25  ;;  %v937_v10 = vsel %vm936_vm14, %v1924_v34, %v933_v12  ;;  %v3546_v34 = vld [vmem:[#allocation33_spill] sm:$0xff]  ;;  %v3549_v33 = vld [vmem:[#allocation36_spill] sm:$0xff]  ;;  %v3552_v25 = vld [vmem:[#allocation39_spill] sm:$0xff] }
 0x250   :  { %v942_v28 = vsel %vm939_vm0, %v941_v22, %v937_v10  ;;  %v961_v9 = vmul.f32 %v1928_v21, %v927_v27  ;;  %vm954_vm4 = vcmp.eq.f32.partialorder %v953_v35, 8.507059e+37  ;;  %v3550_v23 = vld [vmem:[#allocation37_spill] sm:$0xff]  ;;  %v3551_v22 = vld [vmem:[#allocation38_spill] sm:$0xff]  ;;  %v3553_v21 = vld [vmem:[#allocation40_spill] sm:$0xff] }
 0x251   :  { %v947_v7 = vmul.f32 %v1926_v14, %v946_v11  ;;  %v960_v19 = vmul.f32 %v942_v28, %v2888_v18  ;;  %v3540_v18 = vld [vmem:[#allocation27_spill] sm:$0xff]  ;;  %v3543_v11 = vld [vmem:[#allocation30_spill] sm:$0xff]  ;;  %v3554_v27 = vld [vmem:[#allocation41_spill] sm:$0xff] }
 0x252   :  { %v3555_v28 = vld [vmem:[#allocation42_spill] sm:$0xff] }
 0x253   :  { %v3072_v17 = vadd.f32 %v961_v9, %v960_v19  ;;  %v948_v32 = vadd.f32 %v1926_v14, %v947_v7  ;;  %v3541_v7 = vld [vmem:[#allocation28_spill] sm:$0xff]  ;;  %v3542_v9 = vld [vmem:[#allocation29_spill] sm:$0xff]  ;;  %v3556_v19 = vld [vmem:[#allocation43_spill] sm:$0xff] }
 0x254   :  { %v3134_v35 = vld [vmem:[#allocation10 + $0x28] sm:$0xff] }
 0x255   :  { %1929 = vtanh.f32 %v3072_v17  ;;  %v952_v29 = vsel %vm951_vm3, %v1926_v14, %v948_v32  ;;  %v3544_v14 = vld [vmem:[#allocation31_spill] sm:$0xff]  ;;  %v3557_v32 = vld [vmem:[#allocation44_spill] sm:$0xff]  ;;  %3559 = vst [vmem:[#allocation46_spill] sm:$0xff] %v3134_v35 }
 0x256   :  { %v957_v15 = vsel %vm954_vm4, %v956_v30, %v952_v29  ;;  %v3137_v29 = vld [vmem:[#allocation10 + $0x30] sm:$0xff]  ;;  %v3140_v30 = vld [vmem:[#allocation10 + $0x38] sm:$0xff] }
 0x257   :  { %3560 = vst [vmem:[#allocation47_spill] sm:$0xff] %v3137_v29 }
 0x258   :  { %3561 = vst [vmem:[#allocation48_spill] sm:$0xff] %v3140_v30 }
 0x25b   :  { %v1930_v12 = vpop.eup %1929 }
 0x25c   :  { %v964_v10 = vmul.f32 %v1930_v12, %v957_v15  ;;  %v3143_v12 = vld [vmem:[#allocation10] sm:$0xff]  ;;  %v3146_v15 = vld [vmem:[#allocation10 + $0x8] sm:$0xff] }
 0x25d   :  { %3562 = vst [vmem:[#allocation49_spill] sm:$0xff] %v3143_v12 }
 0x25e   :  { %966 = vst [vmem:[#allocation16 + $0x10] sm:$0xff] %v964_v10  ;;  %990 = vmatmul.f32.vlgmr.msrb.gmra.mxu0 %v964_v10  ;;  %1010 = vmatmul.f32.vlgmr.msrb.gmra.mxu1 %v964_v10 }
 0x25f   :  { %1030 = vmatmul.f32.vlgmr.msrb.gmra.mxu2 %v964_v10  ;;  %1050 = vmatmul.f32.vlgmr.msrb.gmra.mxu3 %v964_v10  ;;  %3563 = vst [vmem:[#allocation50_spill] sm:$0xff] %v3146_v15  ;;  %v3149_v10 = vld [vmem:[#allocation10 + $0x10] sm:$0xff] }
 0x260   :  { %1286 = vmatpush.msrb.mxu0 %v2891_v26  ;;  %1306 = vmatpush.msrb.mxu1 %v2894_v36  ;;  %3564 = vst [vmem:[#allocation51_spill] sm:$0xff] %v3149_v10 }
 0x261   :  { %1326 = vmatpush.msrb.mxu2 %v2897_v37  ;;  %1346 = vmatpush.msrb.mxu3 %v2900_v38 }
 0x262   :  { %1287 = vmatpush.msrb.mxu0 %v2903_v40  ;;  %1307 = vmatpush.msrb.mxu1 %v2906_v41 }
 0x263   :  { %1327 = vmatpush.msrb.mxu2 %v2909_v42  ;;  %1347 = vmatpush.msrb.mxu3 %v2912_v43 }
 0x264   :  { %1288 = vmatpush.msrb.mxu0 %v2915_v44  ;;  %1308 = vmatpush.msrb.mxu1 %v2918_v45 }
 0x265   :  { %1328 = vmatpush.msrb.mxu2 %v2921_v46  ;;  %1348 = vmatpush.msrb.mxu3 %v2924_v47 }
 0x266   :  { %1289 = vmatpush.msrb.mxu0 %v2927_v1  ;;  %1309 = vmatpush.msrb.mxu1 %v2930_v4 }
 0x267   :  { %1329 = vmatpush.msrb.mxu2 %v2933_v57  ;;  %1349 = vmatpush.msrb.mxu3 %v2936_v61 }
 0x268   :  { %1290 = vmatpush.msrb.mxu0 %v2939_v49  ;;  %1310 = vmatpush.msrb.mxu1 %v2942_v3 }
 0x269   :  { %1330 = vmatpush.msrb.mxu2 %v2945_v52  ;;  %1350 = vmatpush.msrb.mxu3 %v2948_v53 }
 0x26a   :  { %1291 = vmatpush.msrb.mxu0 %v2951_v59  ;;  %1311 = vmatpush.msrb.mxu1 %v2954_v55 }
 0x26b   :  { %1331 = vmatpush.msrb.mxu2 %v2957_v48  ;;  %1351 = vmatpush.msrb.mxu3 %v2960_v39 }
 0x26c   :  { %1292 = vmatpush.msrb.mxu0 %v2963_v56  ;;  %1312 = vmatpush.msrb.mxu1 %v2966_v0 }
 0x26d   :  { %1332 = vmatpush.msrb.mxu2 %v2969_v13  ;;  %1352 = vmatpush.msrb.mxu3 %v2972_v62 }
 0x26e   :  { %1293 = vmatpush.msrb.mxu0 %v2975_v51  ;;  %1313 = vmatpush.msrb.mxu1 %v2978_v50 }
 0x26f   :  { %1333 = vmatpush.msrb.mxu2 %v2981_v60  ;;  %1353 = vmatpush.msrb.mxu3 %v2984_v58 }
 0x270   :  { %1294 = vmatpush.msrb.mxu0 %v2987_v63  ;;  %1314 = vmatpush.msrb.mxu1 %v2990_v8 }
 0x271   :  { %1334 = vmatpush.msrb.mxu2 %v2993_v2  ;;  %1354 = vmatpush.msrb.mxu3 %v2996_v54 }
 0x272   :  { %1295 = vmatpush.msrb.mxu0 %v2999_v5  ;;  %1315 = vmatpush.msrb.mxu1 %v3002_v6 }
 0x273   :  { %1335 = vmatpush.msrb.mxu2 %v3540_v18  ;;  %1355 = vmatpush.msrb.mxu3 %v3541_v7 }
 0x274   :  { %1296 = vmatpush.msrb.mxu0 %v3542_v9  ;;  %1316 = vmatpush.msrb.mxu1 %v3543_v11 }
 0x275   :  { %1336 = vmatpush.msrb.mxu2 %v3544_v14  ;;  %1356 = vmatpush.msrb.mxu3 %v3545_v24 }
 0x276   :  { %1297 = vmatpush.msrb.mxu0 %v3546_v34  ;;  %1317 = vmatpush.msrb.mxu1 %v3547_v31 }
 0x277   :  { %1337 = vmatpush.msrb.mxu2 %v3548_v16  ;;  %1357 = vmatpush.msrb.mxu3 %v3549_v33 }
 0x278   :  { %1298 = vmatpush.msrb.mxu0 %v3550_v23  ;;  %1318 = vmatpush.msrb.mxu1 %v3551_v22 }
 0x279   :  { %1338 = vmatpush.msrb.mxu2 %v3552_v25  ;;  %1358 = vmatpush.msrb.mxu3 %v3553_v21 }
 0x27a   :  { %1299 = vmatpush.msrb.mxu0 %v3554_v27  ;;  %1319 = vmatpush.msrb.mxu1 %v3555_v28 }
 0x27b   :  { %1339 = vmatpush.msrb.mxu2 %v3556_v19  ;;  %1359 = vmatpush.msrb.mxu3 %v3557_v32  ;;  %v3566_v32 = vld [vmem:[#allocation60_spill] sm:$0xff]  ;;  %v3567_v19 = vld [vmem:[#allocation61_spill] sm:$0xff] }
 0x27c   :  { %1300 = vmatpush.msrb.mxu0 %v3131_v20  ;;  %1320 = vmatpush.msrb.mxu1 %v3134_v35  ;;  %v3152_v35 = vld [vmem:[#allocation10 + $0x18] sm:$0xff] }
 0x27d   :  { %1340 = vmatpush.msrb.mxu2 %v3137_v29  ;;  %1360 = vmatpush.msrb.mxu3 %v3140_v30  ;;  %3565 = vst [vmem:[#allocation52_spill] sm:$0xff] %v3152_v35 }
 0x27e   :  { %1301 = vmatpush.msrb.mxu0 %v3143_v12  ;;  %1321 = vmatpush.msrb.mxu1 %v3146_v15  ;;  %v3568_v15 = vld [vmem:[#allocation62_spill] sm:$0xff] }
 0x27f   :  { %1341 = vmatpush.msrb.mxu2 %v3149_v10  ;;  %1361 = vmatpush.msrb.mxu3 %v3152_v35 }
 0x2db   :  { %v991_v29 = vpop.f32.mrf.mxu0  ;;  %v1011_v20 = vpop.f32.mrf.mxu1 }
 0x2dc   :  { %v1054_v30 = vadd.f32 %v991_v29, %v3566_v32  ;;  %v1055_v28 = vadd.f32 %v1011_v20, %v3567_v19  ;;  %v3569_v19 = vld [vmem:[#allocation63_spill] sm:$0xff] }
 0x2de   :  { %v1855_v27 = vmul.f32 -1.442695, %v1054_v30  ;;  %v1856_v12 = vmul.f32 -1.442695, %v1055_v28 }
 0x2e0   :  { %1931 = vpow2.f32 %v1855_v27 }
 0x2e1   :  { %1933 = vpow2.f32 %v1856_v12 }
 0x2e2   :  { %v1031_v21 = vpop.f32.mrf.mxu2  ;;  %v1051_v35 = vpop.f32.mrf.mxu3 }
 0x2e3   :  { %v1056_v25 = vadd.f32 %v1031_v21, %v3568_v15  ;;  %v1057_v20 = vadd.f32 %v1051_v35, %v3569_v19 }
 0x2e5   :  { %v1857_v22 = vmul.f32 -1.442695, %v1056_v25 }
 0x2e6   :  { %v1932_v23 = vpop.eup %1931 }
 0x2e7   :  { %v1934_v10 = vpop.eup %1933  ;;  %v1067_v33 = vadd.f32 1.0, %v1932_v23  ;;  %1935 = vpow2.f32 %v1857_v22 }
 0x2e8   :  { %v1068_v16 = vadd.f32 1.0, %v1934_v10 }
 0x2e9   :  { %1937 = vrcp.f32 %v1067_v33  ;;  %v1081_v25 = vand.u32 2147483648, %v1067_v33  ;;  %v1079_v22 = vand.u32 2147483647, %v1067_v33  ;;  %vm1075_vm7 = vweird.f32 %v1067_v33 }
 0x2ea   :  { %1939 = vrcp.f32 %v1068_v16  ;;  %v1096_v15 = vand.u32 2147483648, %v1068_v16  ;;  %v1094_v34 = vand.u32 2147483647, %v1068_v16  ;;  %vm1090_vm8 = vweird.f32 %v1068_v16 }
 0x2eb   :  { %v1082_v19 = vor.u32 1.1754944e-38, %v1081_v25  ;;  %vm1080_vm11 = vcmp.eq.f32.partialorder %v1079_v22, 8.507059e+37 }
 0x2ec   :  { %vm1095_vm12 = vcmp.eq.f32.partialorder %v1094_v34, 8.507059e+37 }
 0x2ed   :  { %v1936_v31 = vpop.eup %1935 }
 0x2ee   :  { %v1069_v32 = vadd.f32 1.0, %v1936_v31 }
 0x2ef   :  { %v1938_v29 = vpop.eup %1937 }
 0x2f0   :  { %v1940_v28 = vpop.eup %1939  ;;  %v1071_v27 = vmul.f32 %v1938_v29, %v1067_v33  ;;  %1941 = vrcp.f32 %v1069_v32  ;;  %vm1076_vm5 = vweird.f32 %v1938_v29  ;;  %v1111_v25 = vand.u32 2147483648, %v1069_v32 }
 0x2f1   :  { %v1086_v30 = vmul.f32 %v1940_v28, %v1068_v16  ;;  %1943 = vtanh.f32 %v1057_v20  ;;  %vm1091_vm6 = vweird.f32 %v1940_v28  ;;  %vm1077_vm9 = vmor %vm1075_vm7, %vm1076_vm5  ;;  %vm1105_vm14 = vweird.f32 %v1069_v32 }
 0x2f2   :  { %v1072_v12 = vsub.f32 1.0, %v1071_v27  ;;  %vm1092_vm10 = vmor %vm1090_vm8, %vm1091_vm6  ;;  %v1097_v27 = vor.u32 1.1754944e-38, %v1096_v15  ;;  %v1112_v22 = vor.u32 1.1754944e-38, %v1111_v25  ;;  %v3588_v25 = vld [vmem:[#allocation45_spill] sm:$0xff] }
 0x2f3   :  { %v1087_v21 = vsub.f32 1.0, %v1086_v30 }
 0x2f4   :  { %v1073_v23 = vmul.f32 %v1938_v29, %v1072_v12 }
 0x2f5   :  { %v1088_v10 = vmul.f32 %v1940_v28, %v1087_v21 }
 0x2f6   :  { %v1942_v24 = vpop.eup %1941  ;;  %v1074_v31 = vadd.f32 %v1938_v29, %v1073_v23 }
 0x2f7   :  { %v1101_v35 = vmul.f32 %v1942_v24, %v1069_v32  ;;  %v1089_v14 = vadd.f32 %v1940_v28, %v1088_v10  ;;  %v1944_v20 = vpop.eup %1943  ;;  %vm1106_vm13 = vweird.f32 %v1942_v24  ;;  %v3577_v10 = vld [vmem:[#allocation34_spill] sm:$0xff] }
 0x2f8   :  { %v1078_v30 = vsel %vm1077_vm9, %v1938_v29, %v1074_v31  ;;  %v1109_v29 = vand.u32 2147483647, %v1069_v32  ;;  %vm1107_vm15 = vmor %vm1105_vm14, %vm1106_vm13  ;;  %v3575_v32 = vld [vmem:[#allocation32_spill] sm:$0xff]  ;;  %v3578_v31 = vld [vmem:[#allocation35_spill] sm:$0xff] }
 0x2f9   :  { %v1102_v11 = vsub.f32 1.0, %v1101_v35  ;;  %v1083_v12 = vsel %vm1080_vm11, %v1082_v19, %v1078_v30  ;;  %v1093_v9 = vsel %vm1092_vm10, %v1940_v28, %v1089_v14  ;;  %v3576_v28 = vld [vmem:[#allocation33_spill] sm:$0xff]  ;;  %v3579_v35 = vld [vmem:[#allocation36_spill] sm:$0xff]  ;;  %v3582_v30 = vld [vmem:[#allocation39_spill] sm:$0xff] }
 0x2fa   :  { %v1098_v21 = vsel %vm1095_vm12, %v1097_v27, %v1093_v9  ;;  %v1117_v7 = vmul.f32 %v1944_v20, %v1083_v12  ;;  %vm1110_vm0 = vcmp.eq.f32.partialorder %v1109_v29, 8.507059e+37  ;;  %v3580_v19 = vld [vmem:[#allocation37_spill] sm:$0xff]  ;;  %v3581_v27 = vld [vmem:[#allocation38_spill] sm:$0xff]  ;;  %v3583_v20 = vld [vmem:[#allocation40_spill] sm:$0xff] }
 0x2fb   :  { %v1103_v18 = vmul.f32 %v1942_v24, %v1102_v11  ;;  %v1116_v23 = vmul.f32 %v1098_v21, %v3072_v17  ;;  %v3570_v17 = vld [vmem:[#allocation27_spill] sm:$0xff]  ;;  %v3573_v11 = vld [vmem:[#allocation30_spill] sm:$0xff]  ;;  %v3584_v12 = vld [vmem:[#allocation41_spill] sm:$0xff] }
 0x2fc   :  { %v3585_v21 = vld [vmem:[#allocation42_spill] sm:$0xff] }
 0x2fd   :  { %v3160_v33 = vadd.f32 %v1117_v7, %v1116_v23  ;;  %v1104_v16 = vadd.f32 %v1942_v24, %v1103_v18  ;;  %v3571_v18 = vld [vmem:[#allocation28_spill] sm:$0xff]  ;;  %v3572_v7 = vld [vmem:[#allocation29_spill] sm:$0xff]  ;;  %v3586_v23 = vld [vmem:[#allocation43_spill] sm:$0xff] }
 0x2fe   :  { %v3589_v29 = vld [vmem:[#allocation46_spill] sm:$0xff] }
 0x2ff   :  { %1945 = vtanh.f32 %v3160_v33  ;;  %v1108_v15 = vsel %vm1107_vm15, %v1942_v24, %v1104_v16  ;;  %v3574_v24 = vld [vmem:[#allocation31_spill] sm:$0xff]  ;;  %v3587_v16 = vld [vmem:[#allocation44_spill] sm:$0xff] }
 0x300   :  { %v1113_v34 = vsel %vm1110_vm0, %v1112_v22, %v1108_v15  ;;  %v3590_v15 = vld [vmem:[#allocation47_spill] sm:$0xff]  ;;  %v3591_v22 = vld [vmem:[#allocation48_spill] sm:$0xff] }
 0x305   :  { %v1946_v14 = vpop.eup %1945 }
 0x306   :  { %v1120_v9 = vmul.f32 %v1946_v14, %v1113_v34  ;;  %v3592_v14 = vld [vmem:[#allocation49_spill] sm:$0xff]  ;;  %v3593_v34 = vld [vmem:[#allocation50_spill] sm:$0xff] }
 0x308   :  { %1122 = vst [vmem:[#allocation16 + $0x18] sm:$0xff] %v1120_v9  ;;  %1146 = vmatmul.f32.vlgmr.msra.gmra.mxu0 %v1120_v9  ;;  %1166 = vmatmul.f32.vlgmr.msra.gmra.mxu1 %v1120_v9 }
 0x309   :  { %1186 = vmatmul.f32.vlgmr.msra.gmra.mxu2 %v1120_v9  ;;  %1206 = vmatmul.f32.vlgmr.msra.gmra.mxu3 %v1120_v9  ;;  %v3594_v9 = vld [vmem:[#allocation51_spill] sm:$0xff] }
 0x30a   :  { %1442 = vmatpush.msra.mxu0 %v2891_v26  ;;  %1462 = vmatpush.msra.mxu1 %v2894_v36 }
 0x30b   :  { %1482 = vmatpush.msra.mxu2 %v2897_v37  ;;  %1502 = vmatpush.msra.mxu3 %v2900_v38 }
 0x30c   :  { %1443 = vmatpush.msra.mxu0 %v2903_v40  ;;  %1463 = vmatpush.msra.mxu1 %v2906_v41 }
 0x30d   :  { %1483 = vmatpush.msra.mxu2 %v2909_v42  ;;  %1503 = vmatpush.msra.mxu3 %v2912_v43 }
 0x30e   :  { %1444 = vmatpush.msra.mxu0 %v2915_v44  ;;  %1464 = vmatpush.msra.mxu1 %v2918_v45 }
 0x30f   :  { %1484 = vmatpush.msra.mxu2 %v2921_v46  ;;  %1504 = vmatpush.msra.mxu3 %v2924_v47 }
 0x310   :  { %1445 = vmatpush.msra.mxu0 %v2927_v1  ;;  %1465 = vmatpush.msra.mxu1 %v2930_v4 }
 0x311   :  { %1485 = vmatpush.msra.mxu2 %v2933_v57  ;;  %1505 = vmatpush.msra.mxu3 %v2936_v61 }
 0x312   :  { %1446 = vmatpush.msra.mxu0 %v2939_v49  ;;  %1466 = vmatpush.msra.mxu1 %v2942_v3 }
 0x313   :  { %1486 = vmatpush.msra.mxu2 %v2945_v52  ;;  %1506 = vmatpush.msra.mxu3 %v2948_v53 }
 0x314   :  { %1447 = vmatpush.msra.mxu0 %v2951_v59  ;;  %1467 = vmatpush.msra.mxu1 %v2954_v55 }
 0x315   :  { %1487 = vmatpush.msra.mxu2 %v2957_v48  ;;  %1507 = vmatpush.msra.mxu3 %v2960_v39 }
 0x316   :  { %1448 = vmatpush.msra.mxu0 %v2963_v56  ;;  %1468 = vmatpush.msra.mxu1 %v2966_v0 }
 0x317   :  { %1488 = vmatpush.msra.mxu2 %v2969_v13  ;;  %1508 = vmatpush.msra.mxu3 %v2972_v62 }
 0x318   :  { %1449 = vmatpush.msra.mxu0 %v2975_v51  ;;  %1469 = vmatpush.msra.mxu1 %v2978_v50 }
 0x319   :  { %1489 = vmatpush.msra.mxu2 %v2981_v60  ;;  %1509 = vmatpush.msra.mxu3 %v2984_v58 }
 0x31a   :  { %1450 = vmatpush.msra.mxu0 %v2987_v63  ;;  %1470 = vmatpush.msra.mxu1 %v2990_v8 }
 0x31b   :  { %1490 = vmatpush.msra.mxu2 %v2993_v2  ;;  %1510 = vmatpush.msra.mxu3 %v2996_v54 }
 0x31c   :  { %1451 = vmatpush.msra.mxu0 %v2999_v5  ;;  %1471 = vmatpush.msra.mxu1 %v3002_v6 }
 0x31d   :  { %1491 = vmatpush.msra.mxu2 %v3570_v17  ;;  %1511 = vmatpush.msra.mxu3 %v3571_v18 }
 0x31e   :  { %1452 = vmatpush.msra.mxu0 %v3572_v7  ;;  %1472 = vmatpush.msra.mxu1 %v3573_v11 }
 0x31f   :  { %1492 = vmatpush.msra.mxu2 %v3574_v24  ;;  %1512 = vmatpush.msra.mxu3 %v3575_v32 }
 0x320   :  { %1453 = vmatpush.msra.mxu0 %v3576_v28  ;;  %1473 = vmatpush.msra.mxu1 %v3577_v10 }
 0x321   :  { %1493 = vmatpush.msra.mxu2 %v3578_v31  ;;  %1513 = vmatpush.msra.mxu3 %v3579_v35 }
 0x322   :  { %1454 = vmatpush.msra.mxu0 %v3580_v19  ;;  %1474 = vmatpush.msra.mxu1 %v3581_v27 }
 0x323   :  { %1494 = vmatpush.msra.mxu2 %v3582_v30  ;;  %1514 = vmatpush.msra.mxu3 %v3583_v20  ;;  %v3596_v20 = vld [vmem:[#allocation64_spill] sm:$0xff]  ;;  %v3597_v30 = vld [vmem:[#allocation65_spill] sm:$0xff] }
 0x324   :  { %1455 = vmatpush.msra.mxu0 %v3584_v12  ;;  %1475 = vmatpush.msra.mxu1 %v3585_v21  ;;  %v3595_v12 = vld [vmem:[#allocation52_spill] sm:$0xff] }
 0x325   :  { %1495 = vmatpush.msra.mxu2 %v3586_v23  ;;  %1515 = vmatpush.msra.mxu3 %v3587_v16 }
 0x326   :  { %1456 = vmatpush.msra.mxu0 %v3588_v25  ;;  %1476 = vmatpush.msra.mxu1 %v3589_v29 }
 0x327   :  { %1496 = vmatpush.msra.mxu2 %v3590_v15  ;;  %1516 = vmatpush.msra.mxu3 %v3591_v22  ;;  %v3598_v22 = vld [vmem:[#allocation66_spill] sm:$0xff] }
 0x328   :  { %1457 = vmatpush.msra.mxu0 %v3592_v14  ;;  %1477 = vmatpush.msra.mxu1 %v3593_v34 }
 0x329   :  { %1497 = vmatpush.msra.mxu2 %v3594_v9  ;;  %1517 = vmatpush.msra.mxu3 %v3595_v12 }
 0x385   :  { %v1147_v21 = vpop.f32.mrf.mxu0  ;;  %v1167_v23 = vpop.f32.mrf.mxu1 }
 0x386   :  { %v1210_v16 = vadd.f32 %v1147_v21, %v3596_v20  ;;  %v1211_v25 = vadd.f32 %v1167_v23, %v3597_v30  ;;  %v3599_v30 = vld [vmem:[#allocation67_spill] sm:$0xff] }
 0x388   :  { %v1858_v27 = vmul.f32 -1.442695, %v1210_v16  ;;  %v1859_v29 = vmul.f32 -1.442695, %v1211_v25 }
 0x38a   :  { %1947 = vpow2.f32 %v1858_v27 }
 0x38b   :  { %1949 = vpow2.f32 %v1859_v29 }
 0x38c   :  { %v1187_v15 = vpop.f32.mrf.mxu2  ;;  %v1207_v12 = vpop.f32.mrf.mxu3 }
 0x38d   :  { %v1212_v19 = vadd.f32 %v1187_v15, %v3598_v22  ;;  %v1213_v23 = vadd.f32 %v1207_v12, %v3599_v30 }
 0x38f   :  { %v1860_v14 = vmul.f32 -1.442695, %v1212_v19 }
 0x390   :  { %v1948_v35 = vpop.eup %1947 }
 0x391   :  { %v1950_v34 = vpop.eup %1949  ;;  %v1223_v31 = vadd.f32 1.0, %v1948_v35  ;;  %1951 = vpow2.f32 %v1860_v14 }
 0x392   :  { %v1224_v9 = vadd.f32 1.0, %v1950_v34 }
 0x393   :  { %1953 = vrcp.f32 %v1223_v31  ;;  %v1237_v19 = vand.u32 2147483648, %v1223_v31  ;;  %v1235_v14 = vand.u32 2147483647, %v1223_v31  ;;  %vm1231_vm3 = vweird.f32 %v1223_v31 }
 0x394   :  { %1955 = vrcp.f32 %v1224_v9  ;;  %v1252_v22 = vand.u32 2147483648, %v1224_v9  ;;  %v1250_v28 = vand.u32 2147483647, %v1224_v9  ;;  %vm1246_vm4 = vweird.f32 %v1224_v9 }
 0x395   :  { %v1238_v30 = vor.u32 1.1754944e-38, %v1237_v19  ;;  %vm1236_vm7 = vcmp.eq.f32.partialorder %v1235_v14, 8.507059e+37 }
 0x396   :  { %vm1251_vm8 = vcmp.eq.f32.partialorder %v1250_v28, 8.507059e+37 }
 0x397   :  { %v1952_v10 = vpop.eup %1951 }
 0x398   :  { %v1225_v20 = vadd.f32 1.0, %v1952_v10 }
 0x399   :  { %v1954_v21 = vpop.eup %1953 }
 0x39a   :  { %v1956_v16 = vpop.eup %1955  ;;  %v1227_v27 = vmul.f32 %v1954_v21, %v1223_v31  ;;  %1957 = vrcp.f32 %v1225_v20  ;;  %vm1232_vm1 = vweird.f32 %v1954_v21  ;;  %v1267_v19 = vand.u32 2147483648, %v1225_v20 }
 0x39b   :  { %v1242_v25 = vmul.f32 %v1956_v16, %v1224_v9  ;;  %1959 = vtanh.f32 %v1213_v23  ;;  %vm1247_vm2 = vweird.f32 %v1956_v16  ;;  %vm1233_vm5 = vmor %vm1231_vm3, %vm1232_vm1  ;;  %vm1261_vm10 = vweird.f32 %v1225_v20 }
 0x39c   :  { %v1228_v29 = vsub.f32 1.0, %v1227_v27  ;;  %vm1248_vm6 = vmor %vm1246_vm4, %vm1247_vm2  ;;  %v1253_v27 = vor.u32 1.1754944e-38, %v1252_v22  ;;  %v1268_v14 = vor.u32 1.1754944e-38, %v1267_v19 }
 0x39d   :  { %v1243_v15 = vsub.f32 1.0, %v1242_v25 }
 0x39e   :  { %v1229_v35 = vmul.f32 %v1954_v21, %v1228_v29 }
 0x39f   :  { %v1244_v34 = vmul.f32 %v1956_v16, %v1243_v15 }
 0x3a0   :  { %v1958_v32 = vpop.eup %1957  ;;  %v1230_v10 = vadd.f32 %v1954_v21, %v1229_v35 }
 0x3a1   :  { %v1257_v12 = vmul.f32 %v1958_v32, %v1225_v20  ;;  %v1245_v24 = vadd.f32 %v1956_v16, %v1244_v34  ;;  %v1960_v23 = vpop.eup %1959  ;;  %vm1262_vm9 = vweird.f32 %v1958_v32 }
 0x3a2   :  { %v1234_v25 = vsel %vm1233_vm5, %v1954_v21, %v1230_v10  ;;  %v1265_v21 = vand.u32 2147483647, %v1225_v20  ;;  %vm1263_vm11 = vmor %vm1261_vm10, %vm1262_vm9  ;;  %v3629_v10 = vld [vmem:[#allocation71_spill] sm:$0xff] }
 0x3a3   :  { %v1258_v11 = vsub.f32 1.0, %v1257_v12  ;;  %v1239_v29 = vsel %vm1236_vm7, %v1238_v30, %v1234_v25  ;;  %v1249_v7 = vsel %vm1248_vm6, %v1956_v16, %v1245_v24 }
 0x3a4   :  { %v1254_v15 = vsel %vm1251_vm8, %v1253_v27, %v1249_v7  ;;  %v1273_v18 = vmul.f32 %v1960_v23, %v1239_v29  ;;  %vm1266_vm12 = vcmp.eq.f32.partialorder %v1265_v21, 8.507059e+37 }
 0x3a5   :  { %v1259_v17 = vmul.f32 %v1958_v32, %v1258_v11  ;;  %v1272_v35 = vmul.f32 %v1254_v15, %v3160_v33 }
 0x3a7   :  { %v3232_v31 = vadd.f32 %v1273_v18, %v1272_v35  ;;  %v1260_v9 = vadd.f32 %v1958_v32, %v1259_v17 }
 0x3a9   :  { %1961 = vtanh.f32 %v3232_v31  ;;  %v1264_v22 = vsel %vm1263_vm11, %v1958_v32, %v1260_v9 }
 0x3aa   :  { %v1269_v28 = vsel %vm1266_vm12, %v1268_v14, %v1264_v22 }
 0x3af   :  { %v1962_v24 = vpop.eup %1961 }
 0x3b0   :  { %v1276_v7 = vmul.f32 %v1962_v24, %v1269_v28 }
 0x3b2   :  { %1278 = vst [vmem:[#allocation16 + $0x20] sm:$0xff] %v1276_v7  ;;  %1302 = vmatmul.f32.vlgmr.msrb.gmra.mxu0 %v1276_v7  ;;  %1322 = vmatmul.f32.vlgmr.msrb.gmra.mxu1 %v1276_v7 }
 0x3b3   :  { %1342 = vmatmul.f32.vlgmr.msrb.gmra.mxu2 %v1276_v7  ;;  %1362 = vmatmul.f32.vlgmr.msrb.gmra.mxu3 %v1276_v7 }
 0x3b4   :  { %1598 = vmatpush.msrb.mxu0 %v2891_v26  ;;  %1618 = vmatpush.msrb.mxu1 %v2894_v36  ;;  %v3600_v26 = vld [vmem:[#allocation27_spill] sm:$0xff]  ;;  %v3601_v36 = vld [vmem:[#allocation28_spill] sm:$0xff] }
 0x3b5   :  { %1638 = vmatpush.msrb.mxu2 %v2897_v37  ;;  %1658 = vmatpush.msrb.mxu3 %v2900_v38  ;;  %v3602_v37 = vld [vmem:[#allocation29_spill] sm:$0xff]  ;;  %v3603_v38 = vld [vmem:[#allocation30_spill] sm:$0xff] }
 0x3b6   :  { %1599 = vmatpush.msrb.mxu0 %v2903_v40  ;;  %1619 = vmatpush.msrb.mxu1 %v2906_v41  ;;  %v3604_v40 = vld [vmem:[#allocation31_spill] sm:$0xff]  ;;  %v3605_v41 = vld [vmem:[#allocation32_spill] sm:$0xff] }
 0x3b7   :  { %1639 = vmatpush.msrb.mxu2 %v2909_v42  ;;  %1659 = vmatpush.msrb.mxu3 %v2912_v43  ;;  %v3606_v42 = vld [vmem:[#allocation33_spill] sm:$0xff]  ;;  %v3607_v43 = vld [vmem:[#allocation34_spill] sm:$0xff] }
 0x3b8   :  { %1600 = vmatpush.msrb.mxu0 %v2915_v44  ;;  %1620 = vmatpush.msrb.mxu1 %v2918_v45  ;;  %v3608_v44 = vld [vmem:[#allocation35_spill] sm:$0xff]  ;;  %v3609_v45 = vld [vmem:[#allocation36_spill] sm:$0xff] }
 0x3b9   :  { %1640 = vmatpush.msrb.mxu2 %v2921_v46  ;;  %1660 = vmatpush.msrb.mxu3 %v2924_v47  ;;  %v3610_v46 = vld [vmem:[#allocation37_spill] sm:$0xff]  ;;  %v3611_v47 = vld [vmem:[#allocation38_spill] sm:$0xff] }
 0x3ba   :  { %1601 = vmatpush.msrb.mxu0 %v2927_v1  ;;  %1621 = vmatpush.msrb.mxu1 %v2930_v4  ;;  %v3612_v1 = vld [vmem:[#allocation39_spill] sm:$0xff]  ;;  %v3613_v4 = vld [vmem:[#allocation40_spill] sm:$0xff] }
 0x3bb   :  { %1641 = vmatpush.msrb.mxu2 %v2933_v57  ;;  %1661 = vmatpush.msrb.mxu3 %v2936_v61  ;;  %v3614_v57 = vld [vmem:[#allocation41_spill] sm:$0xff]  ;;  %v3615_v61 = vld [vmem:[#allocation42_spill] sm:$0xff] }
 0x3bc   :  { %1602 = vmatpush.msrb.mxu0 %v2939_v49  ;;  %1622 = vmatpush.msrb.mxu1 %v2942_v3  ;;  %v3616_v49 = vld [vmem:[#allocation43_spill] sm:$0xff]  ;;  %v3617_v3 = vld [vmem:[#allocation44_spill] sm:$0xff] }
 0x3bd   :  { %1642 = vmatpush.msrb.mxu2 %v2945_v52  ;;  %1662 = vmatpush.msrb.mxu3 %v2948_v53  ;;  %v3618_v52 = vld [vmem:[#allocation45_spill] sm:$0xff]  ;;  %v3619_v53 = vld [vmem:[#allocation46_spill] sm:$0xff] }
 0x3be   :  { %1603 = vmatpush.msrb.mxu0 %v2951_v59  ;;  %1623 = vmatpush.msrb.mxu1 %v2954_v55  ;;  %v3620_v59 = vld [vmem:[#allocation47_spill] sm:$0xff]  ;;  %v3621_v55 = vld [vmem:[#allocation48_spill] sm:$0xff] }
 0x3bf   :  { %1643 = vmatpush.msrb.mxu2 %v2957_v48  ;;  %1663 = vmatpush.msrb.mxu3 %v2960_v39  ;;  %v3622_v48 = vld [vmem:[#allocation49_spill] sm:$0xff]  ;;  %v3623_v39 = vld [vmem:[#allocation50_spill] sm:$0xff] }
 0x3c0   :  { %1604 = vmatpush.msrb.mxu0 %v2963_v56  ;;  %1624 = vmatpush.msrb.mxu1 %v2966_v0  ;;  %v3624_v56 = vld [vmem:[#allocation51_spill] sm:$0xff]  ;;  %v3625_v0 = vld [vmem:[#allocation52_spill] sm:$0xff] }
 0x3c1   :  { %1644 = vmatpush.msrb.mxu2 %v2969_v13  ;;  %1664 = vmatpush.msrb.mxu3 %v2972_v62 }
 0x3c2   :  { %1605 = vmatpush.msrb.mxu0 %v2975_v51  ;;  %1625 = vmatpush.msrb.mxu1 %v2978_v50  ;;  %v3626_v51 = vld [vmem:[#allocation68_spill] sm:$0xff] }
 0x3c3   :  { %1645 = vmatpush.msrb.mxu2 %v2981_v60  ;;  %1665 = vmatpush.msrb.mxu3 %v2984_v58  ;;  %v3627_v60 = vld [vmem:[#allocation69_spill] sm:$0xff] }
 0x3c4   :  { %1606 = vmatpush.msrb.mxu0 %v2987_v63  ;;  %1626 = vmatpush.msrb.mxu1 %v2990_v8 }
 0x3c5   :  { %1646 = vmatpush.msrb.mxu2 %v2993_v2  ;;  %1666 = vmatpush.msrb.mxu3 %v2996_v54  ;;  %v3628_v54 = vld [vmem:[#allocation70_spill] sm:$0xff] }
 0x3c6   :  { %1607 = vmatpush.msrb.mxu0 %v2999_v5  ;;  %1627 = vmatpush.msrb.mxu1 %v3002_v6 }
 0x3c7   :  { %1647 = vmatpush.msrb.mxu2 %v3600_v26  ;;  %1667 = vmatpush.msrb.mxu3 %v3601_v36 }
 0x3c8   :  { %1608 = vmatpush.msrb.mxu0 %v3602_v37  ;;  %1628 = vmatpush.msrb.mxu1 %v3603_v38 }
 0x3c9   :  { %1648 = vmatpush.msrb.mxu2 %v3604_v40  ;;  %1668 = vmatpush.msrb.mxu3 %v3605_v41 }
 0x3ca   :  { %1609 = vmatpush.msrb.mxu0 %v3606_v42  ;;  %1629 = vmatpush.msrb.mxu1 %v3607_v43 }
 0x3cb   :  { %1649 = vmatpush.msrb.mxu2 %v3608_v44  ;;  %1669 = vmatpush.msrb.mxu3 %v3609_v45 }
 0x3cc   :  { %1610 = vmatpush.msrb.mxu0 %v3610_v46  ;;  %1630 = vmatpush.msrb.mxu1 %v3611_v47 }
 0x3cd   :  { %1650 = vmatpush.msrb.mxu2 %v3612_v1  ;;  %1670 = vmatpush.msrb.mxu3 %v3613_v4 }
 0x3ce   :  { %1611 = vmatpush.msrb.mxu0 %v3614_v57  ;;  %1631 = vmatpush.msrb.mxu1 %v3615_v61 }
 0x3cf   :  { %1651 = vmatpush.msrb.mxu2 %v3616_v49  ;;  %1671 = vmatpush.msrb.mxu3 %v3617_v3 }
 0x3d0   :  { %1612 = vmatpush.msrb.mxu0 %v3618_v52  ;;  %1632 = vmatpush.msrb.mxu1 %v3619_v53 }
 0x3d1   :  { %1652 = vmatpush.msrb.mxu2 %v3620_v59  ;;  %1672 = vmatpush.msrb.mxu3 %v3621_v55  ;;  %v3630_v55 = vld [vmem:[#allocation72_spill] sm:$0xff] }
 0x3d2   :  { %1613 = vmatpush.msrb.mxu0 %v3622_v48  ;;  %1633 = vmatpush.msrb.mxu1 %v3623_v39  ;;  %v3631_v39 = vld [vmem:[#allocation73_spill] sm:$0xff] }
 0x3d3   :  { %1653 = vmatpush.msrb.mxu2 %v3624_v56  ;;  %1673 = vmatpush.msrb.mxu3 %v3625_v0 }
 0x42f   :  { %v1303_v13 = vpop.f32.mrf.mxu0  ;;  %v1323_v62 = vpop.f32.mrf.mxu1 }
 0x430   :  { %v1366_v50 = vadd.f32 %v1303_v13, %v3626_v51  ;;  %v1367_v58 = vadd.f32 %v1323_v62, %v3627_v60  ;;  %v3632_v51 = vld [vmem:[#allocation74_spill] sm:$0xff] }
 0x432   :  { %v1861_v63 = vmul.f32 -1.442695, %v1366_v50  ;;  %v1862_v8 = vmul.f32 -1.442695, %v1367_v58 }
 0x434   :  { %1963 = vpow2.f32 %v1861_v63 }
 0x435   :  { %1965 = vpow2.f32 %v1862_v8 }
 0x436   :  { %v1343_v2 = vpop.f32.mrf.mxu2  ;;  %v1363_v32 = vpop.f32.mrf.mxu3 }
 0x437   :  { %v1368_v5 = vadd.f32 %v1343_v2, %v3628_v54  ;;  %v1369_v12 = vadd.f32 %v1363_v32, %v3629_v10 }
 0x439   :  { %v1863_v6 = vmul.f32 -1.442695, %v1368_v5 }
 0x43a   :  { %v1964_v33 = vpop.eup %1963 }
 0x43b   :  { %v1966_v17 = vpop.eup %1965  ;;  %v1379_v18 = vadd.f32 1.0, %v1964_v33  ;;  %1967 = vpow2.f32 %v1863_v6 }
 0x43c   :  { %v1380_v11 = vadd.f32 1.0, %v1966_v17  ;;  %v3633_v17 = vld [vmem:[#allocation75_spill] sm:$0xff] }
 0x43d   :  { %1969 = vrcp.f32 %v1379_v18  ;;  %v1393_v15 = vand.u32 2147483648, %v1379_v18  ;;  %v1391_v19 = vand.u32 2147483647, %v1379_v18  ;;  %vm1387_vm15 = vweird.f32 %v1379_v18 }
 0x43e   :  { %1971 = vrcp.f32 %v1380_v11  ;;  %v1408_v35 = vand.u32 2147483648, %v1380_v11  ;;  %v1406_v22 = vand.u32 2147483647, %v1380_v11  ;;  %vm1402_vm0 = vweird.f32 %v1380_v11 }
 0x43f   :  { %v1394_v7 = vor.u32 1.1754944e-38, %v1393_v15  ;;  %vm1392_vm3 = vcmp.eq.f32.partialorder %v1391_v19, 8.507059e+37 }
 0x440   :  { %v1409_v36 = vor.u32 1.1754944e-38, %v1408_v35  ;;  %vm1407_vm4 = vcmp.eq.f32.partialorder %v1406_v22, 8.507059e+37 }
 0x441   :  { %v1968_v20 = vpop.eup %1967 }
 0x442   :  { %v1381_v16 = vadd.f32 1.0, %v1968_v20 }
 0x443   :  { %v1970_v34 = vpop.eup %1969 }
 0x444   :  { %v1972_v30 = vpop.eup %1971  ;;  %v1383_v27 = vmul.f32 %v1970_v34, %v1379_v18  ;;  %1973 = vrcp.f32 %v1381_v16  ;;  %vm1388_vm13 = vweird.f32 %v1970_v34  ;;  %v1423_v4 = vand.u32 2147483648, %v1381_v16 }
 0x445   :  { %v1398_v25 = vmul.f32 %v1972_v30, %v1380_v11  ;;  %1975 = vtanh.f32 %v1369_v12  ;;  %vm1403_vm14 = vweird.f32 %v1972_v30  ;;  %vm1389_vm1 = vmor %vm1387_vm15, %vm1388_vm13  ;;  %vm1417_vm6 = vweird.f32 %v1381_v16 }
 0x446   :  { %v1384_v23 = vsub.f32 1.0, %v1383_v27  ;;  %vm1404_vm2 = vmor %vm1402_vm0, %vm1403_vm14  ;;  %v1421_v57 = vand.u32 2147483647, %v1381_v16  ;;  %v1424_v49 = vor.u32 1.1754944e-38, %v1423_v4 }
 0x447   :  { %v1399_v29 = vsub.f32 1.0, %v1398_v25 }
 0x448   :  { %v1385_v9 = vmul.f32 %v1970_v34, %v1384_v23  ;;  %vm1422_vm8 = vcmp.eq.f32.partialorder %v1421_v57, 8.507059e+37 }
 0x449   :  { %v1400_v21 = vmul.f32 %v1972_v30, %v1399_v29 }
 0x44a   :  { %v1974_v14 = vpop.eup %1973  ;;  %v1386_v24 = vadd.f32 %v1970_v34, %v1385_v9 }
 0x44b   :  { %v1413_v28 = vmul.f32 %v1974_v14, %v1381_v16  ;;  %v1401_v26 = vadd.f32 %v1972_v30, %v1400_v21  ;;  %v1976_v38 = vpop.eup %1975  ;;  %vm1418_vm5 = vweird.f32 %v1974_v14 }
 0x44c   :  { %v1390_v37 = vsel %vm1389_vm1, %v1970_v34, %v1386_v24  ;;  %vm1419_vm7 = vmor %vm1417_vm6, %vm1418_vm5 }
 0x44d   :  { %v1414_v40 = vsub.f32 1.0, %v1413_v28  ;;  %v1395_v41 = vsel %vm1392_vm3, %v1394_v7, %v1390_v37  ;;  %v1405_v42 = vsel %vm1404_vm2, %v1972_v30, %v1401_v26 }
 0x44e   :  { %v1410_v43 = vsel %vm1407_vm4, %v1409_v36, %v1405_v42  ;;  %v1429_v44 = vmul.f32 %v1976_v38, %v1395_v41 }
 0x44f   :  { %v1415_v45 = vmul.f32 %v1974_v14, %v1414_v40  ;;  %v1428_v46 = vmul.f32 %v1410_v43, %v3232_v31 }
 0x451   :  { %v3304_v47 = vadd.f32 %v1429_v44, %v1428_v46  ;;  %v1416_v1 = vadd.f32 %v1974_v14, %v1415_v45 }
 0x453   :  { %1977 = vtanh.f32 %v3304_v47  ;;  %v1420_v61 = vsel %vm1419_vm7, %v1974_v14, %v1416_v1 }
 0x454   :  { %v1425_v52 = vsel %vm1422_vm8, %v1424_v49, %v1420_v61  ;;  %v3634_v61 = vld [vmem:[#allocation76_spill] sm:$0xff] }
 0x459   :  { %v1978_v3 = vpop.eup %1977 }
 0x45a   :  { %v1432_v53 = vmul.f32 %v1978_v3, %v1425_v52  ;;  %v3635_v3 = vld [vmem:[#allocation77_spill] sm:$0xff] }
 0x45c   :  { %1434 = vst [vmem:[#allocation16 + $0x28] sm:$0xff] %v1432_v53  ;;  %1458 = vmatmul.f32.vlgmr.msra.gmra.mxu0 %v1432_v53  ;;  %1478 = vmatmul.f32.vlgmr.msra.gmra.mxu1 %v1432_v53 }
 0x45d   :  { %1498 = vmatmul.f32.vlgmr.msra.gmra.mxu2 %v1432_v53  ;;  %1518 = vmatmul.f32.vlgmr.msra.gmra.mxu3 %v1432_v53 }
 0x4d9   :  { %v1459_v31 = vpop.f32.mrf.mxu0  ;;  %v1479_v59 = vpop.f32.mrf.mxu1 }
 0x4da   :  { %v1522_v48 = vadd.f32 %v1459_v31, %v3630_v55  ;;  %v1523_v56 = vadd.f32 %v1479_v59, %v3631_v39  ;;  %v3636_v55 = vld [vmem:[#allocation78_spill] sm:$0xff] }
 0x4dc   :  { %v1864_v0 = vmul.f32 -1.442695, %v1522_v48  ;;  %v1865_v13 = vmul.f32 -1.442695, %v1523_v56 }
 0x4de   :  { %1979 = vpow2.f32 %v1864_v0 }
 0x4df   :  { %1981 = vpow2.f32 %v1865_v13 }
 0x4e0   :  { %v1499_v62 = vpop.f32.mrf.mxu2  ;;  %v1519_v54 = vpop.f32.mrf.mxu3 }
 0x4e1   :  { %v1524_v50 = vadd.f32 %v1499_v62, %v3632_v51  ;;  %v1525_v18 = vadd.f32 %v1519_v54, %v3633_v17 }
 0x4e3   :  { %v1866_v60 = vmul.f32 -1.442695, %v1524_v50 }
 0x4e4   :  { %v1980_v58 = vpop.eup %1979 }
 0x4e5   :  { %v1982_v63 = vpop.eup %1981  ;;  %v1535_v8 = vadd.f32 1.0, %v1980_v58  ;;  %1983 = vpow2.f32 %v1866_v60 }
 0x4e6   :  { %v1536_v2 = vadd.f32 1.0, %v1982_v63  ;;  %v3637_v63 = vld [vmem:[#allocation79_spill] sm:$0xff] }
 0x4e7   :  { %1985 = vrcp.f32 %v1535_v8  ;;  %v1549_v10 = vand.u32 2147483648, %v1535_v8  ;;  %v1547_v27 = vand.u32 2147483647, %v1535_v8  ;;  %vm1543_vm11 = vweird.f32 %v1535_v8 }
 0x4e8   :  { %1987 = vrcp.f32 %v1536_v2  ;;  %v1564_v12 = vand.u32 2147483648, %v1536_v2  ;;  %v1562_v23 = vand.u32 2147483647, %v1536_v2  ;;  %vm1558_vm12 = vweird.f32 %v1536_v2 }
 0x4e9   :  { %v1550_v9 = vor.u32 1.1754944e-38, %v1549_v10  ;;  %vm1548_vm15 = vcmp.eq.f32.partialorder %v1547_v27, 8.507059e+37 }
 0x4ea   :  { %v1565_v21 = vor.u32 1.1754944e-38, %v1564_v12  ;;  %vm1563_vm0 = vcmp.eq.f32.partialorder %v1562_v23, 8.507059e+37 }
 0x4eb   :  { %v1984_v5 = vpop.eup %1983 }
 0x4ec   :  { %v1537_v6 = vadd.f32 1.0, %v1984_v5 }
 0x4ed   :  { %v1986_v33 = vpop.eup %1985 }
 0x4ee   :  { %v1988_v11 = vpop.eup %1987  ;;  %v1539_v32 = vmul.f32 %v1986_v33, %v1535_v8  ;;  %1989 = vrcp.f32 %v1537_v6  ;;  %vm1544_vm9 = vweird.f32 %v1986_v33  ;;  %v1579_v42 = vand.u32 2147483648, %v1537_v6 }
 0x4ef   :  { %v1554_v20 = vmul.f32 %v1988_v11, %v1536_v2  ;;  %1991 = vtanh.f32 %v1525_v18  ;;  %vm1559_vm10 = vweird.f32 %v1988_v11  ;;  %vm1545_vm13 = vmor %vm1543_vm11, %vm1544_vm9  ;;  %vm1573_vm2 = vweird.f32 %v1537_v6 }
 0x4f0   :  { %v1540_v16 = vsub.f32 1.0, %v1539_v32  ;;  %vm1560_vm14 = vmor %vm1558_vm12, %vm1559_vm10  ;;  %v1577_v43 = vand.u32 2147483647, %v1537_v6  ;;  %v1580_v45 = vor.u32 1.1754944e-38, %v1579_v42 }
 0x4f1   :  { %v1555_v34 = vsub.f32 1.0, %v1554_v20 }
 0x4f2   :  { %v1541_v30 = vmul.f32 %v1986_v33, %v1540_v16  ;;  %vm1578_vm4 = vcmp.eq.f32.partialorder %v1577_v43, 8.507059e+37 }
 0x4f3   :  { %v1556_v25 = vmul.f32 %v1988_v11, %v1555_v34 }
 0x4f4   :  { %v1990_v29 = vpop.eup %1989  ;;  %v1542_v15 = vadd.f32 %v1986_v33, %v1541_v30 }
 0x4f5   :  { %v1569_v35 = vmul.f32 %v1990_v29, %v1537_v6  ;;  %v1557_v19 = vadd.f32 %v1988_v11, %v1556_v25  ;;  %v1992_v14 = vpop.eup %1991  ;;  %vm1574_vm1 = vweird.f32 %v1990_v29 }
 0x4f6   :  { %v1546_v22 = vsel %vm1545_vm13, %v1986_v33, %v1542_v15  ;;  %vm1575_vm3 = vmor %vm1573_vm2, %vm1574_vm1 }
 0x4f7   :  { %v1570_v24 = vsub.f32 1.0, %v1569_v35  ;;  %v1551_v28 = vsel %vm1548_vm15, %v1550_v9, %v1546_v22  ;;  %v1561_v7 = vsel %vm1560_vm14, %v1988_v11, %v1557_v19 }
 0x4f8   :  { %v1566_v26 = vsel %vm1563_vm0, %v1565_v21, %v1561_v7  ;;  %v1585_v36 = vmul.f32 %v1992_v14, %v1551_v28 }
 0x4f9   :  { %v1571_v37 = vmul.f32 %v1990_v29, %v1570_v24  ;;  %v1584_v38 = vmul.f32 %v1566_v26, %v3304_v47 }
 0x4fb   :  { %v3312_v40 = vadd.f32 %v1585_v36, %v1584_v38  ;;  %v1572_v41 = vadd.f32 %v1990_v29, %v1571_v37 }
 0x4fd   :  { %1993 = vtanh.f32 %v3312_v40  ;;  %v1576_v44 = vsel %vm1575_vm3, %v1990_v29, %v1572_v41 }
 0x4fe   :  { %v1581_v1 = vsel %vm1578_vm4, %v1580_v45, %v1576_v44 }
 0x503   :  { %v1994_v46 = vpop.eup %1993 }
 0x504   :  { %v1588_v4 = vmul.f32 %v1994_v46, %v1581_v1 }
 0x506   :  { %1590 = vst [vmem:[#allocation16 + $0x30] sm:$0xff] %v1588_v4  ;;  %1614 = vmatmul.f32.vlgmr.msrb.gmra.mxu0 %v1588_v4  ;;  %1634 = vmatmul.f32.vlgmr.msrb.gmra.mxu1 %v1588_v4 }
 0x507   :  { %1654 = vmatmul.f32.vlgmr.msrb.gmra.mxu2 %v1588_v4  ;;  %1674 = vmatmul.f32.vlgmr.msrb.gmra.mxu3 %v1588_v4 }
 0x583   :  { %v1615_v47 = vpop.f32.mrf.mxu0  ;;  %v1635_v57 = vpop.f32.mrf.mxu1 }
 0x584   :  { %v1678_v49 = vadd.f32 %v1615_v47, %v3634_v61  ;;  %v1679_v52 = vadd.f32 %v1635_v57, %v3635_v3 }
 0x586   :  { %v1867_v53 = vmul.f32 -1.442695, %v1678_v49  ;;  %v1868_v31 = vmul.f32 -1.442695, %v1679_v52 }
 0x588   :  { %1995 = vpow2.f32 %v1867_v53 }
 0x589   :  { %1997 = vpow2.f32 %v1868_v31 }
 0x58a   :  { %v1655_v59 = vpop.f32.mrf.mxu2  ;;  %v1675_v51 = vpop.f32.mrf.mxu3 }
 0x58b   :  { %v1680_v48 = vadd.f32 %v1655_v59, %v3636_v55  ;;  %v1681_v8 = vadd.f32 %v1675_v51, %v3637_v63 }
 0x58d   :  { %v1869_v39 = vmul.f32 -1.442695, %v1680_v48 }
 0x58e   :  { %v1996_v56 = vpop.eup %1995 }
 0x58f   :  { %v1998_v0 = vpop.eup %1997  ;;  %v1691_v13 = vadd.f32 1.0, %v1996_v56  ;;  %1999 = vpow2.f32 %v1869_v39 }
 0x590   :  { %v1692_v62 = vadd.f32 1.0, %v1998_v0 }
 0x591   :  { %2001 = vrcp.f32 %v1691_v13  ;;  %v1705_v17 = vand.u32 2147483648, %v1691_v13  ;;  %v1703_v32 = vand.u32 2147483647, %v1691_v13  ;;  %vm1699_vm7 = vweird.f32 %v1691_v13 }
 0x592   :  { %2003 = vrcp.f32 %v1692_v62  ;;  %v1720_v18 = vand.u32 2147483648, %v1692_v62  ;;  %v1718_v16 = vand.u32 2147483647, %v1692_v62  ;;  %vm1714_vm8 = vweird.f32 %v1692_v62 }
 0x593   :  { %v1706_v30 = vor.u32 1.1754944e-38, %v1705_v17  ;;  %vm1704_vm11 = vcmp.eq.f32.partialorder %v1703_v32, 8.507059e+37 }
 0x594   :  { %v1721_v25 = vor.u32 1.1754944e-38, %v1720_v18  ;;  %vm1719_vm12 = vcmp.eq.f32.partialorder %v1718_v16, 8.507059e+37 }
 0x595   :  { %v2000_v50 = vpop.eup %1999 }
 0x596   :  { %v1693_v60 = vadd.f32 1.0, %v2000_v50 }
 0x597   :  { %v2002_v58 = vpop.eup %2001 }
 0x598   :  { %v2004_v2 = vpop.eup %2003  ;;  %v1695_v54 = vmul.f32 %v2002_v58, %v1691_v13  ;;  %2005 = vrcp.f32 %v1693_v60  ;;  %vm1700_vm5 = vweird.f32 %v2002_v58  ;;  %v1735_v7 = vand.u32 2147483648, %v1693_v60 }
 0x599   :  { %v1710_v5 = vmul.f32 %v2004_v2, %v1692_v62  ;;  %2007 = vtanh.f32 %v1681_v8  ;;  %vm1715_vm6 = vweird.f32 %v2004_v2  ;;  %vm1701_vm9 = vmor %vm1699_vm7, %vm1700_vm5  ;;  %vm1729_vm14 = vweird.f32 %v1693_v60 }
 0x59a   :  { %v1696_v6 = vsub.f32 1.0, %v1695_v54  ;;  %vm1716_vm10 = vmor %vm1714_vm8, %vm1715_vm6  ;;  %v1733_v26 = vand.u32 2147483647, %v1693_v60  ;;  %v1736_v37 = vor.u32 1.1754944e-38, %v1735_v7 }
 0x59b   :  { %v1711_v33 = vsub.f32 1.0, %v1710_v5 }
 0x59c   :  { %v1697_v11 = vmul.f32 %v2002_v58, %v1696_v6  ;;  %vm1734_vm0 = vcmp.eq.f32.partialorder %v1733_v26, 8.507059e+37 }
 0x59d   :  { %v1712_v20 = vmul.f32 %v2004_v2, %v1711_v33 }
 0x59e   :  { %v2006_v34 = vpop.eup %2005  ;;  %v1698_v10 = vadd.f32 %v2002_v58, %v1697_v11 }
 0x59f   :  { %v1725_v12 = vmul.f32 %v2006_v34, %v1693_v60  ;;  %v1713_v27 = vadd.f32 %v2004_v2, %v1712_v20  ;;  %v2008_v29 = vpop.eup %2007  ;;  %vm1730_vm13 = vweird.f32 %v2006_v34 }
 0x5a0   :  { %v1702_v23 = vsel %vm1701_vm9, %v2002_v58, %v1698_v10  ;;  %vm1731_vm15 = vmor %vm1729_vm14, %vm1730_vm13 }
 0x5a1   :  { %v1726_v15 = vsub.f32 1.0, %v1725_v12  ;;  %v1707_v35 = vsel %vm1704_vm11, %v1706_v30, %v1702_v23  ;;  %v1717_v9 = vsel %vm1716_vm10, %v2004_v2, %v1713_v27 }
 0x5a2   :  { %v1722_v19 = vsel %vm1719_vm12, %v1721_v25, %v1717_v9  ;;  %v1741_v21 = vmul.f32 %v2008_v29, %v1707_v35 }
 0x5a3   :  { %v1740_v22 = vmul.f32 %v1722_v19, %v3312_v40  ;;  %v1727_v14 = vmul.f32 %v2006_v34, %v1726_v15 }
 0x5a5   :  { %v1742_v24 = vadd.f32 %v1741_v21, %v1740_v22  ;;  %v1728_v28 = vadd.f32 %v2006_v34, %v1727_v14 }
 0x5a7   :  { %2009 = vtanh.f32 %v1742_v24  ;;  %1753 = vst [vmem:[#allocation19] sm:$0xff] %v1742_v24  ;;  %v1732_v36 = vsel %vm1731_vm15, %v2006_v34, %v1728_v28 }
 0x5a8   :  { %v1737_v40 = vsel %vm1734_vm0, %v1736_v37, %v1732_v36 }
 0x5ad   :  { %v2010_v38 = vpop.eup %2009 }
 0x5ae   :  { %v1744_v41 = vmul.f32 %v2010_v38, %v1737_v40 }
 0x5b0   :  { %1746 = vst [vmem:[#allocation16 + $0x38] sm:$0xff] %v1744_v41 }
 0x5b1   :  { %1752 = vst [vmem:[#allocation17] sm:$0xff] %v1744_v41  ;;  %1766 = dma.vmem_to_hbm [thread:$0]  %s1759_s5, 1024, %s1761_s15, [#allocation7], %s2306_s22, %s2306_s22, %s2307_s3  }
 0x5b2   :  { %1777 = dma.vmem_to_hbm [thread:$0]  %s1773_s17, 128, %s1775_s19, [#allocation18]  }
 0x5b3   :  { %1788 = dma.vmem_to_hbm [thread:$0]  %s1784_s21, 128, %s1786_s0, [#allocation18]  }
 0x5b4   :  { %2299 = dma.done.wait [#allocation7], 1024  }
 0x5b5   :  { %2300 = vsyncadd [#allocation7], 4294966272 }
 0x5b6   :  { %2301 = dma.done.wait [#allocation18], 256  }
 0x5b7   :  { %2302 = vsyncadd [#allocation18], 4294967040 }
 0x5b8   :  { %1801 = vsyncpa [#allocation6], 1 }
 0x5b9   :  { %1802 = vsyncpa [#allocation9], 1 }
 0x5ba   :  { %1803 = vsyncpa [#allocation12], 1 }
 0x5bb   :  { %1804 = vsyncpa [#allocation15], 1 }
 0x5bc   :  { %1805 = vsyncpa [#allocation7], 1 }
 0x5bd   :  { %1806 = vsyncpa [#allocation18], 1 }

// kernel: tpu_custom_call.1
= control target key start
LH: loop header
LB: loop body
LE: loop exit
PB: predicated region body
PF: predicated region fallthrough
CT: control target
= control target key end

     0   :  { %14 = vsyncpa [#allocation6], 0  ;;  %s3332_s0 = inlined_call_operand.hbm [shape: f32[8,8,8], index: 0, kind: input, shape index: {}]   ;;  %s3333_s1 = inlined_call_operand.hbm [shape: f32[8,512], index: 1, kind: input, shape index: {}]   ;;  %s3334_s2 = inlined_call_operand.hbm [shape: f32[128,512], index: 2, kind: input, shape index: {}]   ;;  %s3335_s3 = inlined_call_operand.hbm [shape: f32[1,512], index: 3, kind: input, shape index: {}]   ;;  %s3336_s4 = inlined_call_operand.hbm [shape: f32[8,128], index: 4, kind: input, shape index: {}]   ;;  %s3337_s5 = inlined_call_operand.hbm [shape: f32[8,128], index: 5, kind: input, shape index: {}]   ;;  %s3338_s6 = inlined_call_operand.hbm [shape: f32[8,8,128], index: 6, kind: output, shape index: {0}]   ;;  %s3339_s7 = inlined_call_operand.hbm [shape: f32[8,128], index: 7, kind: output, shape index: {1}]   ;;  %s3340_s8 = inlined_call_operand.hbm [shape: f32[8,128], index: 8, kind: output, shape index: {2}]  }
   0x1   :  { %15 = vsyncpa [#allocation9], 0 }
   0x2   :  { %16 = vsyncpa [#allocation12], 0 }
   0x3   :  { %17 = vsyncpa [#allocation15], 0 }
   0x4   :  { %18 = vsyncpa [#allocation7], 0  ;;  %s38_s29 = sshll.u32 %s3333_s1, 4  ;;  %s39_s29 = int_to_ptr.hbm [resolvable:$true] %s38_s29 }
   0x5   :  { %19 = vsyncpa [#allocation18], 0  ;;  %s2303_s30 = smov [#allocation8]   ;;  %s62_s12 = sshll.u32 %s3335_s3, 4  ;;  %s63_s12 = int_to_ptr.hbm [resolvable:$true] %s62_s12 }
   0x6   :  { %s40_s9 = sshll.u32 %s2303_s30, 4  ;;  %s2304_s13 = smov [#allocation11]   ;;  %s41_s9 = int_to_ptr.vmem [resolvable:$true] %s40_s9 }
   0x7   :  { %43 = dma.hbm_to_vmem [thread:$0]  %s39_s29, 512, %s41_s9, [#allocation9]  }
   0x8   :  { %s64_s14 = sshll.u32 %s2304_s13, 4  ;;  %s24_s17 = sshll.u32 %s3332_s0, 4  ;;  %s65_s14 = int_to_ptr.vmem [resolvable:$true] %s64_s14  ;;  %s25_s17 = int_to_ptr.hbm [resolvable:$true] %s24_s17 }
   0x9   :  { %67 = dma.hbm_to_vmem [thread:$0]  %s63_s12, 64, %s65_s14, [#allocation12]  }
   0xa   :  { %s2305_s1 = smov [#allocation5]   ;;  %s48_s21 = sshll.u32 %s3334_s2, 4  ;;  %s49_s21 = int_to_ptr.hbm [resolvable:$true] %s48_s21 }
   0xb   :  { %s26_s18 = sshll.u32 %s2305_s1, 4  ;;  %s2306_s22 = smov 128   ;;  %s27_s18 = int_to_ptr.vmem [resolvable:$true] %s26_s18 }
   0xc   :  { %s2307_s3 = smov 8   ;;  %s2308_s23 = smov [#allocation10]  }
   0xd   :  { %32 = dma.hbm_to_vmem [thread:$0]  %s25_s17, 1024, %s27_s18, [#allocation6], %s2306_s22, %s2306_s22, %s2307_s3  }
   0xe   :  { %s50_s24 = sshll.u32 %s2308_s23, 4  ;;  %s2309_s0 = smov 512   ;;  %s51_s24 = int_to_ptr.vmem [resolvable:$true] %s50_s24 }
   0xf   :  { %s2310_s25 = smov 32   ;;  %s73_s28 = sshll.u32 %s3336_s4, 4  ;;  %s74_s28 = int_to_ptr.hbm [resolvable:$true] %s73_s28 }
  0x10   :  { %56 = dma.hbm_to_vmem [thread:$0]  %s49_s21, 8192, %s51_s24, [#allocation9], %s2309_s0, %s2309_s0, %s2310_s25  }
  0x11   :  { %s2311_s29 = smov [#allocation13]   ;;  %s84_s10 = sshll.u32 %s3337_s5, 4  ;;  %s85_s10 = int_to_ptr.hbm [resolvable:$true] %s84_s10 }
  0x12   :  { %s75_s2 = sshll.u32 %s2311_s29, 4  ;;  %s2312_s11 = smov [#allocation14]   ;;  %s76_s2 = int_to_ptr.vmem [resolvable:$true] %s75_s2 }
  0x13   :  { %78 = dma.hbm_to_vmem [thread:$0]  %s74_s28, 128, %s76_s2, [#allocation12]  }
  0x14   :  { %s86_s12 = sshll.u32 %s2312_s11, 4  ;;  %s87_s12 = int_to_ptr.vmem [resolvable:$true] %s86_s12 }
  0x15   :  { %89 = dma.hbm_to_vmem [thread:$0]  %s85_s10, 128, %s87_s12, [#allocation15]  }
  0x16   :  { %2291 = dma.done.wait [#allocation6], 1024  }
  0x17   :  { %2292 = vsyncadd [#allocation6], 4294966272 }
  0x18   :  { %2293 = dma.done.wait [#allocation9], 8704  }
  0x19   :  { %2294 = vsyncadd [#allocation9], 4294958592 }
  0x1a   :  { %2295 = dma.done.wait [#allocation12], 192  }
  0x1b   :  { %2296 = vsyncadd [#allocation12], 4294967104 }
  0x1c   :  { %2297 = dma.done.wait [#allocation15], 128  }
  0x1d   :  { %2298 = vsyncadd [#allocation15], 4294967168  ;;  %v123_v0 = vld [vmem:[#allocation8] sm:$0xff]  ;;  %v124_v1 = vld [vmem:[#allocation8 + $0x8] sm:$0xff]  ;;  %vm140_vm0 = vcmask 64512   ;;  %s2313_s4 = smov [#allocation16]  }
  0x1e   :  { %v125_v2 = vld [vmem:[#allocation8 + $0x10] sm:$0xff]  ;;  %168 = vmatpush.msra.mxu0 %v123_v0  ;;  %197 = vmatpush.msra.mxu1 %v124_v1  ;;  %v126_v3 = vld [vmem:[#allocation8 + $0x18] sm:$0xff]  ;;  %v127_v4 = vld [vmem:[#allocation5] sm:$0xff]  ;;  %s1758_s5 = sshll.u32 %s2313_s4, 4  ;;  %s1760_s15 = sshll.u32 %s3338_s6, 4  ;;  %s1759_s5 = int_to_ptr.vmem [resolvable:$true] %s1758_s5  ;;  %s1761_s15 = int_to_ptr.hbm [resolvable:$true] %s1760_s15 }
  0x1f   :  { %226 = vmatpush.msra.mxu2 %v125_v2  ;;  %255 = vmatpush.msra.mxu3 %v126_v3  ;;  %v2386_v5 = vld [vmem:[#allocation10 + $0x1e0] sm:$0xff]  ;;  %v2388_v6 = vld [vmem:[#allocation10 + $0x1e8] sm:$0xff]  ;;  %v2390_v7 = vld [vmem:[#allocation10 + $0x1f0] sm:$0xff]  ;;  %s2314_s16 = smov [#allocation17]   ;;  %s1774_s19 = sshll.u32 %s3339_s7, 4  ;;  %s1775_s19 = int_to_ptr.hbm [resolvable:$true] %s1774_s19 }
  0x20   :  { %1814 = vmatmul.msk.f32.vlgmr.msra.gmra.mxu0 %vm140_vm0, %v127_v4  ;;  %1818 = vmatmul.msk.f32.vlgmr.msra.gmra.mxu1 %vm140_vm0, %v127_v4  ;;  %v2392_v8 = vld [vmem:[#allocation10 + $0x1f8] sm:$0xff]  ;;  %v2394_v9 = vld [vmem:[#allocation10 + $0x1c0] sm:$0xff]  ;;  %v2396_v10 = vld [vmem:[#allocation10 + $0x1c8] sm:$0xff]  ;;  %s1772_s17 = sshll.u32 %s2314_s16, 4  ;;  %s2315_s20 = smov [#allocation19]   ;;  %s1773_s17 = int_to_ptr.vmem [resolvable:$true] %s1772_s17 }
  0x21   :  { %1822 = vmatmul.msk.f32.vlgmr.msra.gmra.mxu2 %vm140_vm0, %v127_v4  ;;  %1826 = vmatmul.msk.f32.vlgmr.msra.gmra.mxu3 %vm140_vm0, %v127_v4  ;;  %3431 = vst [vmem:[#allocation26_spill] sm:$0xff] %v2392_v8  ;;  %v2400_v11 = vld [vmem:[#allocation10 + $0x1d0] sm:$0xff]  ;;  %v2402_v12 = vld [vmem:[#allocation10 + $0x1d8] sm:$0xff]  ;;  %v128_v13 = vld [vmem:[#allocation5 + $0x8] sm:$0xff]  ;;  %s1783_s21 = sshll.u32 %s2315_s20, 4  ;;  %s1785_s0 = sshll.u32 %s3340_s8, 4  ;;  %s1784_s21 = int_to_ptr.vmem [resolvable:$true] %s1783_s21  ;;  %s1786_s0 = int_to_ptr.hbm [resolvable:$true] %s1785_s0 }
  0x22   :  { %317 = vmatpush.msrb.mxu0 %v123_v0  ;;  %346 = vmatpush.msrb.mxu1 %v124_v1  ;;  %v2410_v14 = vld [vmem:[#allocation10 + $0x1a0] sm:$0xff]  ;;  %v2412_v15 = vld [vmem:[#allocation10 + $0x1a8] sm:$0xff]  ;;  %v2416_v16 = vld [vmem:[#allocation10 + $0x1b0] sm:$0xff] }
  0x23   :  { %375 = vmatpush.msrb.mxu2 %v125_v2  ;;  %404 = vmatpush.msrb.mxu3 %v126_v3  ;;  %v2418_v17 = vld [vmem:[#allocation10 + $0x1b8] sm:$0xff]  ;;  %v2422_v18 = vld [vmem:[#allocation10 + $0x180] sm:$0xff]  ;;  %v2424_v19 = vld [vmem:[#allocation10 + $0x188] sm:$0xff] }
  0x24   :  { %507 = vmatpush.msra.mxu0 %v2386_v5  ;;  %527 = vmatpush.msra.mxu1 %v2388_v6  ;;  %v2428_v20 = vld [vmem:[#allocation10 + $0x190] sm:$0xff]  ;;  %v2430_v21 = vld [vmem:[#allocation10 + $0x198] sm:$0xff]  ;;  %v2434_v22 = vld [vmem:[#allocation10 + $0x160] sm:$0xff] }
  0x25   :  { %547 = vmatpush.msra.mxu2 %v2390_v7  ;;  %567 = vmatpush.msra.mxu3 %v2392_v8  ;;  %v2436_v23 = vld [vmem:[#allocation10 + $0x168] sm:$0xff]  ;;  %v2440_v24 = vld [vmem:[#allocation10 + $0x170] sm:$0xff]  ;;  %v2442_v25 = vld [vmem:[#allocation10 + $0x178] sm:$0xff] }
  0x26   :  { %508 = vmatpush.msra.mxu0 %v2394_v9  ;;  %528 = vmatpush.msra.mxu1 %v2396_v10  ;;  %v129_v26 = vld [vmem:[#allocation5 + $0x10] sm:$0xff]  ;;  %v2450_v27 = vld [vmem:[#allocation10 + $0x140] sm:$0xff]  ;;  %v2452_v28 = vld [vmem:[#allocation10 + $0x148] sm:$0xff] }
  0x27   :  { %548 = vmatpush.msra.mxu2 %v2400_v11  ;;  %568 = vmatpush.msra.mxu3 %v2402_v12  ;;  %v2456_v29 = vld [vmem:[#allocation10 + $0x150] sm:$0xff]  ;;  %v2458_v30 = vld [vmem:[#allocation10 + $0x158] sm:$0xff]  ;;  %v2462_v31 = vld [vmem:[#allocation10 + $0x120] sm:$0xff] }
  0x28   :  { %1815 = vmatmul.msk.f32.gmra.mxu0 %vm140_vm0, %v128_v13  ;;  %1819 = vmatmul.msk.f32.gmra.mxu1 %vm140_vm0, %v128_v13  ;;  %v2464_v32 = vld [vmem:[#allocation10 + $0x128] sm:$0xff]  ;;  %v2468_v33 = vld [vmem:[#allocation10 + $0x130] sm:$0xff]  ;;  %v2470_v34 = vld [vmem:[#allocation10 + $0x138] sm:$0xff] }
  0x29   :  { %1823 = vmatmul.msk.f32.gmra.mxu2 %vm140_vm0, %v128_v13  ;;  %1827 = vmatmul.msk.f32.gmra.mxu3 %vm140_vm0, %v128_v13  ;;  %v2474_v35 = vld [vmem:[#allocation10 + $0x100] sm:$0xff]  ;;  %v2476_v36 = vld [vmem:[#allocation10 + $0x108] sm:$0xff]  ;;  %v2480_v37 = vld [vmem:[#allocation10 + $0x110] sm:$0xff] }
  0x2a   :  { %509 = vmatpush.msra.mxu0 %v2410_v14  ;;  %529 = vmatpush.msra.mxu1 %v2412_v15  ;;  %v2482_v38 = vld [vmem:[#allocation10 + $0x118] sm:$0xff]  ;;  %v2490_v40 = vld [vmem:[#allocation10 + $0xe0] sm:$0xff]  ;;  %v2492_v41 = vld [vmem:[#allocation10 + $0xe8] sm:$0xff] }
  0x2b   :  { %549 = vmatpush.msra.mxu2 %v2416_v16  ;;  %569 = vmatpush.msra.mxu3 %v2418_v17  ;;  %v130_v39 = vld [vmem:[#allocation5 + $0x18] sm:$0xff]  ;;  %v2496_v42 = vld [vmem:[#allocation10 + $0xf0] sm:$0xff]  ;;  %v2502_v44 = vld [vmem:[#allocation10 + $0xc0] sm:$0xff] }
  0x2c   :  { %510 = vmatpush.msra.mxu0 %v2422_v18  ;;  %530 = vmatpush.msra.mxu1 %v2424_v19  ;;  %v2498_v43 = vld [vmem:[#allocation10 + $0xf8] sm:$0xff]  ;;  %v2504_v45 = vld [vmem:[#allocation10 + $0xc8] sm:$0xff]  ;;  %v2508_v46 = vld [vmem:[#allocation10 + $0xd0] sm:$0xff] }
  0x2d   :  { %550 = vmatpush.msra.mxu2 %v2428_v20  ;;  %570 = vmatpush.msra.mxu3 %v2430_v21  ;;  %3432 = vst [vmem:[#allocation27_spill] sm:$0xff] %v2508_v46  ;;  %v2510_v47 = vld [vmem:[#allocation10 + $0xd8] sm:$0xff]  ;;  %v2514_v48 = vld [vmem:[#allocation10 + $0xa0] sm:$0xff]  ;;  %v2516_v49 = vld [vmem:[#allocation10 + $0xa8] sm:$0xff] }
  0x2e   :  { %511 = vmatpush.msra.mxu0 %v2434_v22  ;;  %531 = vmatpush.msra.mxu1 %v2436_v23  ;;  %3433 = vst [vmem:[#allocation28_spill] sm:$0xff] %v2510_v47  ;;  %v2520_v50 = vld [vmem:[#allocation10 + $0xb0] sm:$0xff]  ;;  %v2522_v51 = vld [vmem:[#allocation10 + $0xb8] sm:$0xff]  ;;  %v286_v52 = vld [vmem:[#allocation5 + $0x20] sm:$0xff] }
  0x2f   :  { %551 = vmatpush.msra.mxu2 %v2440_v24  ;;  %571 = vmatpush.msra.mxu3 %v2442_v25  ;;  %3434 = vst [vmem:[#allocation29_spill] sm:$0xff] %v2514_v48  ;;  %v2530_v53 = vld [vmem:[#allocation10 + $0x80] sm:$0xff]  ;;  %v2532_v54 = vld [vmem:[#allocation10 + $0x88] sm:$0xff]  ;;  %v2536_v55 = vld [vmem:[#allocation10 + $0x90] sm:$0xff] }
  0x30   :  { %1816 = vmatmul.msk.f32.gmra.mxu0 %vm140_vm0, %v129_v26  ;;  %1820 = vmatmul.msk.f32.gmra.mxu1 %vm140_vm0, %v129_v26  ;;  %3435 = vst [vmem:[#allocation30_spill] sm:$0xff] %v2516_v49  ;;  %v2538_v56 = vld [vmem:[#allocation10 + $0x98] sm:$0xff]  ;;  %v2542_v57 = vld [vmem:[#allocation10 + $0x60] sm:$0xff]  ;;  %v2544_v58 = vld [vmem:[#allocation10 + $0x68] sm:$0xff] }
  0x31   :  { %1824 = vmatmul.msk.f32.gmra.mxu2 %vm140_vm0, %v129_v26  ;;  %1828 = vmatmul.msk.f32.gmra.mxu3 %vm140_vm0, %v129_v26  ;;  %3436 = vst [vmem:[#allocation31_spill] sm:$0xff] %v2520_v50  ;;  %v2548_v59 = vld [vmem:[#allocation10 + $0x70] sm:$0xff]  ;;  %v2550_v60 = vld [vmem:[#allocation10 + $0x78] sm:$0xff]  ;;  %v2554_v61 = vld [vmem:[#allocation10 + $0x40] sm:$0xff] }
  0x32   :  { %512 = vmatpush.msra.mxu0 %v2450_v27  ;;  %532 = vmatpush.msra.mxu1 %v2452_v28  ;;  %3437 = vst [vmem:[#allocation32_spill] sm:$0xff] %v2522_v51  ;;  %v2556_v62 = vld [vmem:[#allocation10 + $0x48] sm:$0xff]  ;;  %v2560_v63 = vld [vmem:[#allocation10 + $0x50] sm:$0xff]  ;;  %v2562_v0 = vld [vmem:[#allocation10 + $0x58] sm:$0xff] }
  0x33   :  { %552 = vmatpush.msra.mxu2 %v2456_v29  ;;  %572 = vmatpush.msra.mxu3 %v2458_v30  ;;  %3438 = vst [vmem:[#allocation33_spill] sm:$0xff] %v2530_v53  ;;  %v287_v1 = vld [vmem:[#allocation5 + $0x28] sm:$0xff]  ;;  %v2570_v2 = vld [vmem:[#allocation10 + $0x20] sm:$0xff]  ;;  %v2576_v4 = vld [vmem:[#allocation10 + $0x30] sm:$0xff] }
  0x34   :  { %513 = vmatpush.msra.mxu0 %v2462_v31  ;;  %533 = vmatpush.msra.mxu1 %v2464_v32  ;;  %3439 = vst [vmem:[#allocation34_spill] sm:$0xff] %v2532_v54  ;;  %v2572_v3 = vld [vmem:[#allocation10 + $0x28] sm:$0xff]  ;;  %v2578_v13 = vld [vmem:[#allocation10 + $0x38] sm:$0xff]  ;;  %v2582_v26 = vld [vmem:[#allocation10] sm:$0xff] }
  0x35   :  { %553 = vmatpush.msra.mxu2 %v2468_v33  ;;  %573 = vmatpush.msra.mxu3 %v2470_v34  ;;  %3440 = vst [vmem:[#allocation35_spill] sm:$0xff] %v2536_v55 }
  0x36   :  { %514 = vmatpush.msra.mxu0 %v2474_v35  ;;  %534 = vmatpush.msra.mxu1 %v2476_v36  ;;  %3441 = vst [vmem:[#allocation36_spill] sm:$0xff] %v2538_v56 }
  0x37   :  { %554 = vmatpush.msra.mxu2 %v2480_v37  ;;  %574 = vmatpush.msra.mxu3 %v2482_v38  ;;  %3442 = vst [vmem:[#allocation37_spill] sm:$0xff] %v2542_v57 }
  0x38   :  { %1817 = vmatmul.msk.f32.gmra.mxu0 %vm140_vm0, %v130_v39  ;;  %1821 = vmatmul.msk.f32.gmra.mxu1 %vm140_vm0, %v130_v39  ;;  %3443 = vst [vmem:[#allocation38_spill] sm:$0xff] %v2544_v58 }
  0x39   :  { %1825 = vmatmul.msk.f32.gmra.mxu2 %vm140_vm0, %v130_v39  ;;  %1829 = vmatmul.msk.f32.gmra.mxu3 %vm140_vm0, %v130_v39  ;;  %3444 = vst [vmem:[#allocation39_spill] sm:$0xff] %v2548_v59  ;;  %v2584_v39 = vld [vmem:[#allocation10 + $0x8] sm:$0xff] }
  0x3a   :  { %515 = vmatpush.msra.mxu0 %v2490_v40  ;;  %535 = vmatpush.msra.mxu1 %v2492_v41  ;;  %3445 = vst [vmem:[#allocation40_spill] sm:$0xff] %v2550_v60 }
  0x3b   :  { %555 = vmatpush.msra.mxu2 %v2496_v42  ;;  %575 = vmatpush.msra.mxu3 %v2498_v43  ;;  %3446 = vst [vmem:[#allocation41_spill] sm:$0xff] %v2554_v61 }
  0x3c   :  { %516 = vmatpush.msra.mxu0 %v2502_v44  ;;  %536 = vmatpush.msra.mxu1 %v2504_v45  ;;  %3447 = vst [vmem:[#allocation42_spill] sm:$0xff] %v2556_v62 }
  0x3d   :  { %556 = vmatpush.msra.mxu2 %v2508_v46  ;;  %576 = vmatpush.msra.mxu3 %v2510_v47  ;;  %3448 = vst [vmem:[#allocation43_spill] sm:$0xff] %v2560_v63 }
  0x3e   :  { %517 = vmatpush.msra.mxu0 %v2514_v48  ;;  %537 = vmatpush.msra.mxu1 %v2516_v49  ;;  %3449 = vst [vmem:[#allocation44_spill] sm:$0xff] %v2562_v0 }
  0x3f   :  { %557 = vmatpush.msra.mxu2 %v2520_v50  ;;  %577 = vmatpush.msra.mxu3 %v2522_v51  ;;  %3450 = vst [vmem:[#allocation45_spill] sm:$0xff] %v2570_v2 }
  0x40   :  { %1830 = vmatmul.msk.f32.vlgmr.msrb.gmra.mxu0 %vm140_vm0, %v286_v52  ;;  %1834 = vmatmul.msk.f32.vlgmr.msrb.gmra.mxu1 %vm140_vm0, %v286_v52  ;;  %3451 = vst [vmem:[#allocation46_spill] sm:$0xff] %v2572_v3 }
  0x41   :  { %1838 = vmatmul.msk.f32.vlgmr.msrb.gmra.mxu2 %vm140_vm0, %v286_v52  ;;  %1842 = vmatmul.msk.f32.vlgmr.msrb.gmra.mxu3 %vm140_vm0, %v286_v52  ;;  %3452 = vst [vmem:[#allocation47_spill] sm:$0xff] %v2576_v4  ;;  %v2588_v52 = vld [vmem:[#allocation10 + $0x10] sm:$0xff] }
  0x42   :  { %518 = vmatpush.msra.mxu0 %v2530_v53  ;;  %538 = vmatpush.msra.mxu1 %v2532_v54  ;;  %3453 = vst [vmem:[#allocation48_spill] sm:$0xff] %v2578_v13 }
  0x43   :  { %558 = vmatpush.msra.mxu2 %v2536_v55  ;;  %578 = vmatpush.msra.mxu3 %v2538_v56  ;;  %3454 = vst [vmem:[#allocation49_spill] sm:$0xff] %v2582_v26 }
  0x44   :  { %519 = vmatpush.msra.mxu0 %v2542_v57  ;;  %539 = vmatpush.msra.mxu1 %v2544_v58  ;;  %3455 = vst [vmem:[#allocation50_spill] sm:$0xff] %v2584_v39 }
  0x45   :  { %559 = vmatpush.msra.mxu2 %v2548_v59  ;;  %579 = vmatpush.msra.mxu3 %v2550_v60  ;;  %3456 = vst [vmem:[#allocation51_spill] sm:$0xff] %v2588_v52 }
  0x46   :  { %520 = vmatpush.msra.mxu0 %v2554_v61  ;;  %540 = vmatpush.msra.mxu1 %v2556_v62 }
  0x47   :  { %560 = vmatpush.msra.mxu2 %v2560_v63  ;;  %580 = vmatpush.msra.mxu3 %v2562_v0  ;;  %v2590_v0 = vld [vmem:[#allocation10 + $0x18] sm:$0xff] }
  0x48   :  { %1831 = vmatmul.msk.f32.gmra.mxu0 %vm140_vm0, %v287_v1  ;;  %1835 = vmatmul.msk.f32.gmra.mxu1 %vm140_vm0, %v287_v1  ;;  %3457 = vst [vmem:[#allocation52_spill] sm:$0xff] %v2590_v0 }
  0x49   :  { %1839 = vmatmul.msk.f32.gmra.mxu2 %vm140_vm0, %v287_v1  ;;  %1843 = vmatmul.msk.f32.gmra.mxu3 %vm140_vm0, %v287_v1  ;;  %v288_v1 = vld [vmem:[#allocation5 + $0x30] sm:$0xff] }
  0x4a   :  { %521 = vmatpush.msra.mxu0 %v2570_v2  ;;  %541 = vmatpush.msra.mxu1 %v2572_v3 }
  0x4b   :  { %561 = vmatpush.msra.mxu2 %v2576_v4  ;;  %581 = vmatpush.msra.mxu3 %v2578_v13 }
  0x4c   :  { %522 = vmatpush.msra.mxu0 %v2582_v26  ;;  %542 = vmatpush.msra.mxu1 %v2584_v39 }
  0x4d   :  { %562 = vmatpush.msra.mxu2 %v2588_v52  ;;  %582 = vmatpush.msra.mxu3 %v2590_v0 }
  0x4e   :  { %662 = vmatpush.msrb.mxu0 %v2386_v5  ;;  %682 = vmatpush.msrb.mxu1 %v2388_v6 }
  0x4f   :  { %702 = vmatpush.msrb.mxu2 %v2390_v7  ;;  %722 = vmatpush.msrb.mxu3 %v2392_v8  ;;  %v289_v8 = vld [vmem:[#allocation5 + $0x38] sm:$0xff] }
  0x50   :  { %1832 = vmatmul.msk.f32.gmra.mxu0 %vm140_vm0, %v288_v1  ;;  %1836 = vmatmul.msk.f32.gmra.mxu1 %vm140_vm0, %v288_v1 }
  0x51   :  { %1840 = vmatmul.msk.f32.gmra.mxu2 %vm140_vm0, %v288_v1  ;;  %1844 = vmatmul.msk.f32.gmra.mxu3 %vm140_vm0, %v288_v1  ;;  %v118_v1 = vld [vmem:[#allocation13] sm:$0xff] }
  0x52   :  { %663 = vmatpush.msrb.mxu0 %v2394_v9  ;;  %683 = vmatpush.msrb.mxu1 %v2396_v10 }
  0x53   :  { %703 = vmatpush.msrb.mxu2 %v2400_v11  ;;  %723 = vmatpush.msrb.mxu3 %v2402_v12 }
  0x54   :  { %664 = vmatpush.msrb.mxu0 %v2410_v14  ;;  %684 = vmatpush.msrb.mxu1 %v2412_v15 }
  0x55   :  { %704 = vmatpush.msrb.mxu2 %v2416_v16  ;;  %724 = vmatpush.msrb.mxu3 %v2418_v17 }
  0x56   :  { %665 = vmatpush.msrb.mxu0 %v2422_v18  ;;  %685 = vmatpush.msrb.mxu1 %v2424_v19 }
  0x57   :  { %705 = vmatpush.msrb.mxu2 %v2428_v20  ;;  %725 = vmatpush.msrb.mxu3 %v2430_v21 }
  0x58   :  { %1833 = vmatmul.msk.f32.gmra.mxu0 %vm140_vm0, %v289_v8  ;;  %1837 = vmatmul.msk.f32.gmra.mxu1 %vm140_vm0, %v289_v8 }
  0x59   :  { %1841 = vmatmul.msk.f32.gmra.mxu2 %vm140_vm0, %v289_v8  ;;  %1845 = vmatmul.msk.f32.gmra.mxu3 %vm140_vm0, %v289_v8  ;;  %v3458_v8 = vld [vmem:[#allocation44_spill] sm:$0xff] }
  0x5a   :  { %666 = vmatpush.msrb.mxu0 %v2434_v22  ;;  %686 = vmatpush.msrb.mxu1 %v2436_v23 }
  0x5b   :  { %706 = vmatpush.msrb.mxu2 %v2440_v24  ;;  %726 = vmatpush.msrb.mxu3 %v2442_v25 }
  0x5c   :  { %667 = vmatpush.msrb.mxu0 %v2450_v27  ;;  %687 = vmatpush.msrb.mxu1 %v2452_v28 }
  0x5d   :  { %707 = vmatpush.msrb.mxu2 %v2456_v29  ;;  %727 = vmatpush.msrb.mxu3 %v2458_v30 }
  0x5e   :  { %668 = vmatpush.msrb.mxu0 %v2462_v31  ;;  %688 = vmatpush.msrb.mxu1 %v2464_v32 }
  0x5f   :  { %708 = vmatpush.msrb.mxu2 %v2468_v33  ;;  %728 = vmatpush.msrb.mxu3 %v2470_v34 }
  0x60   :  { %523 = vmatmul.f32.vlgmr.msra.gmra.mxu0 %v118_v1  ;;  %543 = vmatmul.f32.vlgmr.msra.gmra.mxu1 %v118_v1 }
  0x61   :  { %563 = vmatmul.f32.vlgmr.msra.gmra.mxu2 %v118_v1  ;;  %583 = vmatmul.f32.vlgmr.msra.gmra.mxu3 %v118_v1  ;;  %v3459_v1 = vld [vmem:[#allocation26_spill] sm:$0xff] }
  0x62   :  { %669 = vmatpush.msrb.mxu0 %v2474_v35  ;;  %689 = vmatpush.msrb.mxu1 %v2476_v36 }
  0x63   :  { %709 = vmatpush.msrb.mxu2 %v2480_v37  ;;  %729 = vmatpush.msrb.mxu3 %v2482_v38 }
  0x64   :  { %670 = vmatpush.msrb.mxu0 %v2490_v40  ;;  %690 = vmatpush.msrb.mxu1 %v2492_v41 }
  0x65   :  { %710 = vmatpush.msrb.mxu2 %v2496_v42  ;;  %730 = vmatpush.msrb.mxu3 %v2498_v43 }
  0x66   :  { %671 = vmatpush.msrb.mxu0 %v2502_v44  ;;  %691 = vmatpush.msrb.mxu1 %v2504_v45 }
  0x67   :  { %711 = vmatpush.msrb.mxu2 %v2508_v46  ;;  %731 = vmatpush.msrb.mxu3 %v2510_v47 }
  0x68   :  { %672 = vmatpush.msrb.mxu0 %v2514_v48  ;;  %692 = vmatpush.msrb.mxu1 %v2516_v49 }
  0x69   :  { %712 = vmatpush.msrb.mxu2 %v2520_v50  ;;  %732 = vmatpush.msrb.mxu3 %v2522_v51 }
  0x6a   :  { %673 = vmatpush.msrb.mxu0 %v2530_v53  ;;  %693 = vmatpush.msrb.mxu1 %v2532_v54 }
  0x6b   :  { %713 = vmatpush.msrb.mxu2 %v2536_v55  ;;  %733 = vmatpush.msrb.mxu3 %v2538_v56 }
  0x6c   :  { %674 = vmatpush.msrb.mxu0 %v2542_v57  ;;  %694 = vmatpush.msrb.mxu1 %v2544_v58 }
  0x6d   :  { %714 = vmatpush.msrb.mxu2 %v2548_v59  ;;  %734 = vmatpush.msrb.mxu3 %v2550_v60 }
  0x6e   :  { %675 = vmatpush.msrb.mxu0 %v2554_v61  ;;  %695 = vmatpush.msrb.mxu1 %v2556_v62 }
  0x6f   :  { %715 = vmatpush.msrb.mxu2 %v2560_v63  ;;  %735 = vmatpush.msrb.mxu3 %v3458_v8 }
  0x70   :  { %676 = vmatpush.msrb.mxu0 %v2570_v2  ;;  %696 = vmatpush.msrb.mxu1 %v2572_v3 }
  0x71   :  { %716 = vmatpush.msrb.mxu2 %v2576_v4  ;;  %736 = vmatpush.msrb.mxu3 %v2578_v13 }
  0x72   :  { %677 = vmatpush.msrb.mxu0 %v2582_v26  ;;  %697 = vmatpush.msrb.mxu1 %v2584_v39 }
  0x73   :  { %717 = vmatpush.msrb.mxu2 %v2588_v52  ;;  %737 = vmatpush.msrb.mxu3 %v2590_v0 }
  0x74   :  { %818 = vmatpush.msra.mxu0 %v2386_v5  ;;  %838 = vmatpush.msra.mxu1 %v2388_v6 }
  0x75   :  { %858 = vmatpush.msra.mxu2 %v2390_v7  ;;  %878 = vmatpush.msra.mxu3 %v3459_v1 }
  0x76   :  { %819 = vmatpush.msra.mxu0 %v2394_v9  ;;  %839 = vmatpush.msra.mxu1 %v2396_v10 }
  0x77   :  { %859 = vmatpush.msra.mxu2 %v2400_v11  ;;  %879 = vmatpush.msra.mxu3 %v2402_v12 }
  0x78   :  { %820 = vmatpush.msra.mxu0 %v2410_v14  ;;  %840 = vmatpush.msra.mxu1 %v2412_v15 }
  0x79   :  { %860 = vmatpush.msra.mxu2 %v2416_v16  ;;  %880 = vmatpush.msra.mxu3 %v2418_v17 }
  0x7a   :  { %821 = vmatpush.msra.mxu0 %v2422_v18  ;;  %841 = vmatpush.msra.mxu1 %v2424_v19 }
  0x7b   :  { %861 = vmatpush.msra.mxu2 %v2428_v20  ;;  %881 = vmatpush.msra.mxu3 %v2430_v21 }
  0x7c   :  { %822 = vmatpush.msra.mxu0 %v2434_v22  ;;  %842 = vmatpush.msra.mxu1 %v2436_v23 }
  0x7d   :  { %862 = vmatpush.msra.mxu2 %v2440_v24  ;;  %882 = vmatpush.msra.mxu3 %v2442_v25 }
  0x7e   :  { %823 = vmatpush.msra.mxu0 %v2450_v27  ;;  %843 = vmatpush.msra.mxu1 %v2452_v28 }
  0x7f   :  { %863 = vmatpush.msra.mxu2 %v2456_v29  ;;  %883 = vmatpush.msra.mxu3 %v2458_v30 }
  0x80   :  { %824 = vmatpush.msra.mxu0 %v2462_v31  ;;  %844 = vmatpush.msra.mxu1 %v2464_v32 }
  0x81   :  { %864 = vmatpush.msra.mxu2 %v2468_v33  ;;  %884 = vmatpush.msra.mxu3 %v2470_v34 }
  0x82   :  { %825 = vmatpush.msra.mxu0 %v2474_v35  ;;  %845 = vmatpush.msra.mxu1 %v2476_v36 }
  0x83   :  { %865 = vmatpush.msra.mxu2 %v2480_v37  ;;  %885 = vmatpush.msra.mxu3 %v2482_v38 }
  0x84   :  { %826 = vmatpush.msra.mxu0 %v2490_v40  ;;  %846 = vmatpush.msra.mxu1 %v2492_v41 }
  0x85   :  { %866 = vmatpush.msra.mxu2 %v2496_v42  ;;  %886 = vmatpush.msra.mxu3 %v2498_v43 }
  0x86   :  { %827 = vmatpush.msra.mxu0 %v2502_v44  ;;  %847 = vmatpush.msra.mxu1 %v2504_v45 }
  0x87   :  { %867 = vmatpush.msra.mxu2 %v2508_v46  ;;  %887 = vmatpush.msra.mxu3 %v2510_v47 }
  0x88   :  { %828 = vmatpush.msra.mxu0 %v2514_v48  ;;  %848 = vmatpush.msra.mxu1 %v2516_v49 }
  0x89   :  { %868 = vmatpush.msra.mxu2 %v2520_v50  ;;  %888 = vmatpush.msra.mxu3 %v2522_v51 }
  0x8a   :  { %829 = vmatpush.msra.mxu0 %v2530_v53  ;;  %849 = vmatpush.msra.mxu1 %v2532_v54 }
  0x8b   :  { %869 = vmatpush.msra.mxu2 %v2536_v55  ;;  %889 = vmatpush.msra.mxu3 %v2538_v56 }
  0x8c   :  { %830 = vmatpush.msra.mxu0 %v2542_v57  ;;  %850 = vmatpush.msra.mxu1 %v2544_v58 }
  0x8d   :  { %870 = vmatpush.msra.mxu2 %v2548_v59  ;;  %890 = vmatpush.msra.mxu3 %v2550_v60 }
  0x8e   :  { %831 = vmatpush.msra.mxu0 %v2554_v61  ;;  %851 = vmatpush.msra.mxu1 %v2556_v62  ;;  %v122_v61 = vld [vmem:[#allocation11] sm:$0xf] }
  0x8f   :  { %871 = vmatpush.msra.mxu2 %v2560_v63  ;;  %891 = vmatpush.msra.mxu3 %v3458_v8  ;;  %v132_v8 = vperm.slane %v122_v61, 0  ;;  %v133_v60 = vperm.slane %v122_v61, 1 }
  0x90   :  { %832 = vmatpush.msra.mxu0 %v2570_v2  ;;  %852 = vmatpush.msra.mxu1 %v2572_v3 }
  0x91   :  { %872 = vmatpush.msra.mxu2 %v2576_v4  ;;  %892 = vmatpush.msra.mxu3 %v2578_v13 }
  0x92   :  { %833 = vmatpush.msra.mxu0 %v2582_v26  ;;  %853 = vmatpush.msra.mxu1 %v2584_v39  ;;  %v2742_v39 = vperm.slane %v122_v61, 2 }
  0x93   :  { %873 = vmatpush.msra.mxu2 %v2588_v52  ;;  %893 = vmatpush.msra.mxu3 %v2590_v0  ;;  %v2744_v52 = vperm.slane %v122_v61, 3 }
  0x9d   :  { %v170_v62 = vpop.f32.mrf.mxu0  ;;  %v199_v63 = vpop.f32.mrf.mxu1 }
  0xa4   :  { %v2734_v2 = vpop.f32.mrf.mxu2  ;;  %v2736_v3 = vpop.f32.mrf.mxu3 }
  0xa5   :  { %v173_v4 = vpop.f32.mrf.mxu0  ;;  %v202_v59 = vpop.f32.mrf.mxu1 }
  0xa6   :  { %v2738_v13 = vadd.f32 %v173_v4, %v132_v8  ;;  %v2740_v26 = vadd.f32 %v202_v59, %v133_v60 }
  0xa8   :  { %3460 = vst [vmem:[#allocation26_spill] sm:$0xff] %v2738_v13 }
  0xa9   :  { %3461 = vst [vmem:[#allocation53_spill] sm:$0xff] %v2740_v26 }
  0xac   :  { %v231_v0 = vpop.f32.mrf.mxu2  ;;  %v260_v58 = vpop.f32.mrf.mxu3 }
  0xad   :  { %v2747_v57 = vadd.f32 %v231_v0, %v2742_v39  ;;  %v2750_v56 = vadd.f32 %v260_v58, %v2744_v52  ;;  %v176_v55 = vpop.f32.mrf.mxu0  ;;  %v205_v54 = vpop.f32.mrf.mxu1 }
  0xae   :  { %v2752_v53 = vadd.f32 %v176_v55, %v132_v8  ;;  %v2754_v4 = vadd.f32 %v205_v54, %v133_v60 }
  0xaf   :  { %3462 = vst [vmem:[#allocation54_spill] sm:$0xff] %v2747_v57 }
  0xb0   :  { %3463 = vst [vmem:[#allocation55_spill] sm:$0xff] %v2750_v56 }
  0xb1   :  { %3464 = vst [vmem:[#allocation56_spill] sm:$0xff] %v2752_v53 }
  0xb2   :  { %3465 = vst [vmem:[#allocation57_spill] sm:$0xff] %v2754_v4 }
  0xb4   :  { %v234_v59 = vpop.f32.mrf.mxu2  ;;  %v263_v26 = vpop.f32.mrf.mxu3 }
  0xb5   :  { %v2757_v13 = vadd.f32 %v234_v59, %v2742_v39  ;;  %v2760_v61 = vadd.f32 %v263_v26, %v2744_v52  ;;  %v179_v51 = vpop.f32.mrf.mxu0  ;;  %v208_v0 = vpop.f32.mrf.mxu1 }
  0xb6   :  { %v2762_v57 = vadd.f32 %v179_v51, %v132_v8  ;;  %v2764_v58 = vadd.f32 %v208_v0, %v133_v60 }
  0xb7   :  { %3466 = vst [vmem:[#allocation58_spill] sm:$0xff] %v2757_v13 }
  0xb8   :  { %3467 = vst [vmem:[#allocation59_spill] sm:$0xff] %v2760_v61 }
  0xb9   :  { %3468 = vst [vmem:[#allocation60_spill] sm:$0xff] %v2762_v57 }
  0xba   :  { %3469 = vst [vmem:[#allocation61_spill] sm:$0xff] %v2764_v58 }
  0xbc   :  { %v237_v56 = vpop.f32.mrf.mxu2  ;;  %v266_v50 = vpop.f32.mrf.mxu3 }
  0xbd   :  { %v2767_v55 = vadd.f32 %v237_v56, %v2742_v39  ;;  %v2770_v54 = vadd.f32 %v266_v50, %v2744_v52  ;;  %v319_v4 = vpop.f32.mrf.mxu0  ;;  %v348_v59 = vpop.f32.mrf.mxu1 }
  0xbe   :  { %v2772_v13 = vadd.f32 %v319_v4, %v132_v8  ;;  %v2774_v26 = vadd.f32 %v348_v59, %v133_v60 }
  0xbf   :  { %3470 = vst [vmem:[#allocation62_spill] sm:$0xff] %v2767_v55 }
  0xc0   :  { %3471 = vst [vmem:[#allocation63_spill] sm:$0xff] %v2770_v54 }
  0xc1   :  { %3472 = vst [vmem:[#allocation64_spill] sm:$0xff] %v2772_v13 }
  0xc2   :  { %3473 = vst [vmem:[#allocation65_spill] sm:$0xff] %v2774_v26 }
  0xc4   :  { %v377_v61 = vpop.f32.mrf.mxu2  ;;  %v406_v53 = vpop.f32.mrf.mxu3 }
  0xc5   :  { %v2777_v51 = vadd.f32 %v377_v61, %v2742_v39  ;;  %v2780_v0 = vadd.f32 %v406_v53, %v2744_v52  ;;  %v322_v58 = vpop.f32.mrf.mxu0  ;;  %v351_v56 = vpop.f32.mrf.mxu1 }
  0xc6   :  { %v2782_v55 = vadd.f32 %v322_v58, %v132_v8  ;;  %v2784_v50 = vadd.f32 %v351_v56, %v133_v60 }
  0xc7   :  { %3474 = vst [vmem:[#allocation66_spill] sm:$0xff] %v2777_v51 }
  0xc8   :  { %3475 = vst [vmem:[#allocation67_spill] sm:$0xff] %v2780_v0 }
  0xc9   :  { %3476 = vst [vmem:[#allocation68_spill] sm:$0xff] %v2782_v55  ;;  %v200_v55 = vadd.f32 %v199_v63, %v133_v60 }
  0xca   :  { %3477 = vst [vmem:[#allocation69_spill] sm:$0xff] %v2784_v50 }
  0xcc   :  { %v380_v54 = vpop.f32.mrf.mxu2  ;;  %v409_v57 = vpop.f32.mrf.mxu3 }
  0xcd   :  { %v2787_v4 = vadd.f32 %v380_v54, %v2742_v39  ;;  %v2790_v59 = vadd.f32 %v409_v57, %v2744_v52  ;;  %v325_v26 = vpop.f32.mrf.mxu0  ;;  %v354_v61 = vpop.f32.mrf.mxu1 }
  0xce   :  { %v2792_v51 = vadd.f32 %v325_v26, %v132_v8  ;;  %v2794_v53 = vadd.f32 %v354_v61, %v133_v60 }
  0xcf   :  { %3478 = vst [vmem:[#allocation70_spill] sm:$0xff] %v2787_v4 }
  0xd0   :  { %3479 = vst [vmem:[#allocation71_spill] sm:$0xff] %v2790_v59  ;;  %v171_v59 = vadd.f32 %v170_v62, %v132_v8 }
  0xd1   :  { %3480 = vst [vmem:[#allocation72_spill] sm:$0xff] %v2792_v51 }
  0xd2   :  { %3481 = vst [vmem:[#allocation73_spill] sm:$0xff] %v2794_v53 }
  0xd4   :  { %v383_v0 = vpop.f32.mrf.mxu2  ;;  %v412_v13 = vpop.f32.mrf.mxu3 }
  0xd5   :  { %v2797_v58 = vadd.f32 %v383_v0, %v2742_v39  ;;  %v2800_v56 = vadd.f32 %v412_v13, %v2744_v52  ;;  %v328_v50 = vpop.f32.mrf.mxu0  ;;  %v357_v54 = vpop.f32.mrf.mxu1 }
  0xd6   :  { %v2802_v4 = vadd.f32 %v328_v50, %v132_v8  ;;  %v2804_v57 = vadd.f32 %v357_v54, %v133_v60  ;;  %v229_v50 = vadd.f32 %v2734_v2, %v2742_v39 }
  0xd7   :  { %3482 = vst [vmem:[#allocation74_spill] sm:$0xff] %v2797_v58 }
  0xd8   :  { %3483 = vst [vmem:[#allocation75_spill] sm:$0xff] %v2800_v56 }
  0xd9   :  { %3484 = vst [vmem:[#allocation76_spill] sm:$0xff] %v2802_v4 }
  0xda   :  { %3485 = vst [vmem:[#allocation77_spill] sm:$0xff] %v2804_v57 }
  0xdc   :  { %v386_v26 = vpop.f32.mrf.mxu2  ;;  %v415_v51 = vpop.f32.mrf.mxu3 }
  0xdd   :  { %v2807_v61 = vadd.f32 %v386_v26, %v2742_v39  ;;  %v2810_v53 = vadd.f32 %v415_v51, %v2744_v52  ;;  %v524_v0 = vpop.f32.mrf.mxu0  ;;  %v544_v58 = vpop.f32.mrf.mxu1 }
  0xde   :  { %v587_v13 = vadd.f32 %v524_v0, %v171_v59  ;;  %v588_v56 = vadd.f32 %v544_v58, %v200_v55  ;;  %v258_v55 = vadd.f32 %v2736_v3, %v2744_v52 }
  0xdf   :  { %3486 = vst [vmem:[#allocation78_spill] sm:$0xff] %v2807_v61 }
  0xe0   :  { %3487 = vst [vmem:[#allocation79_spill] sm:$0xff] %v2810_v53  ;;  %v1846_v49 = vmul.f32 -1.442695, %v587_v13  ;;  %v1847_v48 = vmul.f32 -1.442695, %v588_v56 }
  0xe2   :  { %1883 = vpow2.f32 %v1846_v49 }
  0xe3   :  { %1885 = vpow2.f32 %v1847_v48 }
  0xe4   :  { %v564_v60 = vpop.f32.mrf.mxu2  ;;  %v584_v53 = vpop.f32.mrf.mxu3 }
  0xe5   :  { %v589_v62 = vadd.f32 %v564_v60, %v229_v50  ;;  %v590_v56 = vadd.f32 %v584_v53, %v258_v55 }
  0xe7   :  { %v1848_v63 = vmul.f32 -1.442695, %v589_v62 }
  0xe8   :  { %v1884_v8 = vpop.eup %1883 }
  0xe9   :  { %v1886_v54 = vpop.eup %1885  ;;  %v600_v26 = vadd.f32 1.0, %v1884_v8  ;;  %1887 = vpow2.f32 %v1848_v63 }
  0xea   :  { %v601_v51 = vadd.f32 1.0, %v1886_v54 }
  0xeb   :  { %1889 = vrcp.f32 %v600_v26  ;;  %v614_v50 = vand.u32 2147483648, %v600_v26  ;;  %v612_v63 = vand.u32 2147483647, %v600_v26  ;;  %vm608_vm3 = vweird.f32 %v600_v26 }
  0xec   :  { %1891 = vrcp.f32 %v601_v51  ;;  %v629_v60 = vand.u32 2147483648, %v601_v51  ;;  %v627_v54 = vand.u32 2147483647, %v601_v51  ;;  %vm623_vm4 = vweird.f32 %v601_v51 }
  0xed   :  { %v615_v53 = vor.u32 1.1754944e-38, %v614_v50  ;;  %vm613_vm7 = vcmp.eq.f32.partialorder %v612_v63, 8.507059e+37 }
  0xee   :  { %v630_v55 = vor.u32 1.1754944e-38, %v629_v60  ;;  %vm628_vm8 = vcmp.eq.f32.partialorder %v627_v54, 8.507059e+37 }
  0xef   :  { %v1888_v59 = vpop.eup %1887 }
  0xf0   :  { %v602_v49 = vadd.f32 1.0, %v1888_v59 }
  0xf1   :  { %v1890_v58 = vpop.eup %1889 }
  0xf2   :  { %v1892_v2 = vpop.eup %1891  ;;  %v604_v48 = vmul.f32 %v1890_v58, %v600_v26  ;;  %1893 = vrcp.f32 %v602_v49  ;;  %vm609_vm1 = vweird.f32 %v1890_v58  ;;  %v644_v50 = vand.u32 2147483648, %v602_v49 }
  0xf3   :  { %v619_v39 = vmul.f32 %v1892_v2, %v601_v51  ;;  %1895 = vtanh.f32 %v590_v56  ;;  %vm624_vm2 = vweird.f32 %v1892_v2  ;;  %vm610_vm5 = vmor %vm608_vm3, %vm609_vm1  ;;  %vm638_vm10 = vweird.f32 %v602_v49 }
  0xf4   :  { %v605_v0 = vsub.f32 1.0, %v604_v48  ;;  %vm625_vm6 = vmor %vm623_vm4, %vm624_vm2  ;;  %v120_v48 = vld [vmem:[#allocation14] sm:$0xff]  ;;  %v642_v60 = vand.u32 2147483647, %v602_v49  ;;  %v645_v63 = vor.u32 1.1754944e-38, %v644_v50 }
  0xf5   :  { %v620_v13 = vsub.f32 1.0, %v619_v39 }
  0xf6   :  { %v606_v62 = vmul.f32 %v1890_v58, %v605_v0  ;;  %vm643_vm12 = vcmp.eq.f32.partialorder %v642_v60, 8.507059e+37 }
  0xf7   :  { %v621_v8 = vmul.f32 %v1892_v2, %v620_v13 }
  0xf8   :  { %v1894_v61 = vpop.eup %1893  ;;  %v607_v3 = vadd.f32 %v1890_v58, %v606_v62 }
  0xf9   :  { %v634_v52 = vmul.f32 %v1894_v61, %v602_v49  ;;  %v622_v59 = vadd.f32 %v1892_v2, %v621_v8  ;;  %v1896_v56 = vpop.eup %1895  ;;  %vm639_vm9 = vweird.f32 %v1894_v61 }
  0xfa   :  { %v611_v39 = vsel %vm610_vm5, %v1890_v58, %v607_v3  ;;  %vm640_vm11 = vmor %vm638_vm10, %vm639_vm9 }
  0xfb   :  { %v635_v0 = vsub.f32 1.0, %v634_v52  ;;  %v616_v57 = vsel %vm613_vm7, %v615_v53, %v611_v39  ;;  %v626_v4 = vsel %vm625_vm6, %v1892_v2, %v622_v59  ;;  %v3517_v53 = vld [vmem:[#allocation55_spill] sm:$0xff] }
  0xfc   :  { %v631_v13 = vsel %vm628_vm8, %v630_v55, %v626_v4  ;;  %v650_v47 = vmul.f32 %v1896_v56, %v616_v57 }
  0xfd   :  { %v636_v46 = vmul.f32 %v1894_v61, %v635_v0  ;;  %v649_v62 = vmul.f32 %v631_v13, %v120_v48 }
  0xff   :  { %v2816_v26 = vadd.f32 %v650_v47, %v649_v62  ;;  %v637_v51 = vadd.f32 %v1894_v61, %v636_v46 }
 0x101   :  { %1897 = vtanh.f32 %v2816_v26  ;;  %v641_v58 = vsel %vm640_vm11, %v1894_v61, %v637_v51 }
 0x102   :  { %v646_v2 = vsel %vm643_vm12, %v645_v63, %v641_v58 }
 0x107   :  { %v1898_v8 = vpop.eup %1897 }
 0x108   :  { %v653_v54 = vmul.f32 %v1898_v8, %v646_v2 }
 0x10a   :  { %654 = vst [vmem:[#allocation16] sm:$0xff] %v653_v54  ;;  %678 = vmatmul.f32.vlgmr.msrb.gmra.mxu0 %v653_v54  ;;  %698 = vmatmul.f32.vlgmr.msrb.gmra.mxu1 %v653_v54 }
 0x10b   :  { %718 = vmatmul.f32.vlgmr.msrb.gmra.mxu2 %v653_v54  ;;  %738 = vmatmul.f32.vlgmr.msrb.gmra.mxu3 %v653_v54 }
 0x10c   :  { %974 = vmatpush.msrb.mxu0 %v2386_v5  ;;  %994 = vmatpush.msrb.mxu1 %v2388_v6  ;;  %v3488_v5 = vld [vmem:[#allocation27_spill] sm:$0xff]  ;;  %v3489_v6 = vld [vmem:[#allocation28_spill] sm:$0xff] }
 0x10d   :  { %1014 = vmatpush.msrb.mxu2 %v2390_v7  ;;  %1034 = vmatpush.msrb.mxu3 %v3459_v1  ;;  %v3490_v7 = vld [vmem:[#allocation29_spill] sm:$0xff] }
 0x10e   :  { %975 = vmatpush.msrb.mxu0 %v2394_v9  ;;  %995 = vmatpush.msrb.mxu1 %v2396_v10  ;;  %v3491_v9 = vld [vmem:[#allocation30_spill] sm:$0xff]  ;;  %v3492_v10 = vld [vmem:[#allocation31_spill] sm:$0xff] }
 0x10f   :  { %1015 = vmatpush.msrb.mxu2 %v2400_v11  ;;  %1035 = vmatpush.msrb.mxu3 %v2402_v12  ;;  %v3493_v11 = vld [vmem:[#allocation32_spill] sm:$0xff]  ;;  %v3494_v12 = vld [vmem:[#allocation33_spill] sm:$0xff] }
 0x110   :  { %976 = vmatpush.msrb.mxu0 %v2410_v14  ;;  %996 = vmatpush.msrb.mxu1 %v2412_v15  ;;  %v3495_v14 = vld [vmem:[#allocation34_spill] sm:$0xff]  ;;  %v3496_v15 = vld [vmem:[#allocation35_spill] sm:$0xff] }
 0x111   :  { %1016 = vmatpush.msrb.mxu2 %v2416_v16  ;;  %1036 = vmatpush.msrb.mxu3 %v2418_v17  ;;  %v3497_v16 = vld [vmem:[#allocation36_spill] sm:$0xff]  ;;  %v3498_v17 = vld [vmem:[#allocation37_spill] sm:$0xff] }
 0x112   :  { %977 = vmatpush.msrb.mxu0 %v2422_v18  ;;  %997 = vmatpush.msrb.mxu1 %v2424_v19  ;;  %v3499_v18 = vld [vmem:[#allocation38_spill] sm:$0xff]  ;;  %v3500_v19 = vld [vmem:[#allocation39_spill] sm:$0xff] }
 0x113   :  { %1017 = vmatpush.msrb.mxu2 %v2428_v20  ;;  %1037 = vmatpush.msrb.mxu3 %v2430_v21  ;;  %v3501_v20 = vld [vmem:[#allocation40_spill] sm:$0xff]  ;;  %v3502_v21 = vld [vmem:[#allocation41_spill] sm:$0xff] }
 0x114   :  { %978 = vmatpush.msrb.mxu0 %v2434_v22  ;;  %998 = vmatpush.msrb.mxu1 %v2436_v23  ;;  %v3503_v22 = vld [vmem:[#allocation42_spill] sm:$0xff]  ;;  %v3504_v23 = vld [vmem:[#allocation43_spill] sm:$0xff] }
 0x115   :  { %1018 = vmatpush.msrb.mxu2 %v2440_v24  ;;  %1038 = vmatpush.msrb.mxu3 %v2442_v25  ;;  %v3505_v24 = vld [vmem:[#allocation44_spill] sm:$0xff]  ;;  %v3506_v25 = vld [vmem:[#allocation45_spill] sm:$0xff] }
 0x116   :  { %979 = vmatpush.msrb.mxu0 %v2450_v27  ;;  %999 = vmatpush.msrb.mxu1 %v2452_v28  ;;  %v3507_v27 = vld [vmem:[#allocation46_spill] sm:$0xff]  ;;  %v3508_v28 = vld [vmem:[#allocation47_spill] sm:$0xff] }
 0x117   :  { %1019 = vmatpush.msrb.mxu2 %v2456_v29  ;;  %1039 = vmatpush.msrb.mxu3 %v2458_v30  ;;  %v3509_v29 = vld [vmem:[#allocation48_spill] sm:$0xff]  ;;  %v3510_v30 = vld [vmem:[#allocation49_spill] sm:$0xff] }
 0x118   :  { %980 = vmatpush.msrb.mxu0 %v2462_v31  ;;  %1000 = vmatpush.msrb.mxu1 %v2464_v32  ;;  %v3511_v31 = vld [vmem:[#allocation50_spill] sm:$0xff]  ;;  %v3512_v32 = vld [vmem:[#allocation51_spill] sm:$0xff] }
 0x119   :  { %1020 = vmatpush.msrb.mxu2 %v2468_v33  ;;  %1040 = vmatpush.msrb.mxu3 %v2470_v34  ;;  %v3513_v33 = vld [vmem:[#allocation52_spill] sm:$0xff] }
 0x11a   :  { %981 = vmatpush.msrb.mxu0 %v2474_v35  ;;  %1001 = vmatpush.msrb.mxu1 %v2476_v36  ;;  %v3514_v36 = vld [vmem:[#allocation26_spill] sm:$0xff] }
 0x11b   :  { %1021 = vmatpush.msrb.mxu2 %v2480_v37  ;;  %1041 = vmatpush.msrb.mxu3 %v2482_v38  ;;  %v3515_v38 = vld [vmem:[#allocation53_spill] sm:$0xff] }
 0x11c   :  { %982 = vmatpush.msrb.mxu0 %v2490_v40  ;;  %1002 = vmatpush.msrb.mxu1 %v2492_v41 }
 0x11d   :  { %1022 = vmatpush.msrb.mxu2 %v2496_v42  ;;  %1042 = vmatpush.msrb.mxu3 %v2498_v43 }
 0x11e   :  { %983 = vmatpush.msrb.mxu0 %v2502_v44  ;;  %1003 = vmatpush.msrb.mxu1 %v2504_v45  ;;  %v3516_v44 = vld [vmem:[#allocation54_spill] sm:$0xff] }
 0x11f   :  { %1023 = vmatpush.msrb.mxu2 %v3488_v5  ;;  %1043 = vmatpush.msrb.mxu3 %v3489_v6 }
 0x120   :  { %984 = vmatpush.msrb.mxu0 %v3490_v7  ;;  %1004 = vmatpush.msrb.mxu1 %v3491_v9 }
 0x121   :  { %1024 = vmatpush.msrb.mxu2 %v3492_v10  ;;  %1044 = vmatpush.msrb.mxu3 %v3493_v11 }
 0x122   :  { %985 = vmatpush.msrb.mxu0 %v3494_v12  ;;  %1005 = vmatpush.msrb.mxu1 %v3495_v14 }
 0x123   :  { %1025 = vmatpush.msrb.mxu2 %v3496_v15  ;;  %1045 = vmatpush.msrb.mxu3 %v3497_v16 }
 0x124   :  { %986 = vmatpush.msrb.mxu0 %v3498_v17  ;;  %1006 = vmatpush.msrb.mxu1 %v3499_v18 }
 0x125   :  { %1026 = vmatpush.msrb.mxu2 %v3500_v19  ;;  %1046 = vmatpush.msrb.mxu3 %v3501_v20 }
 0x126   :  { %987 = vmatpush.msrb.mxu0 %v3502_v21  ;;  %1007 = vmatpush.msrb.mxu1 %v3503_v22 }
 0x127   :  { %1027 = vmatpush.msrb.mxu2 %v3504_v23  ;;  %1047 = vmatpush.msrb.mxu3 %v3505_v24 }
 0x128   :  { %988 = vmatpush.msrb.mxu0 %v3506_v25  ;;  %1008 = vmatpush.msrb.mxu1 %v3507_v27 }
 0x129   :  { %1028 = vmatpush.msrb.mxu2 %v3508_v28  ;;  %1048 = vmatpush.msrb.mxu3 %v3509_v29 }
 0x12a   :  { %989 = vmatpush.msrb.mxu0 %v3510_v30  ;;  %1009 = vmatpush.msrb.mxu1 %v3511_v31 }
 0x12b   :  { %1029 = vmatpush.msrb.mxu2 %v3512_v32  ;;  %1049 = vmatpush.msrb.mxu3 %v3513_v33 }
 0x187   :  { %v679_v34 = vpop.f32.mrf.mxu0  ;;  %v699_v35 = vpop.f32.mrf.mxu1 }
 0x188   :  { %v742_v37 = vadd.f32 %v679_v34, %v3514_v36  ;;  %v743_v40 = vadd.f32 %v699_v35, %v3515_v38  ;;  %v2894_v36 = vld [vmem:[#allocation10 + $0x1e8] sm:$0xff]  ;;  %v2900_v38 = vld [vmem:[#allocation10 + $0x1f8] sm:$0xff] }
 0x18a   :  { %v1849_v41 = vmul.f32 -1.442695, %v742_v37  ;;  %v1850_v42 = vmul.f32 -1.442695, %v743_v40  ;;  %v2897_v37 = vld [vmem:[#allocation10 + $0x1f0] sm:$0xff]  ;;  %v2903_v40 = vld [vmem:[#allocation10 + $0x1c0] sm:$0xff] }
 0x18c   :  { %1899 = vpow2.f32 %v1849_v41  ;;  %v2906_v41 = vld [vmem:[#allocation10 + $0x1c8] sm:$0xff] }
 0x18d   :  { %1901 = vpow2.f32 %v1850_v42  ;;  %v2909_v42 = vld [vmem:[#allocation10 + $0x1d0] sm:$0xff] }
 0x18e   :  { %v719_v43 = vpop.f32.mrf.mxu2  ;;  %v739_v61 = vpop.f32.mrf.mxu3 }
 0x18f   :  { %v744_v45 = vadd.f32 %v719_v43, %v3516_v44  ;;  %v745_v59 = vadd.f32 %v739_v61, %v3517_v53  ;;  %v2912_v43 = vld [vmem:[#allocation10 + $0x1d8] sm:$0xff]  ;;  %v2915_v44 = vld [vmem:[#allocation10 + $0x1a0] sm:$0xff] }
 0x190   :  { %v2936_v61 = vld [vmem:[#allocation10 + $0x198] sm:$0xff] }
 0x191   :  { %v1851_v46 = vmul.f32 -1.442695, %v744_v45  ;;  %v2918_v45 = vld [vmem:[#allocation10 + $0x1a8] sm:$0xff]  ;;  %v2948_v53 = vld [vmem:[#allocation10 + $0x178] sm:$0xff] }
 0x192   :  { %v1900_v47 = vpop.eup %1899 }
 0x193   :  { %v1902_v1 = vpop.eup %1901  ;;  %v755_v4 = vadd.f32 1.0, %v1900_v47  ;;  %1903 = vpow2.f32 %v1851_v46  ;;  %v2921_v46 = vld [vmem:[#allocation10 + $0x1b0] sm:$0xff]  ;;  %v2924_v47 = vld [vmem:[#allocation10 + $0x1b8] sm:$0xff] }
 0x194   :  { %v756_v57 = vadd.f32 1.0, %v1902_v1  ;;  %v2927_v1 = vld [vmem:[#allocation10 + $0x180] sm:$0xff] }
 0x195   :  { %1905 = vrcp.f32 %v755_v4  ;;  %v769_v13 = vand.u32 2147483648, %v755_v4  ;;  %v767_v50 = vand.u32 2147483647, %v755_v4  ;;  %vm763_vm15 = vweird.f32 %v755_v4 }
 0x196   :  { %1907 = vrcp.f32 %v756_v57  ;;  %v784_v62 = vand.u32 2147483648, %v756_v57  ;;  %v782_v58 = vand.u32 2147483647, %v756_v57  ;;  %vm778_vm0 = vweird.f32 %v756_v57 }
 0x197   :  { %v770_v54 = vor.u32 1.1754944e-38, %v769_v13  ;;  %vm768_vm3 = vcmp.eq.f32.partialorder %v767_v50, 8.507059e+37  ;;  %v2969_v13 = vld [vmem:[#allocation10 + $0x130] sm:$0xff]  ;;  %v2978_v50 = vld [vmem:[#allocation10 + $0x108] sm:$0xff] }
 0x198   :  { %v785_v6 = vor.u32 1.1754944e-38, %v784_v62  ;;  %vm783_vm4 = vcmp.eq.f32.partialorder %v782_v58, 8.507059e+37  ;;  %v2972_v62 = vld [vmem:[#allocation10 + $0x138] sm:$0xff] }
 0x199   :  { %v1904_v49 = vpop.eup %1903  ;;  %v2984_v58 = vld [vmem:[#allocation10 + $0x118] sm:$0xff] }
 0x19a   :  { %v757_v3 = vadd.f32 1.0, %v1904_v49  ;;  %v2939_v49 = vld [vmem:[#allocation10 + $0x160] sm:$0xff] }
 0x19b   :  { %v1906_v52 = vpop.eup %1905 }
 0x19c   :  { %v1908_v55 = vpop.eup %1907  ;;  %v759_v48 = vmul.f32 %v1906_v52, %v755_v4  ;;  %1909 = vrcp.f32 %v757_v3  ;;  %vm764_vm13 = vweird.f32 %v1906_v52  ;;  %v799_v20 = vand.u32 2147483648, %v757_v3  ;;  %v2930_v4 = vld [vmem:[#allocation10 + $0x188] sm:$0xff] }
 0x19d   :  { %v774_v39 = vmul.f32 %v1908_v55, %v756_v57  ;;  %1911 = vtanh.f32 %v745_v59  ;;  %vm779_vm14 = vweird.f32 %v1908_v55  ;;  %vm765_vm1 = vmor %vm763_vm15, %vm764_vm13  ;;  %vm793_vm6 = vweird.f32 %v757_v3  ;;  %v2933_v57 = vld [vmem:[#allocation10 + $0x190] sm:$0xff]  ;;  %v2951_v59 = vld [vmem:[#allocation10 + $0x140] sm:$0xff] }
 0x19e   :  { %v760_v56 = vsub.f32 1.0, %v759_v48  ;;  %vm780_vm2 = vmor %vm778_vm0, %vm779_vm14  ;;  %v797_v21 = vand.u32 2147483647, %v757_v3  ;;  %v800_v23 = vor.u32 1.1754944e-38, %v799_v20  ;;  %v2957_v48 = vld [vmem:[#allocation10 + $0x150] sm:$0xff]  ;;  %v3035_v20 = vld [vmem:[#allocation10 + $0x60] sm:$0xff] }
 0x19f   :  { %v775_v0 = vsub.f32 1.0, %v774_v39  ;;  %v2960_v39 = vld [vmem:[#allocation10 + $0x158] sm:$0xff]  ;;  %3528 = vst [vmem:[#allocation37_spill] sm:$0xff] %v3035_v20 }
 0x1a0   :  { %v761_v51 = vmul.f32 %v1906_v52, %v760_v56  ;;  %vm798_vm8 = vcmp.eq.f32.partialorder %v797_v21, 8.507059e+37  ;;  %v2963_v56 = vld [vmem:[#allocation10 + $0x120] sm:$0xff]  ;;  %v3038_v21 = vld [vmem:[#allocation10 + $0x68] sm:$0xff] }
 0x1a1   :  { %v776_v60 = vmul.f32 %v1908_v55, %v775_v0  ;;  %v2966_v0 = vld [vmem:[#allocation10 + $0x128] sm:$0xff]  ;;  %3529 = vst [vmem:[#allocation38_spill] sm:$0xff] %v3038_v21 }
 0x1a2   :  { %v1910_v63 = vpop.eup %1909  ;;  %v762_v8 = vadd.f32 %v1906_v52, %v761_v51  ;;  %v2975_v51 = vld [vmem:[#allocation10 + $0x100] sm:$0xff] }
 0x1a3   :  { %v789_v2 = vmul.f32 %v1910_v63, %v757_v3  ;;  %v777_v5 = vadd.f32 %v1908_v55, %v776_v60  ;;  %v1912_v9 = vpop.eup %1911  ;;  %vm794_vm5 = vweird.f32 %v1910_v63  ;;  %v2942_v3 = vld [vmem:[#allocation10 + $0x168] sm:$0xff]  ;;  %v2981_v60 = vld [vmem:[#allocation10 + $0x110] sm:$0xff] }
 0x1a4   :  { %v766_v7 = vsel %vm765_vm1, %v1906_v52, %v762_v8  ;;  %vm795_vm7 = vmor %vm793_vm6, %vm794_vm5  ;;  %v2945_v52 = vld [vmem:[#allocation10 + $0x170] sm:$0xff]  ;;  %v2990_v8 = vld [vmem:[#allocation10 + $0xe8] sm:$0xff] }
 0x1a5   :  { %v790_v10 = vsub.f32 1.0, %v789_v2  ;;  %v771_v11 = vsel %vm768_vm3, %v770_v54, %v766_v7  ;;  %v781_v12 = vsel %vm780_vm2, %v1908_v55, %v777_v5  ;;  %v2954_v55 = vld [vmem:[#allocation10 + $0x148] sm:$0xff]  ;;  %v2993_v2 = vld [vmem:[#allocation10 + $0xf0] sm:$0xff]  ;;  %v2996_v54 = vld [vmem:[#allocation10 + $0xf8] sm:$0xff] }
 0x1a6   :  { %v786_v14 = vsel %vm783_vm4, %v785_v6, %v781_v12  ;;  %v805_v15 = vmul.f32 %v1912_v9, %v771_v11  ;;  %v2999_v5 = vld [vmem:[#allocation10 + $0xc0] sm:$0xff]  ;;  %v3002_v6 = vld [vmem:[#allocation10 + $0xc8] sm:$0xff]  ;;  %v3005_v7 = vld [vmem:[#allocation10 + $0xd0] sm:$0xff] }
 0x1a7   :  { %v791_v16 = vmul.f32 %v1910_v63, %v790_v10  ;;  %v804_v17 = vmul.f32 %v786_v14, %v2816_v26  ;;  %v2891_v26 = vld [vmem:[#allocation10 + $0x1e0] sm:$0xff]  ;;  %3518 = vst [vmem:[#allocation27_spill] sm:$0xff] %v3005_v7  ;;  %v3008_v9 = vld [vmem:[#allocation10 + $0xd8] sm:$0xff]  ;;  %v3014_v11 = vld [vmem:[#allocation10 + $0xa8] sm:$0xff] }
 0x1a8   :  { %3519 = vst [vmem:[#allocation28_spill] sm:$0xff] %v3008_v9  ;;  %v3011_v10 = vld [vmem:[#allocation10 + $0xa0] sm:$0xff]  ;;  %v3017_v12 = vld [vmem:[#allocation10 + $0xb0] sm:$0xff]  ;;  %v3020_v14 = vld [vmem:[#allocation10 + $0xb8] sm:$0xff] }
 0x1a9   :  { %v2888_v18 = vadd.f32 %v805_v15, %v804_v17  ;;  %v792_v19 = vadd.f32 %v1910_v63, %v791_v16  ;;  %3520 = vst [vmem:[#allocation29_spill] sm:$0xff] %v3011_v10  ;;  %v3023_v15 = vld [vmem:[#allocation10 + $0x80] sm:$0xff]  ;;  %v3026_v16 = vld [vmem:[#allocation10 + $0x88] sm:$0xff]  ;;  %v3029_v17 = vld [vmem:[#allocation10 + $0x90] sm:$0xff] }
 0x1aa   :  { %3521 = vst [vmem:[#allocation30_spill] sm:$0xff] %v3014_v11 }
 0x1ab   :  { %1913 = vtanh.f32 %v2888_v18  ;;  %v796_v22 = vsel %vm795_vm7, %v1910_v63, %v792_v19  ;;  %v2987_v63 = vld [vmem:[#allocation10 + $0xe0] sm:$0xff]  ;;  %3522 = vst [vmem:[#allocation31_spill] sm:$0xff] %v3017_v12  ;;  %v3032_v19 = vld [vmem:[#allocation10 + $0x98] sm:$0xff] }
 0x1ac   :  { %v801_v34 = vsel %vm798_vm8, %v800_v23, %v796_v22  ;;  %3523 = vst [vmem:[#allocation32_spill] sm:$0xff] %v3020_v14  ;;  %v3041_v22 = vld [vmem:[#allocation10 + $0x70] sm:$0xff]  ;;  %v3044_v23 = vld [vmem:[#allocation10 + $0x78] sm:$0xff] }
 0x1ad   :  { %3524 = vst [vmem:[#allocation33_spill] sm:$0xff] %v3023_v15 }
 0x1ae   :  { %3525 = vst [vmem:[#allocation34_spill] sm:$0xff] %v3026_v16 }
 0x1af   :  { %3526 = vst [vmem:[#allocation35_spill] sm:$0xff] %v3029_v17 }
 0x1b0   :  { %3527 = vst [vmem:[#allocation36_spill] sm:$0xff] %v3032_v19 }
 0x1b1   :  { %v1914_v24 = vpop.eup %1913  ;;  %3530 = vst [vmem:[#allocation39_spill] sm:$0xff] %v3041_v22 }
 0x1b2   :  { %v808_v35 = vmul.f32 %v1914_v24, %v801_v34  ;;  %3531 = vst [vmem:[#allocation40_spill] sm:$0xff] %v3044_v23  ;;  %v3047_v24 = vld [vmem:[#allocation10 + $0x40] sm:$0xff]  ;;  %v3050_v34 = vld [vmem:[#allocation10 + $0x48] sm:$0xff] }
 0x1b3   :  { %3532 = vst [vmem:[#allocation41_spill] sm:$0xff] %v3047_v24 }
 0x1b4   :  { %810 = vst [vmem:[#allocation16 + $0x8] sm:$0xff] %v808_v35  ;;  %834 = vmatmul.f32.vlgmr.msra.gmra.mxu0 %v808_v35  ;;  %854 = vmatmul.f32.vlgmr.msra.gmra.mxu1 %v808_v35 }
 0x1b5   :  { %874 = vmatmul.f32.vlgmr.msra.gmra.mxu2 %v808_v35  ;;  %894 = vmatmul.f32.vlgmr.msra.gmra.mxu3 %v808_v35  ;;  %3533 = vst [vmem:[#allocation42_spill] sm:$0xff] %v3050_v34  ;;  %v3053_v35 = vld [vmem:[#allocation10 + $0x50] sm:$0xff] }
 0x1b6   :  { %1130 = vmatpush.msra.mxu0 %v2891_v26  ;;  %1150 = vmatpush.msra.mxu1 %v2894_v36  ;;  %3534 = vst [vmem:[#allocation43_spill] sm:$0xff] %v3053_v35 }
 0x1b7   :  { %1170 = vmatpush.msra.mxu2 %v2897_v37  ;;  %1190 = vmatpush.msra.mxu3 %v2900_v38 }
 0x1b8   :  { %1131 = vmatpush.msra.mxu0 %v2903_v40  ;;  %1151 = vmatpush.msra.mxu1 %v2906_v41 }
 0x1b9   :  { %1171 = vmatpush.msra.mxu2 %v2909_v42  ;;  %1191 = vmatpush.msra.mxu3 %v2912_v43 }
 0x1ba   :  { %1132 = vmatpush.msra.mxu0 %v2915_v44  ;;  %1152 = vmatpush.msra.mxu1 %v2918_v45 }
 0x1bb   :  { %1172 = vmatpush.msra.mxu2 %v2921_v46  ;;  %1192 = vmatpush.msra.mxu3 %v2924_v47 }
 0x1bc   :  { %1133 = vmatpush.msra.mxu0 %v2927_v1  ;;  %1153 = vmatpush.msra.mxu1 %v2930_v4 }
 0x1bd   :  { %1173 = vmatpush.msra.mxu2 %v2933_v57  ;;  %1193 = vmatpush.msra.mxu3 %v2936_v61 }
 0x1be   :  { %1134 = vmatpush.msra.mxu0 %v2939_v49  ;;  %1154 = vmatpush.msra.mxu1 %v2942_v3 }
 0x1bf   :  { %1174 = vmatpush.msra.mxu2 %v2945_v52  ;;  %1194 = vmatpush.msra.mxu3 %v2948_v53 }
 0x1c0   :  { %1135 = vmatpush.msra.mxu0 %v2951_v59  ;;  %1155 = vmatpush.msra.mxu1 %v2954_v55 }
 0x1c1   :  { %1175 = vmatpush.msra.mxu2 %v2957_v48  ;;  %1195 = vmatpush.msra.mxu3 %v2960_v39 }
 0x1c2   :  { %1136 = vmatpush.msra.mxu0 %v2963_v56  ;;  %1156 = vmatpush.msra.mxu1 %v2966_v0 }
 0x1c3   :  { %1176 = vmatpush.msra.mxu2 %v2969_v13  ;;  %1196 = vmatpush.msra.mxu3 %v2972_v62 }
 0x1c4   :  { %1137 = vmatpush.msra.mxu0 %v2975_v51  ;;  %1157 = vmatpush.msra.mxu1 %v2978_v50 }
 0x1c5   :  { %1177 = vmatpush.msra.mxu2 %v2981_v60  ;;  %1197 = vmatpush.msra.mxu3 %v2984_v58 }
 0x1c6   :  { %1138 = vmatpush.msra.mxu0 %v2987_v63  ;;  %1158 = vmatpush.msra.mxu1 %v2990_v8 }
 0x1c7   :  { %1178 = vmatpush.msra.mxu2 %v2993_v2  ;;  %1198 = vmatpush.msra.mxu3 %v2996_v54 }
 0x1c8   :  { %1139 = vmatpush.msra.mxu0 %v2999_v5  ;;  %1159 = vmatpush.msra.mxu1 %v3002_v6 }
 0x1c9   :  { %1179 = vmatpush.msra.mxu2 %v3005_v7  ;;  %1199 = vmatpush.msra.mxu3 %v3008_v9 }
 0x1ca   :  { %1140 = vmatpush.msra.mxu0 %v3011_v10  ;;  %1160 = vmatpush.msra.mxu1 %v3014_v11 }
 0x1cb   :  { %1180 = vmatpush.msra.mxu2 %v3017_v12  ;;  %1200 = vmatpush.msra.mxu3 %v3020_v14 }
 0x1cc   :  { %1141 = vmatpush.msra.mxu0 %v3023_v15  ;;  %1161 = vmatpush.msra.mxu1 %v3026_v16 }
 0x1cd   :  { %1181 = vmatpush.msra.mxu2 %v3029_v17  ;;  %1201 = vmatpush.msra.mxu3 %v3032_v19 }
 0x1ce   :  { %1142 = vmatpush.msra.mxu0 %v3035_v20  ;;  %1162 = vmatpush.msra.mxu1 %v3038_v21  ;;  %v3056_v21 = vld [vmem:[#allocation10 + $0x58] sm:$0xff] }
 0x1cf   :  { %1182 = vmatpush.msra.mxu2 %v3041_v22  ;;  %1202 = vmatpush.msra.mxu3 %v3044_v23  ;;  %3535 = vst [vmem:[#allocation44_spill] sm:$0xff] %v3056_v21  ;;  %v3537_v23 = vld [vmem:[#allocation57_spill] sm:$0xff] }
 0x1d0   :  { %1143 = vmatpush.msra.mxu0 %v3047_v24  ;;  %1163 = vmatpush.msra.mxu1 %v3050_v34  ;;  %v3536_v24 = vld [vmem:[#allocation56_spill] sm:$0xff] }
 0x1d1   :  { %1183 = vmatpush.msra.mxu2 %v3053_v35  ;;  %1203 = vmatpush.msra.mxu3 %v3056_v21 }
 0x1d2   :  { %1144 = vmatpush.msra.mxu0 %v3506_v25  ;;  %1164 = vmatpush.msra.mxu1 %v3507_v27 }
 0x1d3   :  { %1184 = vmatpush.msra.mxu2 %v3508_v28  ;;  %1204 = vmatpush.msra.mxu3 %v3509_v29  ;;  %v3538_v29 = vld [vmem:[#allocation58_spill] sm:$0xff] }
 0x1d4   :  { %1145 = vmatpush.msra.mxu0 %v3510_v30  ;;  %1165 = vmatpush.msra.mxu1 %v3511_v31 }
 0x1d5   :  { %1185 = vmatpush.msra.mxu2 %v3512_v32  ;;  %1205 = vmatpush.msra.mxu3 %v3513_v33 }
 0x231   :  { %v835_v35 = vpop.f32.mrf.mxu0  ;;  %v855_v34 = vpop.f32.mrf.mxu1 }
 0x232   :  { %v898_v21 = vadd.f32 %v835_v35, %v3536_v24  ;;  %v899_v25 = vadd.f32 %v855_v34, %v3537_v23  ;;  %v3539_v23 = vld [vmem:[#allocation59_spill] sm:$0xff] }
 0x234   :  { %v1852_v22 = vmul.f32 -1.442695, %v898_v21  ;;  %v1853_v27 = vmul.f32 -1.442695, %v899_v25 }
 0x236   :  { %1915 = vpow2.f32 %v1852_v22 }
 0x237   :  { %1917 = vpow2.f32 %v1853_v27 }
 0x238   :  { %v875_v28 = vpop.f32.mrf.mxu2  ;;  %v895_v33 = vpop.f32.mrf.mxu3 }
 0x239   :  { %v900_v20 = vadd.f32 %v875_v28, %v3538_v29  ;;  %v901_v21 = vadd.f32 %v895_v33, %v3539_v23 }
 0x23b   :  { %v1854_v30 = vmul.f32 -1.442695, %v900_v20 }
 0x23c   :  { %v1916_v19 = vpop.eup %1915 }
 0x23d   :  { %v1918_v31 = vpop.eup %1917  ;;  %v911_v17 = vadd.f32 1.0, %v1916_v19  ;;  %1919 = vpow2.f32 %v1854_v30 }
 0x23e   :  { %v912_v32 = vadd.f32 1.0, %v1918_v31 }
 0x23f   :  { %1921 = vrcp.f32 %v911_v17  ;;  %v925_v20 = vand.u32 2147483648, %v911_v17  ;;  %v923_v30 = vand.u32 2147483647, %v911_v17  ;;  %vm919_vm11 = vweird.f32 %v911_v17 }
 0x240   :  { %1923 = vrcp.f32 %v912_v32  ;;  %v940_v29 = vand.u32 2147483648, %v912_v32  ;;  %v938_v15 = vand.u32 2147483647, %v912_v32  ;;  %vm934_vm12 = vweird.f32 %v912_v32 }
 0x241   :  { %v926_v23 = vor.u32 1.1754944e-38, %v925_v20  ;;  %vm924_vm15 = vcmp.eq.f32.partialorder %v923_v30, 8.507059e+37 }
 0x242   :  { %vm939_vm0 = vcmp.eq.f32.partialorder %v938_v15, 8.507059e+37 }
 0x243   :  { %v1920_v16 = vpop.eup %1919 }
 0x244   :  { %v913_v24 = vadd.f32 1.0, %v1920_v16 }
 0x245   :  { %v1922_v35 = vpop.eup %1921 }
 0x246   :  { %v1924_v34 = vpop.eup %1923  ;;  %v915_v22 = vmul.f32 %v1922_v35, %v911_v17  ;;  %1925 = vrcp.f32 %v913_v24  ;;  %vm920_vm9 = vweird.f32 %v1922_v35  ;;  %v955_v20 = vand.u32 2147483648, %v913_v24 }
 0x247   :  { %v930_v25 = vmul.f32 %v1924_v34, %v912_v32  ;;  %1927 = vtanh.f32 %v901_v21  ;;  %vm935_vm10 = vweird.f32 %v1924_v34  ;;  %vm921_vm13 = vmor %vm919_vm11, %vm920_vm9  ;;  %vm949_vm2 = vweird.f32 %v913_v24 }
 0x248   :  { %v916_v27 = vsub.f32 1.0, %v915_v22  ;;  %vm936_vm14 = vmor %vm934_vm12, %vm935_vm10  ;;  %v941_v22 = vor.u32 1.1754944e-38, %v940_v29  ;;  %v956_v30 = vor.u32 1.1754944e-38, %v955_v20  ;;  %v3131_v20 = vld [vmem:[#allocation10 + $0x20] sm:$0xff] }
 0x249   :  { %v931_v28 = vsub.f32 1.0, %v930_v25  ;;  %3558 = vst [vmem:[#allocation45_spill] sm:$0xff] %v3131_v20 }
 0x24a   :  { %v917_v19 = vmul.f32 %v1922_v35, %v916_v27 }
 0x24b   :  { %v932_v31 = vmul.f32 %v1924_v34, %v931_v28 }
 0x24c   :  { %v1926_v14 = vpop.eup %1925  ;;  %v918_v16 = vadd.f32 %v1922_v35, %v917_v19 }
 0x24d   :  { %v945_v33 = vmul.f32 %v1926_v14, %v913_v24  ;;  %v933_v12 = vadd.f32 %v1924_v34, %v932_v31  ;;  %v1928_v21 = vpop.eup %1927  ;;  %vm950_vm1 = vweird.f32 %v1926_v14  ;;  %v3547_v31 = vld [vmem:[#allocation34_spill] sm:$0xff] }
 0x24e   :  { %v922_v25 = vsel %vm921_vm13, %v1922_v35, %v918_v16  ;;  %v953_v35 = vand.u32 2147483647, %v913_v24  ;;  %vm951_vm3 = vmor %vm949_vm2, %vm950_vm1  ;;  %v3545_v24 = vld [vmem:[#allocation32_spill] sm:$0xff]  ;;  %v3548_v16 = vld [vmem:[#allocation35_spill] sm:$0xff] }
 0x24f   :  { %v946_v11 = vsub.f32 1.0, %v945_v33  ;;  %v927_v27 = vsel %vm924_vm15, %v926_v23, %v922_v25  ;;  %v937_v10 = vsel %vm936_vm14, %v1924_v34, %v933_v12  ;;  %v3546_v34 = vld [vmem:[#allocation33_spill] sm:$0xff]  ;;  %v3549_v33 = vld [vmem:[#allocation36_spill] sm:$0xff]  ;;  %v3552_v25 = vld [vmem:[#allocation39_spill] sm:$0xff] }
 0x250   :  { %v942_v28 = vsel %vm939_vm0, %v941_v22, %v937_v10  ;;  %v961_v9 = vmul.f32 %v1928_v21, %v927_v27  ;;  %vm954_vm4 = vcmp.eq.f32.partialorder %v953_v35, 8.507059e+37  ;;  %v3550_v23 = vld [vmem:[#allocation37_spill] sm:$0xff]  ;;  %v3551_v22 = vld [vmem:[#allocation38_spill] sm:$0xff]  ;;  %v3553_v21 = vld [vmem:[#allocation40_spill] sm:$0xff] }
 0x251   :  { %v947_v7 = vmul.f32 %v1926_v14, %v946_v11  ;;  %v960_v19 = vmul.f32 %v942_v28, %v2888_v18  ;;  %v3540_v18 = vld [vmem:[#allocation27_spill] sm:$0xff]  ;;  %v3543_v11 = vld [vmem:[#allocation30_spill] sm:$0xff]  ;;  %v3554_v27 = vld [vmem:[#allocation41_spill] sm:$0xff] }
 0x252   :  { %v3555_v28 = vld [vmem:[#allocation42_spill] sm:$0xff] }
 0x253   :  { %v3072_v17 = vadd.f32 %v961_v9, %v960_v19  ;;  %v948_v32 = vadd.f32 %v1926_v14, %v947_v7  ;;  %v3541_v7 = vld [vmem:[#allocation28_spill] sm:$0xff]  ;;  %v3542_v9 = vld [vmem:[#allocation29_spill] sm:$0xff]  ;;  %v3556_v19 = vld [vmem:[#allocation43_spill] sm:$0xff] }
 0x254   :  { %v3134_v35 = vld [vmem:[#allocation10 + $0x28] sm:$0xff] }
 0x255   :  { %1929 = vtanh.f32 %v3072_v17  ;;  %v952_v29 = vsel %vm951_vm3, %v1926_v14, %v948_v32  ;;  %v3544_v14 = vld [vmem:[#allocation31_spill] sm:$0xff]  ;;  %v3557_v32 = vld [vmem:[#allocation44_spill] sm:$0xff]  ;;  %3559 = vst [vmem:[#allocation46_spill] sm:$0xff] %v3134_v35 }
 0x256   :  { %v957_v15 = vsel %vm954_vm4, %v956_v30, %v952_v29  ;;  %v3137_v29 = vld [vmem:[#allocation10 + $0x30] sm:$0xff]  ;;  %v3140_v30 = vld [vmem:[#allocation10 + $0x38] sm:$0xff] }
 0x257   :  { %3560 = vst [vmem:[#allocation47_spill] sm:$0xff] %v3137_v29 }
 0x258   :  { %3561 = vst [vmem:[#allocation48_spill] sm:$0xff] %v3140_v30 }
 0x25b   :  { %v1930_v12 = vpop.eup %1929 }
 0x25c   :  { %v964_v10 = vmul.f32 %v1930_v12, %v957_v15  ;;  %v3143_v12 = vld [vmem:[#allocation10] sm:$0xff]  ;;  %v3146_v15 = vld [vmem:[#allocation10 + $0x8] sm:$0xff] }
 0x25d   :  { %3562 = vst [vmem:[#allocation49_spill] sm:$0xff] %v3143_v12 }
 0x25e   :  { %966 = vst [vmem:[#allocation16 + $0x10] sm:$0xff] %v964_v10  ;;  %990 = vmatmul.f32.vlgmr.msrb.gmra.mxu0 %v964_v10  ;;  %1010 = vmatmul.f32.vlgmr.msrb.gmra.mxu1 %v964_v10 }
 0x25f   :  { %1030 = vmatmul.f32.vlgmr.msrb.gmra.mxu2 %v964_v10  ;;  %1050 = vmatmul.f32.vlgmr.msrb.gmra.mxu3 %v964_v10  ;;  %3563 = vst [vmem:[#allocation50_spill] sm:$0xff] %v3146_v15  ;;  %v3149_v10 = vld [vmem:[#allocation10 + $0x10] sm:$0xff] }
 0x260   :  { %1286 = vmatpush.msrb.mxu0 %v2891_v26  ;;  %1306 = vmatpush.msrb.mxu1 %v2894_v36  ;;  %3564 = vst [vmem:[#allocation51_spill] sm:$0xff] %v3149_v10 }
 0x261   :  { %1326 = vmatpush.msrb.mxu2 %v2897_v37  ;;  %1346 = vmatpush.msrb.mxu3 %v2900_v38 }
 0x262   :  { %1287 = vmatpush.msrb.mxu0 %v2903_v40  ;;  %1307 = vmatpush.msrb.mxu1 %v2906_v41 }
 0x263   :  { %1327 = vmatpush.msrb.mxu2 %v2909_v42  ;;  %1347 = vmatpush.msrb.mxu3 %v2912_v43 }
 0x264   :  { %1288 = vmatpush.msrb.mxu0 %v2915_v44  ;;  %1308 = vmatpush.msrb.mxu1 %v2918_v45 }
 0x265   :  { %1328 = vmatpush.msrb.mxu2 %v2921_v46  ;;  %1348 = vmatpush.msrb.mxu3 %v2924_v47 }
 0x266   :  { %1289 = vmatpush.msrb.mxu0 %v2927_v1  ;;  %1309 = vmatpush.msrb.mxu1 %v2930_v4 }
 0x267   :  { %1329 = vmatpush.msrb.mxu2 %v2933_v57  ;;  %1349 = vmatpush.msrb.mxu3 %v2936_v61 }
 0x268   :  { %1290 = vmatpush.msrb.mxu0 %v2939_v49  ;;  %1310 = vmatpush.msrb.mxu1 %v2942_v3 }
 0x269   :  { %1330 = vmatpush.msrb.mxu2 %v2945_v52  ;;  %1350 = vmatpush.msrb.mxu3 %v2948_v53 }
 0x26a   :  { %1291 = vmatpush.msrb.mxu0 %v2951_v59  ;;  %1311 = vmatpush.msrb.mxu1 %v2954_v55 }
 0x26b   :  { %1331 = vmatpush.msrb.mxu2 %v2957_v48  ;;  %1351 = vmatpush.msrb.mxu3 %v2960_v39 }
 0x26c   :  { %1292 = vmatpush.msrb.mxu0 %v2963_v56  ;;  %1312 = vmatpush.msrb.mxu1 %v2966_v0 }
 0x26d   :  { %1332 = vmatpush.msrb.mxu2 %v2969_v13  ;;  %1352 = vmatpush.msrb.mxu3 %v2972_v62 }
 0x26e   :  { %1293 = vmatpush.msrb.mxu0 %v2975_v51  ;;  %1313 = vmatpush.msrb.mxu1 %v2978_v50 }
 0x26f   :  { %1333 = vmatpush.msrb.mxu2 %v2981_v60  ;;  %1353 = vmatpush.msrb.mxu3 %v2984_v58 }
 0x270   :  { %1294 = vmatpush.msrb.mxu0 %v2987_v63  ;;  %1314 = vmatpush.msrb.mxu1 %v2990_v8 }
 0x271   :  { %1334 = vmatpush.msrb.mxu2 %v2993_v2  ;;  %1354 = vmatpush.msrb.mxu3 %v2996_v54 }
 0x272   :  { %1295 = vmatpush.msrb.mxu0 %v2999_v5  ;;  %1315 = vmatpush.msrb.mxu1 %v3002_v6 }
 0x273   :  { %1335 = vmatpush.msrb.mxu2 %v3540_v18  ;;  %1355 = vmatpush.msrb.mxu3 %v3541_v7 }
 0x274   :  { %1296 = vmatpush.msrb.mxu0 %v3542_v9  ;;  %1316 = vmatpush.msrb.mxu1 %v3543_v11 }
 0x275   :  { %1336 = vmatpush.msrb.mxu2 %v3544_v14  ;;  %1356 = vmatpush.msrb.mxu3 %v3545_v24 }
 0x276   :  { %1297 = vmatpush.msrb.mxu0 %v3546_v34  ;;  %1317 = vmatpush.msrb.mxu1 %v3547_v31 }
 0x277   :  { %1337 = vmatpush.msrb.mxu2 %v3548_v16  ;;  %1357 = vmatpush.msrb.mxu3 %v3549_v33 }
 0x278   :  { %1298 = vmatpush.msrb.mxu0 %v3550_v23  ;;  %1318 = vmatpush.msrb.mxu1 %v3551_v22 }
 0x279   :  { %1338 = vmatpush.msrb.mxu2 %v3552_v25  ;;  %1358 = vmatpush.msrb.mxu3 %v3553_v21 }
 0x27a   :  { %1299 = vmatpush.msrb.mxu0 %v3554_v27  ;;  %1319 = vmatpush.msrb.mxu1 %v3555_v28 }
 0x27b   :  { %1339 = vmatpush.msrb.mxu2 %v3556_v19  ;;  %1359 = vmatpush.msrb.mxu3 %v3557_v32  ;;  %v3566_v32 = vld [vmem:[#allocation60_spill] sm:$0xff]  ;;  %v3567_v19 = vld [vmem:[#allocation61_spill] sm:$0xff] }
 0x27c   :  { %1300 = vmatpush.msrb.mxu0 %v3131_v20  ;;  %1320 = vmatpush.msrb.mxu1 %v3134_v35  ;;  %v3152_v35 = vld [vmem:[#allocation10 + $0x18] sm:$0xff] }
 0x27d   :  { %1340 = vmatpush.msrb.mxu2 %v3137_v29  ;;  %1360 = vmatpush.msrb.mxu3 %v3140_v30  ;;  %3565 = vst [vmem:[#allocation52_spill] sm:$0xff] %v3152_v35 }
 0x27e   :  { %1301 = vmatpush.msrb.mxu0 %v3143_v12  ;;  %1321 = vmatpush.msrb.mxu1 %v3146_v15  ;;  %v3568_v15 = vld [vmem:[#allocation62_spill] sm:$0xff] }
 0x27f   :  { %1341 = vmatpush.msrb.mxu2 %v3149_v10  ;;  %1361 = vmatpush.msrb.mxu3 %v3152_v35 }
 0x2db   :  { %v991_v29 = vpop.f32.mrf.mxu0  ;;  %v1011_v20 = vpop.f32.mrf.mxu1 }
 0x2dc   :  { %v1054_v30 = vadd.f32 %v991_v29, %v3566_v32  ;;  %v1055_v28 = vadd.f32 %v1011_v20, %v3567_v19  ;;  %v3569_v19 = vld [vmem:[#allocation63_spill] sm:$0xff] }
 0x2de   :  { %v1855_v27 = vmul.f32 -1.442695, %v1054_v30  ;;  %v1856_v12 = vmul.f32 -1.442695, %v1055_v28 }
 0x2e0   :  { %1931 = vpow2.f32 %v1855_v27 }
 0x2e1   :  { %1933 = vpow2.f32 %v1856_v12 }
 0x2e2   :  { %v1031_v21 = vpop.f32.mrf.mxu2  ;;  %v1051_v35 = vpop.f32.mrf.mxu3 }
 0x2e3   :  { %v1056_v25 = vadd.f32 %v1031_v21, %v3568_v15  ;;  %v1057_v20 = vadd.f32 %v1051_v35, %v3569_v19 }
 0x2e5   :  { %v1857_v22 = vmul.f32 -1.442695, %v1056_v25 }
 0x2e6   :  { %v1932_v23 = vpop.eup %1931 }
 0x2e7   :  { %v1934_v10 = vpop.eup %1933  ;;  %v1067_v33 = vadd.f32 1.0, %v1932_v23  ;;  %1935 = vpow2.f32 %v1857_v22 }
 0x2e8   :  { %v1068_v16 = vadd.f32 1.0, %v1934_v10 }
 0x2e9   :  { %1937 = vrcp.f32 %v1067_v33  ;;  %v1081_v25 = vand.u32 2147483648, %v1067_v33  ;;  %v1079_v22 = vand.u32 2147483647, %v1067_v33  ;;  %vm1075_vm7 = vweird.f32 %v1067_v33 }
 0x2ea   :  { %1939 = vrcp.f32 %v1068_v16  ;;  %v1096_v15 = vand.u32 2147483648, %v1068_v16  ;;  %v1094_v34 = vand.u32 2147483647, %v1068_v16  ;;  %vm1090_vm8 = vweird.f32 %v1068_v16 }
 0x2eb   :  { %v1082_v19 = vor.u32 1.1754944e-38, %v1081_v25  ;;  %vm1080_vm11 = vcmp.eq.f32.partialorder %v1079_v22, 8.507059e+37 }
 0x2ec   :  { %vm1095_vm12 = vcmp.eq.f32.partialorder %v1094_v34, 8.507059e+37 }
 0x2ed   :  { %v1936_v31 = vpop.eup %1935 }
 0x2ee   :  { %v1069_v32 = vadd.f32 1.0, %v1936_v31 }
 0x2ef   :  { %v1938_v29 = vpop.eup %1937 }
 0x2f0   :  { %v1940_v28 = vpop.eup %1939  ;;  %v1071_v27 = vmul.f32 %v1938_v29, %v1067_v33  ;;  %1941 = vrcp.f32 %v1069_v32  ;;  %vm1076_vm5 = vweird.f32 %v1938_v29  ;;  %v1111_v25 = vand.u32 2147483648, %v1069_v32 }
 0x2f1   :  { %v1086_v30 = vmul.f32 %v1940_v28, %v1068_v16  ;;  %1943 = vtanh.f32 %v1057_v20  ;;  %vm1091_vm6 = vweird.f32 %v1940_v28  ;;  %vm1077_vm9 = vmor %vm1075_vm7, %vm1076_vm5  ;;  %vm1105_vm14 = vweird.f32 %v1069_v32 }
 0x2f2   :  { %v1072_v12 = vsub.f32 1.0, %v1071_v27  ;;  %vm1092_vm10 = vmor %vm1090_vm8, %vm1091_vm6  ;;  %v1097_v27 = vor.u32 1.1754944e-38, %v1096_v15  ;;  %v1112_v22 = vor.u32 1.1754944e-38, %v1111_v25  ;;  %v3588_v25 = vld [vmem:[#allocation45_spill] sm:$0xff] }
 0x2f3   :  { %v1087_v21 = vsub.f32 1.0, %v1086_v30 }
 0x2f4   :  { %v1073_v23 = vmul.f32 %v1938_v29, %v1072_v12 }
 0x2f5   :  { %v1088_v10 = vmul.f32 %v1940_v28, %v1087_v21 }
 0x2f6   :  { %v1942_v24 = vpop.eup %1941  ;;  %v1074_v31 = vadd.f32 %v1938_v29, %v1073_v23 }
 0x2f7   :  { %v1101_v35 = vmul.f32 %v1942_v24, %v1069_v32  ;;  %v1089_v14 = vadd.f32 %v1940_v28, %v1088_v10  ;;  %v1944_v20 = vpop.eup %1943  ;;  %vm1106_vm13 = vweird.f32 %v1942_v24  ;;  %v3577_v10 = vld [vmem:[#allocation34_spill] sm:$0xff] }
 0x2f8   :  { %v1078_v30 = vsel %vm1077_vm9, %v1938_v29, %v1074_v31  ;;  %v1109_v29 = vand.u32 2147483647, %v1069_v32  ;;  %vm1107_vm15 = vmor %vm1105_vm14, %vm1106_vm13  ;;  %v3575_v32 = vld [vmem:[#allocation32_spill] sm:$0xff]  ;;  %v3578_v31 = vld [vmem:[#allocation35_spill] sm:$0xff] }
 0x2f9   :  { %v1102_v11 = vsub.f32 1.0, %v1101_v35  ;;  %v1083_v12 = vsel %vm1080_vm11, %v1082_v19, %v1078_v30  ;;  %v1093_v9 = vsel %vm1092_vm10, %v1940_v28, %v1089_v14  ;;  %v3576_v28 = vld [vmem:[#allocation33_spill] sm:$0xff]  ;;  %v3579_v35 = vld [vmem:[#allocation36_spill] sm:$0xff]  ;;  %v3582_v30 = vld [vmem:[#allocation39_spill] sm:$0xff] }
 0x2fa   :  { %v1098_v21 = vsel %vm1095_vm12, %v1097_v27, %v1093_v9  ;;  %v1117_v7 = vmul.f32 %v1944_v20, %v1083_v12  ;;  %vm1110_vm0 = vcmp.eq.f32.partialorder %v1109_v29, 8.507059e+37  ;;  %v3580_v19 = vld [vmem:[#allocation37_spill] sm:$0xff]  ;;  %v3581_v27 = vld [vmem:[#allocation38_spill] sm:$0xff]  ;;  %v3583_v20 = vld [vmem:[#allocation40_spill] sm:$0xff] }
 0x2fb   :  { %v1103_v18 = vmul.f32 %v1942_v24, %v1102_v11  ;;  %v1116_v23 = vmul.f32 %v1098_v21, %v3072_v17  ;;  %v3570_v17 = vld [vmem:[#allocation27_spill] sm:$0xff]  ;;  %v3573_v11 = vld [vmem:[#allocation30_spill] sm:$0xff]  ;;  %v3584_v12 = vld [vmem:[#allocation41_spill] sm:$0xff] }
 0x2fc   :  { %v3585_v21 = vld [vmem:[#allocation42_spill] sm:$0xff] }
 0x2fd   :  { %v3160_v33 = vadd.f32 %v1117_v7, %v1116_v23  ;;  %v1104_v16 = vadd.f32 %v1942_v24, %v1103_v18  ;;  %v3571_v18 = vld [vmem:[#allocation28_spill] sm:$0xff]  ;;  %v3572_v7 = vld [vmem:[#allocation29_spill] sm:$0xff]  ;;  %v3586_v23 = vld [vmem:[#allocation43_spill] sm:$0xff] }
 0x2fe   :  { %v3589_v29 = vld [vmem:[#allocation46_spill] sm:$0xff] }
 0x2ff   :  { %1945 = vtanh.f32 %v3160_v33  ;;  %v1108_v15 = vsel %vm1107_vm15, %v1942_v24, %v1104_v16  ;;  %v3574_v24 = vld [vmem:[#allocation31_spill] sm:$0xff]  ;;  %v3587_v16 = vld [vmem:[#allocation44_spill] sm:$0xff] }
 0x300   :  { %v1113_v34 = vsel %vm1110_vm0, %v1112_v22, %v1108_v15  ;;  %v3590_v15 = vld [vmem:[#allocation47_spill] sm:$0xff]  ;;  %v3591_v22 = vld [vmem:[#allocation48_spill] sm:$0xff] }
 0x305   :  { %v1946_v14 = vpop.eup %1945 }
 0x306   :  { %v1120_v9 = vmul.f32 %v1946_v14, %v1113_v34  ;;  %v3592_v14 = vld [vmem:[#allocation49_spill] sm:$0xff]  ;;  %v3593_v34 = vld [vmem:[#allocation50_spill] sm:$0xff] }
 0x308   :  { %1122 = vst [vmem:[#allocation16 + $0x18] sm:$0xff] %v1120_v9  ;;  %1146 = vmatmul.f32.vlgmr.msra.gmra.mxu0 %v1120_v9  ;;  %1166 = vmatmul.f32.vlgmr.msra.gmra.mxu1 %v1120_v9 }
 0x309   :  { %1186 = vmatmul.f32.vlgmr.msra.gmra.mxu2 %v1120_v9  ;;  %1206 = vmatmul.f32.vlgmr.msra.gmra.mxu3 %v1120_v9  ;;  %v3594_v9 = vld [vmem:[#allocation51_spill] sm:$0xff] }
 0x30a   :  { %1442 = vmatpush.msra.mxu0 %v2891_v26  ;;  %1462 = vmatpush.msra.mxu1 %v2894_v36 }
 0x30b   :  { %1482 = vmatpush.msra.mxu2 %v2897_v37  ;;  %1502 = vmatpush.msra.mxu3 %v2900_v38 }
 0x30c   :  { %1443 = vmatpush.msra.mxu0 %v2903_v40  ;;  %1463 = vmatpush.msra.mxu1 %v2906_v41 }
 0x30d   :  { %1483 = vmatpush.msra.mxu2 %v2909_v42  ;;  %1503 = vmatpush.msra.mxu3 %v2912_v43 }
 0x30e   :  { %1444 = vmatpush.msra.mxu0 %v2915_v44  ;;  %1464 = vmatpush.msra.mxu1 %v2918_v45 }
 0x30f   :  { %1484 = vmatpush.msra.mxu2 %v2921_v46  ;;  %1504 = vmatpush.msra.mxu3 %v2924_v47 }
 0x310   :  { %1445 = vmatpush.msra.mxu0 %v2927_v1  ;;  %1465 = vmatpush.msra.mxu1 %v2930_v4 }
 0x311   :  { %1485 = vmatpush.msra.mxu2 %v2933_v57  ;;  %1505 = vmatpush.msra.mxu3 %v2936_v61 }
 0x312   :  { %1446 = vmatpush.msra.mxu0 %v2939_v49  ;;  %1466 = vmatpush.msra.mxu1 %v2942_v3 }
 0x313   :  { %1486 = vmatpush.msra.mxu2 %v2945_v52  ;;  %1506 = vmatpush.msra.mxu3 %v2948_v53 }
 0x314   :  { %1447 = vmatpush.msra.mxu0 %v2951_v59  ;;  %1467 = vmatpush.msra.mxu1 %v2954_v55 }
 0x315   :  { %1487 = vmatpush.msra.mxu2 %v2957_v48  ;;  %1507 = vmatpush.msra.mxu3 %v2960_v39 }
 0x316   :  { %1448 = vmatpush.msra.mxu0 %v2963_v56  ;;  %1468 = vmatpush.msra.mxu1 %v2966_v0 }
 0x317   :  { %1488 = vmatpush.msra.mxu2 %v2969_v13  ;;  %1508 = vmatpush.msra.mxu3 %v2972_v62 }
 0x318   :  { %1449 = vmatpush.msra.mxu0 %v2975_v51  ;;  %1469 = vmatpush.msra.mxu1 %v2978_v50 }
 0x319   :  { %1489 = vmatpush.msra.mxu2 %v2981_v60  ;;  %1509 = vmatpush.msra.mxu3 %v2984_v58 }
 0x31a   :  { %1450 = vmatpush.msra.mxu0 %v2987_v63  ;;  %1470 = vmatpush.msra.mxu1 %v2990_v8 }
 0x31b   :  { %1490 = vmatpush.msra.mxu2 %v2993_v2  ;;  %1510 = vmatpush.msra.mxu3 %v2996_v54 }
 0x31c   :  { %1451 = vmatpush.msra.mxu0 %v2999_v5  ;;  %1471 = vmatpush.msra.mxu1 %v3002_v6 }
 0x31d   :  { %1491 = vmatpush.msra.mxu2 %v3570_v17  ;;  %1511 = vmatpush.msra.mxu3 %v3571_v18 }
 0x31e   :  { %1452 = vmatpush.msra.mxu0 %v3572_v7  ;;  %1472 = vmatpush.msra.mxu1 %v3573_v11 }
 0x31f   :  { %1492 = vmatpush.msra.mxu2 %v3574_v24  ;;  %1512 = vmatpush.msra.mxu3 %v3575_v32 }
 0x320   :  { %1453 = vmatpush.msra.mxu0 %v3576_v28  ;;  %1473 = vmatpush.msra.mxu1 %v3577_v10 }
 0x321   :  { %1493 = vmatpush.msra.mxu2 %v3578_v31  ;;  %1513 = vmatpush.msra.mxu3 %v3579_v35 }
 0x322   :  { %1454 = vmatpush.msra.mxu0 %v3580_v19  ;;  %1474 = vmatpush.msra.mxu1 %v3581_v27 }
 0x323   :  { %1494 = vmatpush.msra.mxu2 %v3582_v30  ;;  %1514 = vmatpush.msra.mxu3 %v3583_v20  ;;  %v3596_v20 = vld [vmem:[#allocation64_spill] sm:$0xff]  ;;  %v3597_v30 = vld [vmem:[#allocation65_spill] sm:$0xff] }
 0x324   :  { %1455 = vmatpush.msra.mxu0 %v3584_v12  ;;  %1475 = vmatpush.msra.mxu1 %v3585_v21  ;;  %v3595_v12 = vld [vmem:[#allocation52_spill] sm:$0xff] }
 0x325   :  { %1495 = vmatpush.msra.mxu2 %v3586_v23  ;;  %1515 = vmatpush.msra.mxu3 %v3587_v16 }
 0x326   :  { %1456 = vmatpush.msra.mxu0 %v3588_v25  ;;  %1476 = vmatpush.msra.mxu1 %v3589_v29 }
 0x327   :  { %1496 = vmatpush.msra.mxu2 %v3590_v15  ;;  %1516 = vmatpush.msra.mxu3 %v3591_v22  ;;  %v3598_v22 = vld [vmem:[#allocation66_spill] sm:$0xff] }
 0x328   :  { %1457 = vmatpush.msra.mxu0 %v3592_v14  ;;  %1477 = vmatpush.msra.mxu1 %v3593_v34 }
 0x329   :  { %1497 = vmatpush.msra.mxu2 %v3594_v9  ;;  %1517 = vmatpush.msra.mxu3 %v3595_v12 }
 0x385   :  { %v1147_v21 = vpop.f32.mrf.mxu0  ;;  %v1167_v23 = vpop.f32.mrf.mxu1 }
 0x386   :  { %v1210_v16 = vadd.f32 %v1147_v21, %v3596_v20  ;;  %v1211_v25 = vadd.f32 %v1167_v23, %v3597_v30  ;;  %v3599_v30 = vld [vmem:[#allocation67_spill] sm:$0xff] }
 0x388   :  { %v1858_v27 = vmul.f32 -1.442695, %v1210_v16  ;;  %v1859_v29 = vmul.f32 -1.442695, %v1211_v25 }
 0x38a   :  { %1947 = vpow2.f32 %v1858_v27 }
 0x38b   :  { %1949 = vpow2.f32 %v1859_v29 }
 0x38c   :  { %v1187_v15 = vpop.f32.mrf.mxu2  ;;  %v1207_v12 = vpop.f32.mrf.mxu3 }
 0x38d   :  { %v1212_v19 = vadd.f32 %v1187_v15, %v3598_v22  ;;  %v1213_v23 = vadd.f32 %v1207_v12, %v3599_v30 }
 0x38f   :  { %v1860_v14 = vmul.f32 -1.442695, %v1212_v19 }
 0x390   :  { %v1948_v35 = vpop.eup %1947 }
 0x391   :  { %v1950_v34 = vpop.eup %1949  ;;  %v1223_v31 = vadd.f32 1.0, %v1948_v35  ;;  %1951 = vpow2.f32 %v1860_v14 }
 0x392   :  { %v1224_v9 = vadd.f32 1.0, %v1950_v34 }
 0x393   :  { %1953 = vrcp.f32 %v1223_v31  ;;  %v1237_v19 = vand.u32 2147483648, %v1223_v31  ;;  %v1235_v14 = vand.u32 2147483647, %v1223_v31  ;;  %vm1231_vm3 = vweird.f32 %v1223_v31 }
 0x394   :  { %1955 = vrcp.f32 %v1224_v9  ;;  %v1252_v22 = vand.u32 2147483648, %v1224_v9  ;;  %v1250_v28 = vand.u32 2147483647, %v1224_v9  ;;  %vm1246_vm4 = vweird.f32 %v1224_v9 }
 0x395   :  { %v1238_v30 = vor.u32 1.1754944e-38, %v1237_v19  ;;  %vm1236_vm7 = vcmp.eq.f32.partialorder %v1235_v14, 8.507059e+37 }
 0x396   :  { %vm1251_vm8 = vcmp.eq.f32.partialorder %v1250_v28, 8.507059e+37 }
 0x397   :  { %v1952_v10 = vpop.eup %1951 }
 0x398   :  { %v1225_v20 = vadd.f32 1.0, %v1952_v10 }
 0x399   :  { %v1954_v21 = vpop.eup %1953 }
 0x39a   :  { %v1956_v16 = vpop.eup %1955  ;;  %v1227_v27 = vmul.f32 %v1954_v21, %v1223_v31  ;;  %1957 = vrcp.f32 %v1225_v20  ;;  %vm1232_vm1 = vweird.f32 %v1954_v21  ;;  %v1267_v19 = vand.u32 2147483648, %v1225_v20 }
 0x39b   :  { %v1242_v25 = vmul.f32 %v1956_v16, %v1224_v9  ;;  %1959 = vtanh.f32 %v1213_v23  ;;  %vm1247_vm2 = vweird.f32 %v1956_v16  ;;  %vm1233_vm5 = vmor %vm1231_vm3, %vm1232_vm1  ;;  %vm1261_vm10 = vweird.f32 %v1225_v20 }
 0x39c   :  { %v1228_v29 = vsub.f32 1.0, %v1227_v27  ;;  %vm1248_vm6 = vmor %vm1246_vm4, %vm1247_vm2  ;;  %v1253_v27 = vor.u32 1.1754944e-38, %v1252_v22  ;;  %v1268_v14 = vor.u32 1.1754944e-38, %v1267_v19 }
 0x39d   :  { %v1243_v15 = vsub.f32 1.0, %v1242_v25 }
 0x39e   :  { %v1229_v35 = vmul.f32 %v1954_v21, %v1228_v29 }
 0x39f   :  { %v1244_v34 = vmul.f32 %v1956_v16, %v1243_v15 }
 0x3a0   :  { %v1958_v32 = vpop.eup %1957  ;;  %v1230_v10 = vadd.f32 %v1954_v21, %v1229_v35 }
 0x3a1   :  { %v1257_v12 = vmul.f32 %v1958_v32, %v1225_v20  ;;  %v1245_v24 = vadd.f32 %v1956_v16, %v1244_v34  ;;  %v1960_v23 = vpop.eup %1959  ;;  %vm1262_vm9 = vweird.f32 %v1958_v32 }
 0x3a2   :  { %v1234_v25 = vsel %vm1233_vm5, %v1954_v21, %v1230_v10  ;;  %v1265_v21 = vand.u32 2147483647, %v1225_v20  ;;  %vm1263_vm11 = vmor %vm1261_vm10, %vm1262_vm9  ;;  %v3629_v10 = vld [vmem:[#allocation71_spill] sm:$0xff] }
 0x3a3   :  { %v1258_v11 = vsub.f32 1.0, %v1257_v12  ;;  %v1239_v29 = vsel %vm1236_vm7, %v1238_v30, %v1234_v25  ;;  %v1249_v7 = vsel %vm1248_vm6, %v1956_v16, %v1245_v24 }
 0x3a4   :  { %v1254_v15 = vsel %vm1251_vm8, %v1253_v27, %v1249_v7  ;;  %v1273_v18 = vmul.f32 %v1960_v23, %v1239_v29  ;;  %vm1266_vm12 = vcmp.eq.f32.partialorder %v1265_v21, 8.507059e+37 }
 0x3a5   :  { %v1259_v17 = vmul.f32 %v1958_v32, %v1258_v11  ;;  %v1272_v35 = vmul.f32 %v1254_v15, %v3160_v33 }
 0x3a7   :  { %v3232_v31 = vadd.f32 %v1273_v18, %v1272_v35  ;;  %v1260_v9 = vadd.f32 %v1958_v32, %v1259_v17 }
 0x3a9   :  { %1961 = vtanh.f32 %v3232_v31  ;;  %v1264_v22 = vsel %vm1263_vm11, %v1958_v32, %v1260_v9 }
 0x3aa   :  { %v1269_v28 = vsel %vm1266_vm12, %v1268_v14, %v1264_v22 }
 0x3af   :  { %v1962_v24 = vpop.eup %1961 }
 0x3b0   :  { %v1276_v7 = vmul.f32 %v1962_v24, %v1269_v28 }
 0x3b2   :  { %1278 = vst [vmem:[#allocation16 + $0x20] sm:$0xff] %v1276_v7  ;;  %1302 = vmatmul.f32.vlgmr.msrb.gmra.mxu0 %v1276_v7  ;;  %1322 = vmatmul.f32.vlgmr.msrb.gmra.mxu1 %v1276_v7 }
 0x3b3   :  { %1342 = vmatmul.f32.vlgmr.msrb.gmra.mxu2 %v1276_v7  ;;  %1362 = vmatmul.f32.vlgmr.msrb.gmra.mxu3 %v1276_v7 }
 0x3b4   :  { %1598 = vmatpush.msrb.mxu0 %v2891_v26  ;;  %1618 = vmatpush.msrb.mxu1 %v2894_v36  ;;  %v3600_v26 = vld [vmem:[#allocation27_spill] sm:$0xff]  ;;  %v3601_v36 = vld [vmem:[#allocation28_spill] sm:$0xff] }
 0x3b5   :  { %1638 = vmatpush.msrb.mxu2 %v2897_v37  ;;  %1658 = vmatpush.msrb.mxu3 %v2900_v38  ;;  %v3602_v37 = vld [vmem:[#allocation29_spill] sm:$0xff]  ;;  %v3603_v38 = vld [vmem:[#allocation30_spill] sm:$0xff] }
 0x3b6   :  { %1599 = vmatpush.msrb.mxu0 %v2903_v40  ;;  %1619 = vmatpush.msrb.mxu1 %v2906_v41  ;;  %v3604_v40 = vld [vmem:[#allocation31_spill] sm:$0xff]  ;;  %v3605_v41 = vld [vmem:[#allocation32_spill] sm:$0xff] }
 0x3b7   :  { %1639 = vmatpush.msrb.mxu2 %v2909_v42  ;;  %1659 = vmatpush.msrb.mxu3 %v2912_v43  ;;  %v3606_v42 = vld [vmem:[#allocation33_spill] sm:$0xff]  ;;  %v3607_v43 = vld [vmem:[#allocation34_spill] sm:$0xff] }
 0x3b8   :  { %1600 = vmatpush.msrb.mxu0 %v2915_v44  ;;  %1620 = vmatpush.msrb.mxu1 %v2918_v45  ;;  %v3608_v44 = vld [vmem:[#allocation35_spill] sm:$0xff]  ;;  %v3609_v45 = vld [vmem:[#allocation36_spill] sm:$0xff] }
 0x3b9   :  { %1640 = vmatpush.msrb.mxu2 %v2921_v46  ;;  %1660 = vmatpush.msrb.mxu3 %v2924_v47  ;;  %v3610_v46 = vld [vmem:[#allocation37_spill] sm:$0xff]  ;;  %v3611_v47 = vld [vmem:[#allocation38_spill] sm:$0xff] }
 0x3ba   :  { %1601 = vmatpush.msrb.mxu0 %v2927_v1  ;;  %1621 = vmatpush.msrb.mxu1 %v2930_v4  ;;  %v3612_v1 = vld [vmem:[#allocation39_spill] sm:$0xff]  ;;  %v3613_v4 = vld [vmem:[#allocation40_spill] sm:$0xff] }
 0x3bb   :  { %1641 = vmatpush.msrb.mxu2 %v2933_v57  ;;  %1661 = vmatpush.msrb.mxu3 %v2936_v61  ;;  %v3614_v57 = vld [vmem:[#allocation41_spill] sm:$0xff]  ;;  %v3615_v61 = vld [vmem:[#allocation42_spill] sm:$0xff] }
 0x3bc   :  { %1602 = vmatpush.msrb.mxu0 %v2939_v49  ;;  %1622 = vmatpush.msrb.mxu1 %v2942_v3  ;;  %v3616_v49 = vld [vmem:[#allocation43_spill] sm:$0xff]  ;;  %v3617_v3 = vld [vmem:[#allocation44_spill] sm:$0xff] }
 0x3bd   :  { %1642 = vmatpush.msrb.mxu2 %v2945_v52  ;;  %1662 = vmatpush.msrb.mxu3 %v2948_v53  ;;  %v3618_v52 = vld [vmem:[#allocation45_spill] sm:$0xff]  ;;  %v3619_v53 = vld [vmem:[#allocation46_spill] sm:$0xff] }
 0x3be   :  { %1603 = vmatpush.msrb.mxu0 %v2951_v59  ;;  %1623 = vmatpush.msrb.mxu1 %v2954_v55  ;;  %v3620_v59 = vld [vmem:[#allocation47_spill] sm:$0xff]  ;;  %v3621_v55 = vld [vmem:[#allocation48_spill] sm:$0xff] }
 0x3bf   :  { %1643 = vmatpush.msrb.mxu2 %v2957_v48  ;;  %1663 = vmatpush.msrb.mxu3 %v2960_v39  ;;  %v3622_v48 = vld [vmem:[#allocation49_spill] sm:$0xff]  ;;  %v3623_v39 = vld [vmem:[#allocation50_spill] sm:$0xff] }
 0x3c0   :  { %1604 = vmatpush.msrb.mxu0 %v2963_v56  ;;  %1624 = vmatpush.msrb.mxu1 %v2966_v0  ;;  %v3624_v56 = vld [vmem:[#allocation51_spill] sm:$0xff]  ;;  %v3625_v0 = vld [vmem:[#allocation52_spill] sm:$0xff] }
 0x3c1   :  { %1644 = vmatpush.msrb.mxu2 %v2969_v13  ;;  %1664 = vmatpush.msrb.mxu3 %v2972_v62 }
 0x3c2   :  { %1605 = vmatpush.msrb.mxu0 %v2975_v51  ;;  %1625 = vmatpush.msrb.mxu1 %v2978_v50  ;;  %v3626_v51 = vld [vmem:[#allocation68_spill] sm:$0xff] }
 0x3c3   :  { %1645 = vmatpush.msrb.mxu2 %v2981_v60  ;;  %1665 = vmatpush.msrb.mxu3 %v2984_v58  ;;  %v3627_v60 = vld [vmem:[#allocation69_spill] sm:$0xff] }
 0x3c4   :  { %1606 = vmatpush.msrb.mxu0 %v2987_v63  ;;  %1626 = vmatpush.msrb.mxu1 %v2990_v8 }
 0x3c5   :  { %1646 = vmatpush.msrb.mxu2 %v2993_v2  ;;  %1666 = vmatpush.msrb.mxu3 %v2996_v54  ;;  %v3628_v54 = vld [vmem:[#allocation70_spill] sm:$0xff] }
 0x3c6   :  { %1607 = vmatpush.msrb.mxu0 %v2999_v5  ;;  %1627 = vmatpush.msrb.mxu1 %v3002_v6 }
 0x3c7   :  { %1647 = vmatpush.msrb.mxu2 %v3600_v26  ;;  %1667 = vmatpush.msrb.mxu3 %v3601_v36 }
 0x3c8   :  { %1608 = vmatpush.msrb.mxu0 %v3602_v37  ;;  %1628 = vmatpush.msrb.mxu1 %v3603_v38 }
 0x3c9   :  { %1648 = vmatpush.msrb.mxu2 %v3604_v40  ;;  %1668 = vmatpush.msrb.mxu3 %v3605_v41 }
 0x3ca   :  { %1609 = vmatpush.msrb.mxu0 %v3606_v42  ;;  %1629 = vmatpush.msrb.mxu1 %v3607_v43 }
 0x3cb   :  { %1649 = vmatpush.msrb.mxu2 %v3608_v44  ;;  %1669 = vmatpush.msrb.mxu3 %v3609_v45 }
 0x3cc   :  { %1610 = vmatpush.msrb.mxu0 %v3610_v46  ;;  %1630 = vmatpush.msrb.mxu1 %v3611_v47 }
 0x3cd   :  { %1650 = vmatpush.msrb.mxu2 %v3612_v1  ;;  %1670 = vmatpush.msrb.mxu3 %v3613_v4 }
 0x3ce   :  { %1611 = vmatpush.msrb.mxu0 %v3614_v57  ;;  %1631 = vmatpush.msrb.mxu1 %v3615_v61 }
 0x3cf   :  { %1651 = vmatpush.msrb.mxu2 %v3616_v49  ;;  %1671 = vmatpush.msrb.mxu3 %v3617_v3 }
 0x3d0   :  { %1612 = vmatpush.msrb.mxu0 %v3618_v52  ;;  %1632 = vmatpush.msrb.mxu1 %v3619_v53 }
 0x3d1   :  { %1652 = vmatpush.msrb.mxu2 %v3620_v59  ;;  %1672 = vmatpush.msrb.mxu3 %v3621_v55  ;;  %v3630_v55 = vld [vmem:[#allocation72_spill] sm:$0xff] }
 0x3d2   :  { %1613 = vmatpush.msrb.mxu0 %v3622_v48  ;;  %1633 = vmatpush.msrb.mxu1 %v3623_v39  ;;  %v3631_v39 = vld [vmem:[#allocation73_spill] sm:$0xff] }
 0x3d3   :  { %1653 = vmatpush.msrb.mxu2 %v3624_v56  ;;  %1673 = vmatpush.msrb.mxu3 %v3625_v0 }
 0x42f   :  { %v1303_v13 = vpop.f32.mrf.mxu0  ;;  %v1323_v62 = vpop.f32.mrf.mxu1 }
 0x430   :  { %v1366_v50 = vadd.f32 %v1303_v13, %v3626_v51  ;;  %v1367_v58 = vadd.f32 %v1323_v62, %v3627_v60  ;;  %v3632_v51 = vld [vmem:[#allocation74_spill] sm:$0xff] }
 0x432   :  { %v1861_v63 = vmul.f32 -1.442695, %v1366_v50  ;;  %v1862_v8 = vmul.f32 -1.442695, %v1367_v58 }
 0x434   :  { %1963 = vpow2.f32 %v1861_v63 }
 0x435   :  { %1965 = vpow2.f32 %v1862_v8 }
 0x436   :  { %v1343_v2 = vpop.f32.mrf.mxu2  ;;  %v1363_v32 = vpop.f32.mrf.mxu3 }
 0x437   :  { %v1368_v5 = vadd.f32 %v1343_v2, %v3628_v54  ;;  %v1369_v12 = vadd.f32 %v1363_v32, %v3629_v10 }
 0x439   :  { %v1863_v6 = vmul.f32 -1.442695, %v1368_v5 }
 0x43a   :  { %v1964_v33 = vpop.eup %1963 }
 0x43b   :  { %v1966_v17 = vpop.eup %1965  ;;  %v1379_v18 = vadd.f32 1.0, %v1964_v33  ;;  %1967 = vpow2.f32 %v1863_v6 }
 0x43c   :  { %v1380_v11 = vadd.f32 1.0, %v1966_v17  ;;  %v3633_v17 = vld [vmem:[#allocation75_spill] sm:$0xff] }
 0x43d   :  { %1969 = vrcp.f32 %v1379_v18  ;;  %v1393_v15 = vand.u32 2147483648, %v1379_v18  ;;  %v1391_v19 = vand.u32 2147483647, %v1379_v18  ;;  %vm1387_vm15 = vweird.f32 %v1379_v18 }
 0x43e   :  { %1971 = vrcp.f32 %v1380_v11  ;;  %v1408_v35 = vand.u32 2147483648, %v1380_v11  ;;  %v1406_v22 = vand.u32 2147483647, %v1380_v11  ;;  %vm1402_vm0 = vweird.f32 %v1380_v11 }
 0x43f   :  { %v1394_v7 = vor.u32 1.1754944e-38, %v1393_v15  ;;  %vm1392_vm3 = vcmp.eq.f32.partialorder %v1391_v19, 8.507059e+37 }
 0x440   :  { %v1409_v36 = vor.u32 1.1754944e-38, %v1408_v35  ;;  %vm1407_vm4 = vcmp.eq.f32.partialorder %v1406_v22, 8.507059e+37 }
 0x441   :  { %v1968_v20 = vpop.eup %1967 }
 0x442   :  { %v1381_v16 = vadd.f32 1.0, %v1968_v20 }
 0x443   :  { %v1970_v34 = vpop.eup %1969 }
 0x444   :  { %v1972_v30 = vpop.eup %1971  ;;  %v1383_v27 = vmul.f32 %v1970_v34, %v1379_v18  ;;  %1973 = vrcp.f32 %v1381_v16  ;;  %vm1388_vm13 = vweird.f32 %v1970_v34  ;;  %v1423_v4 = vand.u32 2147483648, %v1381_v16 }
 0x445   :  { %v1398_v25 = vmul.f32 %v1972_v30, %v1380_v11  ;;  %1975 = vtanh.f32 %v1369_v12  ;;  %vm1403_vm14 = vweird.f32 %v1972_v30  ;;  %vm1389_vm1 = vmor %vm1387_vm15, %vm1388_vm13  ;;  %vm1417_vm6 = vweird.f32 %v1381_v16 }
 0x446   :  { %v1384_v23 = vsub.f32 1.0, %v1383_v27  ;;  %vm1404_vm2 = vmor %vm1402_vm0, %vm1403_vm14  ;;  %v1421_v57 = vand.u32 2147483647, %v1381_v16  ;;  %v1424_v49 = vor.u32 1.1754944e-38, %v1423_v4 }
 0x447   :  { %v1399_v29 = vsub.f32 1.0, %v1398_v25 }
 0x448   :  { %v1385_v9 = vmul.f32 %v1970_v34, %v1384_v23  ;;  %vm1422_vm8 = vcmp.eq.f32.partialorder %v1421_v57, 8.507059e+37 }
 0x449   :  { %v1400_v21 = vmul.f32 %v1972_v30, %v1399_v29 }
 0x44a   :  { %v1974_v14 = vpop.eup %1973  ;;  %v1386_v24 = vadd.f32 %v1970_v34, %v1385_v9 }
 0x44b   :  { %v1413_v28 = vmul.f32 %v1974_v14, %v1381_v16  ;;  %v1401_v26 = vadd.f32 %v1972_v30, %v1400_v21  ;;  %v1976_v38 = vpop.eup %1975  ;;  %vm1418_vm5 = vweird.f32 %v1974_v14 }
 0x44c   :  { %v1390_v37 = vsel %vm1389_vm1, %v1970_v34, %v1386_v24  ;;  %vm1419_vm7 = vmor %vm1417_vm6, %vm1418_vm5 }
 0x44d   :  { %v1414_v40 = vsub.f32 1.0, %v1413_v28  ;;  %v1395_v41 = vsel %vm1392_vm3, %v1394_v7, %v1390_v37  ;;  %v1405_v42 = vsel %vm1404_vm2, %v1972_v30, %v1401_v26 }
 0x44e   :  { %v1410_v43 = vsel %vm1407_vm4, %v1409_v36, %v1405_v42  ;;  %v1429_v44 = vmul.f32 %v1976_v38, %v1395_v41 }
 0x44f   :  { %v1415_v45 = vmul.f32 %v1974_v14, %v1414_v40  ;;  %v1428_v46 = vmul.f32 %v1410_v43, %v3232_v31 }
 0x451   :  { %v3304_v47 = vadd.f32 %v1429_v44, %v1428_v46  ;;  %v1416_v1 = vadd.f32 %v1974_v14, %v1415_v45 }
 0x453   :  { %1977 = vtanh.f32 %v3304_v47  ;;  %v1420_v61 = vsel %vm1419_vm7, %v1974_v14, %v1416_v1 }
 0x454   :  { %v1425_v52 = vsel %vm1422_vm8, %v1424_v49, %v1420_v61  ;;  %v3634_v61 = vld [vmem:[#allocation76_spill] sm:$0xff] }
 0x459   :  { %v1978_v3 = vpop.eup %1977 }
 0x45a   :  { %v1432_v53 = vmul.f32 %v1978_v3, %v1425_v52  ;;  %v3635_v3 = vld [vmem:[#allocation77_spill] sm:$0xff] }
 0x45c   :  { %1434 = vst [vmem:[#allocation16 + $0x28] sm:$0xff] %v1432_v53  ;;  %1458 = vmatmul.f32.vlgmr.msra.gmra.mxu0 %v1432_v53  ;;  %1478 = vmatmul.f32.vlgmr.msra.gmra.mxu1 %v1432_v53 }
 0x45d   :  { %1498 = vmatmul.f32.vlgmr.msra.gmra.mxu2 %v1432_v53  ;;  %1518 = vmatmul.f32.vlgmr.msra.gmra.mxu3 %v1432_v53 }
 0x4d9   :  { %v1459_v31 = vpop.f32.mrf.mxu0  ;;  %v1479_v59 = vpop.f32.mrf.mxu1 }
 0x4da   :  { %v1522_v48 = vadd.f32 %v1459_v31, %v3630_v55  ;;  %v1523_v56 = vadd.f32 %v1479_v59, %v3631_v39  ;;  %v3636_v55 = vld [vmem:[#allocation78_spill] sm:$0xff] }
 0x4dc   :  { %v1864_v0 = vmul.f32 -1.442695, %v1522_v48  ;;  %v1865_v13 = vmul.f32 -1.442695, %v1523_v56 }
 0x4de   :  { %1979 = vpow2.f32 %v1864_v0 }
 0x4df   :  { %1981 = vpow2.f32 %v1865_v13 }
 0x4e0   :  { %v1499_v62 = vpop.f32.mrf.mxu2  ;;  %v1519_v54 = vpop.f32.mrf.mxu3 }
 0x4e1   :  { %v1524_v50 = vadd.f32 %v1499_v62, %v3632_v51  ;;  %v1525_v18 = vadd.f32 %v1519_v54, %v3633_v17 }
 0x4e3   :  { %v1866_v60 = vmul.f32 -1.442695, %v1524_v50 }
 0x4e4   :  { %v1980_v58 = vpop.eup %1979 }
 0x4e5   :  { %v1982_v63 = vpop.eup %1981  ;;  %v1535_v8 = vadd.f32 1.0, %v1980_v58  ;;  %1983 = vpow2.f32 %v1866_v60 }
 0x4e6   :  { %v1536_v2 = vadd.f32 1.0, %v1982_v63  ;;  %v3637_v63 = vld [vmem:[#allocation79_spill] sm:$0xff] }
 0x4e7   :  { %1985 = vrcp.f32 %v1535_v8  ;;  %v1549_v10 = vand.u32 2147483648, %v1535_v8  ;;  %v1547_v27 = vand.u32 2147483647, %v1535_v8  ;;  %vm1543_vm11 = vweird.f32 %v1535_v8 }
 0x4e8   :  { %1987 = vrcp.f32 %v1536_v2  ;;  %v1564_v12 = vand.u32 2147483648, %v1536_v2  ;;  %v1562_v23 = vand.u32 2147483647, %v1536_v2  ;;  %vm1558_vm12 = vweird.f32 %v1536_v2 }
 0x4e9   :  { %v1550_v9 = vor.u32 1.1754944e-38, %v1549_v10  ;;  %vm1548_vm15 = vcmp.eq.f32.partialorder %v1547_v27, 8.507059e+37 }
 0x4ea   :  { %v1565_v21 = vor.u32 1.1754944e-38, %v1564_v12  ;;  %vm1563_vm0 = vcmp.eq.f32.partialorder %v1562_v23, 8.507059e+37 }
 0x4eb   :  { %v1984_v5 = vpop.eup %1983 }
 0x4ec   :  { %v1537_v6 = vadd.f32 1.0, %v1984_v5 }
 0x4ed   :  { %v1986_v33 = vpop.eup %1985 }
 0x4ee   :  { %v1988_v11 = vpop.eup %1987  ;;  %v1539_v32 = vmul.f32 %v1986_v33, %v1535_v8  ;;  %1989 = vrcp.f32 %v1537_v6  ;;  %vm1544_vm9 = vweird.f32 %v1986_v33  ;;  %v1579_v42 = vand.u32 2147483648, %v1537_v6 }
 0x4ef   :  { %v1554_v20 = vmul.f32 %v1988_v11, %v1536_v2  ;;  %1991 = vtanh.f32 %v1525_v18  ;;  %vm1559_vm10 = vweird.f32 %v1988_v11  ;;  %vm1545_vm13 = vmor %vm1543_vm11, %vm1544_vm9  ;;  %vm1573_vm2 = vweird.f32 %v1537_v6 }
 0x4f0   :  { %v1540_v16 = vsub.f32 1.0, %v1539_v32  ;;  %vm1560_vm14 = vmor %vm1558_vm12, %vm1559_vm10  ;;  %v1577_v43 = vand.u32 2147483647, %v1537_v6  ;;  %v1580_v45 = vor.u32 1.1754944e-38, %v1579_v42 }
 0x4f1   :  { %v1555_v34 = vsub.f32 1.0, %v1554_v20 }
 0x4f2   :  { %v1541_v30 = vmul.f32 %v1986_v33, %v1540_v16  ;;  %vm1578_vm4 = vcmp.eq.f32.partialorder %v1577_v43, 8.507059e+37 }
 0x4f3   :  { %v1556_v25 = vmul.f32 %v1988_v11, %v1555_v34 }
 0x4f4   :  { %v1990_v29 = vpop.eup %1989  ;;  %v1542_v15 = vadd.f32 %v1986_v33, %v1541_v30 }
 0x4f5   :  { %v1569_v35 = vmul.f32 %v1990_v29, %v1537_v6  ;;  %v1557_v19 = vadd.f32 %v1988_v11, %v1556_v25  ;;  %v1992_v14 = vpop.eup %1991  ;;  %vm1574_vm1 = vweird.f32 %v1990_v29 }
 0x4f6   :  { %v1546_v22 = vsel %vm1545_vm13, %v1986_v33, %v1542_v15  ;;  %vm1575_vm3 = vmor %vm1573_vm2, %vm1574_vm1 }
 0x4f7   :  { %v1570_v24 = vsub.f32 1.0, %v1569_v35  ;;  %v1551_v28 = vsel %vm1548_vm15, %v1550_v9, %v1546_v22  ;;  %v1561_v7 = vsel %vm1560_vm14, %v1988_v11, %v1557_v19 }
 0x4f8   :  { %v1566_v26 = vsel %vm1563_vm0, %v1565_v21, %v1561_v7  ;;  %v1585_v36 = vmul.f32 %v1992_v14, %v1551_v28 }
 0x4f9   :  { %v1571_v37 = vmul.f32 %v1990_v29, %v1570_v24  ;;  %v1584_v38 = vmul.f32 %v1566_v26, %v3304_v47 }
 0x4fb   :  { %v3312_v40 = vadd.f32 %v1585_v36, %v1584_v38  ;;  %v1572_v41 = vadd.f32 %v1990_v29, %v1571_v37 }
 0x4fd   :  { %1993 = vtanh.f32 %v3312_v40  ;;  %v1576_v44 = vsel %vm1575_vm3, %v1990_v29, %v1572_v41 }
 0x4fe   :  { %v1581_v1 = vsel %vm1578_vm4, %v1580_v45, %v1576_v44 }
 0x503   :  { %v1994_v46 = vpop.eup %1993 }
 0x504   :  { %v1588_v4 = vmul.f32 %v1994_v46, %v1581_v1 }
 0x506   :  { %1590 = vst [vmem:[#allocation16 + $0x30] sm:$0xff] %v1588_v4  ;;  %1614 = vmatmul.f32.vlgmr.msrb.gmra.mxu0 %v1588_v4  ;;  %1634 = vmatmul.f32.vlgmr.msrb.gmra.mxu1 %v1588_v4 }
 0x507   :  { %1654 = vmatmul.f32.vlgmr.msrb.gmra.mxu2 %v1588_v4  ;;  %1674 = vmatmul.f32.vlgmr.msrb.gmra.mxu3 %v1588_v4 }
 0x583   :  { %v1615_v47 = vpop.f32.mrf.mxu0  ;;  %v1635_v57 = vpop.f32.mrf.mxu1 }
 0x584   :  { %v1678_v49 = vadd.f32 %v1615_v47, %v3634_v61  ;;  %v1679_v52 = vadd.f32 %v1635_v57, %v3635_v3 }
 0x586   :  { %v1867_v53 = vmul.f32 -1.442695, %v1678_v49  ;;  %v1868_v31 = vmul.f32 -1.442695, %v1679_v52 }
 0x588   :  { %1995 = vpow2.f32 %v1867_v53 }
 0x589   :  { %1997 = vpow2.f32 %v1868_v31 }
 0x58a   :  { %v1655_v59 = vpop.f32.mrf.mxu2  ;;  %v1675_v51 = vpop.f32.mrf.mxu3 }
 0x58b   :  { %v1680_v48 = vadd.f32 %v1655_v59, %v3636_v55  ;;  %v1681_v8 = vadd.f32 %v1675_v51, %v3637_v63 }
 0x58d   :  { %v1869_v39 = vmul.f32 -1.442695, %v1680_v48 }
 0x58e   :  { %v1996_v56 = vpop.eup %1995 }
 0x58f   :  { %v1998_v0 = vpop.eup %1997  ;;  %v1691_v13 = vadd.f32 1.0, %v1996_v56  ;;  %1999 = vpow2.f32 %v1869_v39 }
 0x590   :  { %v1692_v62 = vadd.f32 1.0, %v1998_v0 }
 0x591   :  { %2001 = vrcp.f32 %v1691_v13  ;;  %v1705_v17 = vand.u32 2147483648, %v1691_v13  ;;  %v1703_v32 = vand.u32 2147483647, %v1691_v13  ;;  %vm1699_vm7 = vweird.f32 %v1691_v13 }
 0x592   :  { %2003 = vrcp.f32 %v1692_v62  ;;  %v1720_v18 = vand.u32 2147483648, %v1692_v62  ;;  %v1718_v16 = vand.u32 2147483647, %v1692_v62  ;;  %vm1714_vm8 = vweird.f32 %v1692_v62 }
 0x593   :  { %v1706_v30 = vor.u32 1.1754944e-38, %v1705_v17  ;;  %vm1704_vm11 = vcmp.eq.f32.partialorder %v1703_v32, 8.507059e+37 }
 0x594   :  { %v1721_v25 = vor.u32 1.1754944e-38, %v1720_v18  ;;  %vm1719_vm12 = vcmp.eq.f32.partialorder %v1718_v16, 8.507059e+37 }
 0x595   :  { %v2000_v50 = vpop.eup %1999 }
 0x596   :  { %v1693_v60 = vadd.f32 1.0, %v2000_v50 }
 0x597   :  { %v2002_v58 = vpop.eup %2001 }
 0x598   :  { %v2004_v2 = vpop.eup %2003  ;;  %v1695_v54 = vmul.f32 %v2002_v58, %v1691_v13  ;;  %2005 = vrcp.f32 %v1693_v60  ;;  %vm1700_vm5 = vweird.f32 %v2002_v58  ;;  %v1735_v7 = vand.u32 2147483648, %v1693_v60 }
 0x599   :  { %v1710_v5 = vmul.f32 %v2004_v2, %v1692_v62  ;;  %2007 = vtanh.f32 %v1681_v8  ;;  %vm1715_vm6 = vweird.f32 %v2004_v2  ;;  %vm1701_vm9 = vmor %vm1699_vm7, %vm1700_vm5  ;;  %vm1729_vm14 = vweird.f32 %v1693_v60 }
 0x59a   :  { %v1696_v6 = vsub.f32 1.0, %v1695_v54  ;;  %vm1716_vm10 = vmor %vm1714_vm8, %vm1715_vm6  ;;  %v1733_v26 = vand.u32 2147483647, %v1693_v60  ;;  %v1736_v37 = vor.u32 1.1754944e-38, %v1735_v7 }
 0x59b   :  { %v1711_v33 = vsub.f32 1.0, %v1710_v5 }
 0x59c   :  { %v1697_v11 = vmul.f32 %v2002_v58, %v1696_v6  ;;  %vm1734_vm0 = vcmp.eq.f32.partialorder %v1733_v26, 8.507059e+37 }
 0x59d   :  { %v1712_v20 = vmul.f32 %v2004_v2, %v1711_v33 }
 0x59e   :  { %v2006_v34 = vpop.eup %2005  ;;  %v1698_v10 = vadd.f32 %v2002_v58, %v1697_v11 }
 0x59f   :  { %v1725_v12 = vmul.f32 %v2006_v34, %v1693_v60  ;;  %v1713_v27 = vadd.f32 %v2004_v2, %v1712_v20  ;;  %v2008_v29 = vpop.eup %2007  ;;  %vm1730_vm13 = vweird.f32 %v2006_v34 }
 0x5a0   :  { %v1702_v23 = vsel %vm1701_vm9, %v2002_v58, %v1698_v10  ;;  %vm1731_vm15 = vmor %vm1729_vm14, %vm1730_vm13 }
 0x5a1   :  { %v1726_v15 = vsub.f32 1.0, %v1725_v12  ;;  %v1707_v35 = vsel %vm1704_vm11, %v1706_v30, %v1702_v23  ;;  %v1717_v9 = vsel %vm1716_vm10, %v2004_v2, %v1713_v27 }
 0x5a2   :  { %v1722_v19 = vsel %vm1719_vm12, %v1721_v25, %v1717_v9  ;;  %v1741_v21 = vmul.f32 %v2008_v29, %v1707_v35 }
 0x5a3   :  { %v1740_v22 = vmul.f32 %v1722_v19, %v3312_v40  ;;  %v1727_v14 = vmul.f32 %v2006_v34, %v1726_v15 }
 0x5a5   :  { %v1742_v24 = vadd.f32 %v1741_v21, %v1740_v22  ;;  %v1728_v28 = vadd.f32 %v2006_v34, %v1727_v14 }
 0x5a7   :  { %2009 = vtanh.f32 %v1742_v24  ;;  %1753 = vst [vmem:[#allocation19] sm:$0xff] %v1742_v24  ;;  %v1732_v36 = vsel %vm1731_vm15, %v2006_v34, %v1728_v28 }
 0x5a8   :  { %v1737_v40 = vsel %vm1734_vm0, %v1736_v37, %v1732_v36 }
 0x5ad   :  { %v2010_v38 = vpop.eup %2009 }
 0x5ae   :  { %v1744_v41 = vmul.f32 %v2010_v38, %v1737_v40 }
 0x5b0   :  { %1746 = vst [vmem:[#allocation16 + $0x38] sm:$0xff] %v1744_v41 }
 0x5b1   :  { %1752 = vst [vmem:[#allocation17] sm:$0xff] %v1744_v41  ;;  %1766 = dma.vmem_to_hbm [thread:$0]  %s1759_s5, 1024, %s1761_s15, [#allocation7], %s2306_s22, %s2306_s22, %s2307_s3  }
 0x5b2   :  { %1777 = dma.vmem_to_hbm [thread:$0]  %s1773_s17, 128, %s1775_s19, [#allocation18]  }
 0x5b3   :  { %1788 = dma.vmem_to_hbm [thread:$0]  %s1784_s21, 128, %s1786_s0, [#allocation18]  }
 0x5b4   :  { %2299 = dma.done.wait [#allocation7], 1024  }
 0x5b5   :  { %2300 = vsyncadd [#allocation7], 4294966272 }
 0x5b6   :  { %2301 = dma.done.wait [#allocation18], 256  }
 0x5b7   :  { %2302 = vsyncadd [#allocation18], 4294967040 }
 0x5b8   :  { %1801 = vsyncpa [#allocation6], 1 }
 0x5b9   :  { %1802 = vsyncpa [#allocation9], 1 }
 0x5ba   :  { %1803 = vsyncpa [#allocation12], 1 }
 0x5bb   :  { %1804 = vsyncpa [#allocation15], 1 }
 0x5bc   :  { %1805 = vsyncpa [#allocation7], 1 }
 0x5bd   :  { %1806 = vsyncpa [#allocation18], 1 }

</bundles_post_ra>
